<compile_context>
chip_gen: v7x
topology: tpu7x:2x2x1
jax: 0.10.0
libtpu: 0.0.40
codegen_flags: <defaults>
</compile_context>

<pallas_src>
import jax
import jax.numpy as jnp
from jax import lax
from jax.experimental import pallas as pl
from jax.experimental.pallas import tpu as pltpu


# ---------------------------------------------------------------------------
# Helpers
# ---------------------------------------------------------------------------
def _full_spec(shape):
    """BlockSpec covering the whole array (grid=(1,))."""
    nd = len(shape)

    def idx(i):
        return (0,) * nd

    return pl.BlockSpec(tuple(shape), idx)


# ---------------------------------------------------------------------------
# Kernel 1: fused feature trunk (one image per grid step)
#   stem Conv3x3(pad=1)  +  unitTimes x MLB_B_Inception (eval mode)
# ---------------------------------------------------------------------------
def _make_features_kernel(H, W, cin, c0, k, cmids):
    n_units = len(cmids)
    HW = H * W

    def kernel(*refs):
        x_ref, sw_ref, sb_ref = refs[0], refs[1], refs[2]
        o_ref = refs[3 + 6 * n_units]
        pad_ref = refs[4 + 6 * n_units]     # (1, H+2, W+2, cpad_mid) f32, borders stay 0
        acc_ref = refs[5 + 6 * n_units]     # (HW, Cpad) f32, lane-dense running concat

        def conv3x3(cdepth, w_ref, b_ref):
            # 9-tap accumulating matmul.  pad interior [:, 1:H+1, 1:W+1, :cdepth] was
            # fully overwritten just before this call; border is zero from the single
            # per-step init.  One sublane shift per dx, free dy slices, bf16 MXU taps.
            acc = jnp.zeros((HW, w_ref.shape[-1]), jnp.float32)
            for dx in range(3):
                sh = pad_ref[:, :, dx:dx + W, :cdepth].astype(jnp.bfloat16)  # (1,H+2,W,cd)
                for dy in range(3):
                    tap = sh[:, dy:dy + H].reshape(HW, cdepth)               # free slice
                    acc += jnp.dot(tap, w_ref[dy * 3 + dx],
                                   preferred_element_type=jnp.float32)
            return acc + b_ref[...]

        # ---- zero pad + accumulator ONCE (no per-unit memsets) ----
        pad_ref[...] = jnp.zeros_like(pad_ref)
        acc_ref[...] = jnp.zeros_like(acc_ref)      # also zeroes lanes >= ctot (head fold)

        # ---- stem: Conv3x3(cin -> c0, pad=1) ; Dropout = identity (eval) ----
        pad_ref[:, 1:H + 1, 1:W + 1, :cin] = x_ref[...]
        acc_ref[:, :c0] = conv3x3(cin, sw_ref, sb_ref)

        # ---- MLB_B_Inception units ----
        c = c0
        for i in range(n_units):
            s1, b1, w1, bp, w2, b2 = refs[3 + 6 * i: 9 + 6 * i]
            cm = cmids[i]

            cur = acc_ref[:, :c]                                    # lane-dense prefix view
            h = jnp.maximum(cur * s1[...] + b1[...], 0.0)           # BN1 + ReLU (f32)
            # Conv1x1 with BN2 scale/bias and conv bias pre-folded, then ReLU
            mid = jnp.maximum(
                jnp.dot(h.astype(jnp.bfloat16), w1[...],
                        preferred_element_type=jnp.float32) + bp[...], 0.0)  # (HW, cm)

            # overwrite the pad interior channels [:cm] (no re-zeroing needed)
            pad_ref[:, 1:H + 1, 1:W + 1, :cm] = mid.reshape(1, H, W, cm)
            # x_UseRes + x_UseDense == 2 * conv1(x) in eval mode
            acc_ref[:, c:c + k] = 2.0 * conv3x3(cm, w2, b2)
            c += k

        # single lane-dense store of the whole feature slab (padded to 128 lanes)
        o_ref[...] = acc_ref[...].reshape(o_ref.shape).astype(o_ref.dtype)

    return kernel


# ---------------------------------------------------------------------------
# Kernel 2: head
#   final BN + ReLU (per-feature, flattened padded-NHWC order)
#   + [AvgPool2d(2) + NCHW-flatten + Linear1] folded into one matmul
#   + Linear2 + Linear3     (classifier dropouts = identity in eval)
# ---------------------------------------------------------------------------
def _head_kernel(xf_ref, s_ref, b_ref, w1_ref, b1_ref, w2_ref, b2_ref,
                 w3_ref, b3_ref, o_ref):
    t = jnp.maximum(xf_ref[...] * s_ref[...] + b_ref[...], 0.0)       # BN + ReLU (f32)
    h1 = jnp.dot(t.astype(jnp.bfloat16), w1_ref[...],
                 preferred_element_type=jnp.float32) + b1_ref[...]
    h2 = jnp.dot(h1.astype(jnp.bfloat16), w2_ref[...],
                 preferred_element_type=jnp.float32) + b2_ref[...]
    o_ref[...] = jnp.dot(h2.astype(jnp.bfloat16), w3_ref[...],
                         preferred_element_type=jnp.float32) + b3_ref[...]


# ---------------------------------------------------------------------------
# Wrapper (NCHW in, logits out, like the PyTorch module)
# ---------------------------------------------------------------------------
def mixnet_forward(x_nchw, p):
    N, cin, H, W = x_nchw.shape
    c0 = p["stem_w"].shape[0]                 # 2*k
    k = p["units"][0]["w2"].shape[0]
    num_classes = p["fc3_w"].shape[0]
    HW = H * W

    x = jnp.transpose(x_nchw, (0, 2, 3, 1)).astype(jnp.float32)       # NCHW -> NHWC

    # (O, I, 3, 3) -> (9, I, O) bf16, tap order t = dy*3 + dx (matches the kernel)
    def tap_w(w_oihw):
        o, i = w_oihw.shape[0], w_oihw.shape[1]
        return jnp.transpose(w_oihw, (2, 3, 1, 0)).reshape(9, i, o).astype(jnp.bfloat16)

    # -------- feature-trunk parameters (glue / algebraic folds) --------
    feat_args = [x, tap_w(p["stem_w"]), p["stem_b"].reshape(1, c0)]
    cmids = []
    c = c0
    for u in p["units"]:
        cm = u["w1"].shape[0]
        cmids.append(cm)
        w1f = (u["w1"].reshape(cm, c).T * u["bn2_s"][None, :]).astype(jnp.bfloat16)
        b1f = (u["b1"] * u["bn2_s"] + u["bn2_b"]).reshape(1, cm)      # bias + BN2 bias
        feat_args += [u["bn1_s"].reshape(1, c), u["bn1_b"].reshape(1, c),
                      w1f, b1f, tap_w(u["w2"]), u["b2"].reshape(1, k)]
        c += k
    ctot = c
    cpad_mid = max([cin] + cmids)                       # pad-scratch channel width
    cpad_out = ((ctot + 127) // 128) * 128              # lane-dense output width

    in_specs = [pl.BlockSpec((1, H, W, cin), lambda b: (b, 0, 0, 0))]
    for a in feat_args[1:]:
        in_specs.append(pl.BlockSpec(tuple(a.shape), lambda b, n=a.ndim: (0,) * n))

    feats = pl.pallas_call(
        _make_features_kernel(H, W, cin, c0, k, tuple(cmids)),
        out_shape=jax.ShapeDtypeStruct((N, HW, cpad_out), jnp.float32),
        grid_spec=pltpu.PrefetchScalarGridSpec(
            num_scalar_prefetch=0,
            grid=(N,),                                   # batch split across the grid
            in_specs=in_specs,
            out_specs=pl.BlockSpec((1, HW, cpad_out), lambda b: (b, 0, 0)),
            scratch_shapes=[pltpu.VMEM((1, H + 2, W + 2, cpad_mid), jnp.float32),
                            pltpu.VMEM((HW, cpad_out), jnp.float32)],
        ),
        compiler_params=pltpu.CompilerParams(dimension_semantics=("parallel",)),
    )(*feat_args)

    # -------- head parameters (glue / exact folds, padded channels fold to zero) ----
    flat = feats.reshape(N, HW * cpad_out)              # free HBM view

    s_pad = jnp.concatenate([p["bn_s"], jnp.ones((cpad_out - ctot,), jnp.float32)])
    b_pad = jnp.concatenate([p["bn_b"], jnp.zeros((cpad_out - ctot,), jnp.float32)])
    s_flat = jnp.tile(s_pad, HW).reshape(1, -1)
    b_flat = jnp.tile(b_pad, HW).reshape(1, -1)

    # Fold AvgPool2d(2) + NCHW-flatten into the first Linear's weight (exact):
    #   W1f[(h*W + w)*Cpad + c, o] = 0.25 * fc1_w[o, c*H2*W2 + (h//2)*W2 + (w//2)], c<ctot
    #   rows for padded channels c>=ctot are zero (matching the zeroed acc lanes).
    H2, W2 = H // 2, W // 2
    a1 = p["fc1_w"].reshape(-1, ctot, H2, W2)
    a1 = jnp.repeat(jnp.repeat(a1, 2, axis=2), 2, axis=3)             # (O, ctot, H, W)
    a1 = jnp.pad(a1, ((0, 0), (0, cpad_out - ctot), (0, 0), (0, 0)))  # (O, Cpad, H, W)
    w1f = (0.25 * jnp.transpose(a1, (2, 3, 1, 0)).reshape(HW * cpad_out, -1)
           ).astype(jnp.bfloat16)

    head_args = [flat, s_flat, b_flat,
                 w1f, p["fc1_b"].reshape(1, -1),
                 p["fc2_w"].T.astype(jnp.bfloat16), p["fc2_b"].reshape(1, -1),
                 p["fc3_w"].T.astype(jnp.bfloat16), p["fc3_b"].reshape(1, -1)]

    logits = pl.pallas_call(
        _head_kernel,
        out_shape=jax.ShapeDtypeStruct((N, num_classes), jnp.float32),
        grid_spec=pltpu.PrefetchScalarGridSpec(
            num_scalar_prefetch=0,
            grid=(1,),
            in_specs=[_full_spec(a.shape) for a in head_args],
            out_specs=_full_spec((N, num_classes)),
        ),
        compiler_params=pltpu.CompilerParams(
            dimension_semantics=("arbitrary",),
            vmem_limit_bytes=32 * 1024 * 1024,   # headroom for the folded fc1 weight
        ),
    )(*head_args)
    return logits


# ---------------------------------------------------------------------------
# Deterministic parameter init (shapes follow the module __init__)
# ---------------------------------------------------------------------------
def init_params(key, *, inplanes, k, unit_times, H, W, num_classes):
    eps = 1e-5
    kit = iter(jax.random.split(key, 64))

    def nrm(shape, scale=0.1):
        return scale * jax.random.normal(next(kit), shape, jnp.float32)

    def uni(shape, lo=0.5, hi=1.5):
        return jax.random.uniform(next(kit), shape, jnp.float32, lo, hi)

    def bn_fold(cdim):
        gamma, beta = uni((cdim,)), nrm((cdim,))
        mean, var = nrm((cdim,)), uni((cdim,))
        s = gamma / jnp.sqrt(var + eps)
        return s, beta - mean * s

    p = {}
    c = 2 * k
    p["stem_w"] = nrm((c, inplanes, 3, 3))        # Conv2d(inplanes, 2k, 3, pad=1)
    p["stem_b"] = nrm((c,))
    units = []
    for _ in range(unit_times):
        cm = (c + k) // 2
        bn1_s, bn1_b = bn_fold(c)                 # BatchNorm2d(c) folded
        w1, b1 = nrm((cm, c, 1, 1)), nrm((cm,))   # Conv2d(c, cm, 1)
        bn2_s, bn2_b = bn_fold(cm)                # BatchNorm2d(cm) folded
        w2, b2 = nrm((k, cm, 3, 3)), nrm((k,))    # Conv2d(cm, k, 3, pad=1)
        units.append(dict(bn1_s=bn1_s, bn1_b=bn1_b, w1=w1, b1=b1,
                          bn2_s=bn2_s, bn2_b=bn2_b, w2=w2, b2=b2))
        c += k
    p["units"] = units
    p["bn_s"], p["bn_b"] = bn_fold(c)             # final BatchNorm2d(2k + k*unitTimes)
    feat = c * (H // 2) * (W // 2)
    p["fc1_w"], p["fc1_b"] = nrm((256, feat)), nrm((256,))
    p["fc2_w"], p["fc2_b"] = nrm((128, 256)), nrm((128,))
    p["fc3_w"], p["fc3_b"] = nrm((num_classes, 128)), nrm((num_classes,))
    return p


# ---------------------------------------------------------------------------
# Pure-JAX reference of the PyTorch forward (eval mode), for verification
# ---------------------------------------------------------------------------
def reference_forward(x_nchw, p):
    prec = lax.Precision.HIGHEST
    dn = ("NCHW", "OIHW", "NCHW")

    def bc(v):
        return v[None, :, None, None]

    y = lax.conv_general_dilated(x_nchw, p["stem_w"], (1, 1), "SAME",
                                 dimension_numbers=dn, precision=prec) + bc(p["stem_b"])
    for u in p["units"]:
        h = jax.nn.relu(y * bc(u["bn1_s"]) + bc(u["bn1_b"]))
        h = lax.conv_general_dilated(h, u["w1"], (1, 1), "VALID",
                                     dimension_numbers=dn, precision=prec) + bc(u["b1"])
        h = jax.nn.relu(h * bc(u["bn2_s"]) + bc(u["bn2_b"]))
        h = lax.conv_general_dilated(h, u["w2"], (1, 1), "SAME",
                                     dimension_numbers=dn, precision=prec) + bc(u["b2"])
        y = jnp.concatenate([y, 2.0 * h], axis=1)     # cat(x, x_UseRes + x_UseDense)
    y = jax.nn.relu(y * bc(p["bn_s"]) + bc(p["bn_b"]))
    n, c, hh, ww = y.shape
    y = y.reshape(n, c, hh // 2, 2, ww // 2, 2).mean(axis=(3, 5))   # AvgPool2d(2)
    y = y.reshape(n, -1)                                            # NCHW flatten
    y = jnp.dot(y, p["fc1_w"].T, precision=prec) + p["fc1_b"]
    y = jnp.dot(y, p["fc2_w"].T, precision=prec) + p["fc2_b"]
    y = jnp.dot(y, p["fc3_w"].T, precision=prec) + p["fc3_b"]
    return y


if __name__ == "__main__":
    # Small shapes consistent with the module: inplanes=4, k=16, 3 units,
    # 8x8 spatial (must be even for AvgPool2d(2)), 10 classes.
    N, INPLANES, H, W = 2, 4, 8, 8
    K, UNIT_TIMES, NUM_CLASSES = 16, 3, 10

    key = jax.random.PRNGKey(0)
    k_x, k_p = jax.random.split(key)
    x = jax.random.normal(k_x, (N, INPLANES, H, W), jnp.float32)      # NCHW like PyTorch
    params = init_params(k_p, inplanes=INPLANES, k=K, unit_times=UNIT_TIMES,
                         H=H, W=W, num_classes=NUM_CLASSES)

    out = mixnet_forward(x, params)
    out = jax.block_until_ready(out)
    assert out.shape == (N, NUM_CLASSES), out.shape

    ref = reference_forward(x, params)
    max_err = float(jnp.max(jnp.abs(out - ref)))
    # bf16 matmul operands (f32 accumulate) vs the HIGHEST-precision f32 reference:
    # wider tolerance than the previous all-f32 version, still catches structural bugs.
    tol = 4e-2 * (1.0 + float(jnp.max(jnp.abs(ref))))
    assert max_err < tol, f"mismatch vs reference: {max_err} (tol {tol})"

    print("KERNEL_OK")
</pallas_src>

<mosaic_0001>
module attributes {stable_mosaic.version = 11 : i64} {
  func.func @kernel(%arg0: i32, %arg1: memref<1x8x8x4xf32, #tpu.memory_space<vmem>>, %arg2: memref<9x4x32xbf16, #tpu.memory_space<vmem>>, %arg3: memref<1x32xf32, #tpu.memory_space<vmem>>, %arg4: memref<1x32xf32, #tpu.memory_space<vmem>>, %arg5: memref<1x32xf32, #tpu.memory_space<vmem>>, %arg6: memref<32x24xbf16, #tpu.memory_space<vmem>>, %arg7: memref<1x24xf32, #tpu.memory_space<vmem>>, %arg8: memref<9x24x16xbf16, #tpu.memory_space<vmem>>, %arg9: memref<1x16xf32, #tpu.memory_space<vmem>>, %arg10: memref<1x48xf32, #tpu.memory_space<vmem>>, %arg11: memref<1x48xf32, #tpu.memory_space<vmem>>, %arg12: memref<48x32xbf16, #tpu.memory_space<vmem>>, %arg13: memref<1x32xf32, #tpu.memory_space<vmem>>, %arg14: memref<9x32x16xbf16, #tpu.memory_space<vmem>>, %arg15: memref<1x16xf32, #tpu.memory_space<vmem>>, %arg16: memref<1x64xf32, #tpu.memory_space<vmem>>, %arg17: memref<1x64xf32, #tpu.memory_space<vmem>>, %arg18: memref<64x40xbf16, #tpu.memory_space<vmem>>, %arg19: memref<1x40xf32, #tpu.memory_space<vmem>>, %arg20: memref<9x40x16xbf16, #tpu.memory_space<vmem>>, %arg21: memref<1x16xf32, #tpu.memory_space<vmem>>, %arg22: memref<1x64x128xf32, #tpu.memory_space<vmem>>, %arg23: memref<1x10x10x40xf32, #tpu.memory_space<vmem>>, %arg24: memref<64x128xf32, #tpu.memory_space<vmem>>) attributes {dimension_semantics = [#tpu.dimension_semantics<parallel>], iteration_bounds = array<i64: 2>, scalar_prefetch = 0 : i64, scratch_operands = 2 : i64, tpu.core_type = #tpu.core_type<tc>, window_params = [{transform_indices = @transform_0, window_bounds = array<i64: 1, 8, 8, 4>}, {pipeline_mode = #tpu.pipeline_mode<synchronous>, transform_indices = @transform_1, window_bounds = array<i64: 9, 4, 32>}, {pipeline_mode = #tpu.pipeline_mode<synchronous>, transform_indices = @transform_2, window_bounds = array<i64: 1, 32>}, {pipeline_mode = #tpu.pipeline_mode<synchronous>, transform_indices = @transform_3, window_bounds = array<i64: 1, 32>}, {pipeline_mode = #tpu.pipeline_mode<synchronous>, transform_indices = @transform_4, window_bounds = array<i64: 1, 32>}, {pipeline_mode = #tpu.pipeline_mode<synchronous>, transform_indices = @transform_5, window_bounds = array<i64: 32, 24>}, {pipeline_mode = #tpu.pipeline_mode<synchronous>, transform_indices = @transform_6, window_bounds = array<i64: 1, 24>}, {pipeline_mode = #tpu.pipeline_mode<synchronous>, transform_indices = @transform_7, window_bounds = array<i64: 9, 24, 16>}, {pipeline_mode = #tpu.pipeline_mode<synchronous>, transform_indices = @transform_8, window_bounds = array<i64: 1, 16>}, {pipeline_mode = #tpu.pipeline_mode<synchronous>, transform_indices = @transform_9, window_bounds = array<i64: 1, 48>}, {pipeline_mode = #tpu.pipeline_mode<synchronous>, transform_indices = @transform_10, window_bounds = array<i64: 1, 48>}, {pipeline_mode = #tpu.pipeline_mode<synchronous>, transform_indices = @transform_11, window_bounds = array<i64: 48, 32>}, {pipeline_mode = #tpu.pipeline_mode<synchronous>, transform_indices = @transform_12, window_bounds = array<i64: 1, 32>}, {pipeline_mode = #tpu.pipeline_mode<synchronous>, transform_indices = @transform_13, window_bounds = array<i64: 9, 32, 16>}, {pipeline_mode = #tpu.pipeline_mode<synchronous>, transform_indices = @transform_14, window_bounds = array<i64: 1, 16>}, {pipeline_mode = #tpu.pipeline_mode<synchronous>, transform_indices = @transform_15, window_bounds = array<i64: 1, 64>}, {pipeline_mode = #tpu.pipeline_mode<synchronous>, transform_indices = @transform_16, window_bounds = array<i64: 1, 64>}, {pipeline_mode = #tpu.pipeline_mode<synchronous>, transform_indices = @transform_17, window_bounds = array<i64: 64, 40>}, {pipeline_mode = #tpu.pipeline_mode<synchronous>, transform_indices = @transform_18, window_bounds = array<i64: 1, 40>}, {pipeline_mode = #tpu.pipeline_mode<synchronous>, transform_indices = @transform_19, window_bounds = array<i64: 9, 40, 16>}, {pipeline_mode = #tpu.pipeline_mode<synchronous>, transform_indices = @transform_20, window_bounds = array<i64: 1, 16>}, {transform_indices = @transform_21, window_bounds = array<i64: 1, 64, 128>}]} {
    %cst = arith.constant 0.000000e+00 : f32
    %0 = vector.broadcast %cst : f32 to vector<1x10x10x40xf32>
    %c0 = arith.constant 0 : index
    %c0_0 = arith.constant 0 : index
    %c0_1 = arith.constant 0 : index
    %c0_2 = arith.constant 0 : index
    %1 = vector.load %arg23[%c0, %c0_0, %c0_1, %c0_2] : memref<1x10x10x40xf32, #tpu.memory_space<vmem>>, vector<1x10x10x40xf32>
    tpu.vector_store %arg23[%c0, %c0_0, %c0_1, %c0_2], %0 {strides = array<i32>} : memref<1x10x10x40xf32, #tpu.memory_space<vmem>>, vector<1x10x10x40xf32>,
    %cst_3 = arith.constant 0.000000e+00 : f32
    %2 = vector.broadcast %cst_3 : f32 to vector<64x128xf32>
    %c0_4 = arith.constant 0 : index
    %c0_5 = arith.constant 0 : index
    %3 = vector.load %arg24[%c0_4, %c0_5] : memref<64x128xf32, #tpu.memory_space<vmem>>, vector<64x128xf32>
    tpu.vector_store %arg24[%c0_4, %c0_5], %2 {strides = array<i32>} : memref<64x128xf32, #tpu.memory_space<vmem>>, vector<64x128xf32>,
    %c0_6 = arith.constant 0 : index
    %c0_7 = arith.constant 0 : index
    %c0_8 = arith.constant 0 : index
    %c0_9 = arith.constant 0 : index
    %4 = vector.load %arg1[%c0_6, %c0_7, %c0_8, %c0_9] : memref<1x8x8x4xf32, #tpu.memory_space<vmem>>, vector<1x8x8x4xf32>
    %c0_10 = arith.constant 0 : index
    %c1 = arith.constant 1 : index
    %c1_11 = arith.constant 1 : index
    %c0_12 = arith.constant 0 : index
    %5 = vector.load %arg23[%c0_10, %c1, %c1_11, %c0_12] : memref<1x10x10x40xf32, #tpu.memory_space<vmem>>, vector<1x8x8x4xf32>
    tpu.vector_store %arg23[%c0_10, %c1, %c1_11, %c0_12], %4 {strides = array<i32>} : memref<1x10x10x40xf32, #tpu.memory_space<vmem>>, vector<1x8x8x4xf32>,
    %cst_13 = arith.constant 0.000000e+00 : f32
    %6 = vector.broadcast %cst_13 : f32 to vector<64x32xf32>
    %c0_14 = arith.constant 0 : index
    %c0_15 = arith.constant 0 : index
    %c0_16 = arith.constant 0 : index
    %c0_17 = arith.constant 0 : index
    %7 = vector.load %arg23[%c0_14, %c0_15, %c0_16, %c0_17] : memref<1x10x10x40xf32, #tpu.memory_space<vmem>>, vector<1x10x8x4xf32>
    %8 = arith.truncf %7 : vector<1x10x8x4xf32> to vector<1x10x8x4xbf16>
    %9 = vector.extract_strided_slice %8 {offsets = [0, 0, 0, 0], sizes = [1, 8, 8, 4], strides = [1, 1, 1, 1]} : vector<1x10x8x4xbf16> to vector<1x8x8x4xbf16>
    %10 = vector.shape_cast %9 : vector<1x8x8x4xbf16> to vector<64x4xbf16>
    %c0_18 = arith.constant 0 : index
    %c0_19 = arith.constant 0 : index
    %c0_20 = arith.constant 0 : index
    %11 = vector.load %arg2[%c0_18, %c0_19, %c0_20] : memref<9x4x32xbf16, #tpu.memory_space<vmem>>, vector<1x4x32xbf16>
    %12 = vector.shape_cast %11 : vector<1x4x32xbf16> to vector<4x32xbf16>
    %cst_21 = arith.constant dense<0.000000e+00> : vector<64x32xf32>
    %13 = tpu.matmul %10, %12, %cst_21 {dimension_numbers = #tpu.dot_dimension_numbers<[1], [0], [0], [1], [0, 0, 1, 1], [], []>} : vector<64x4xbf16>, vector<4x32xbf16>, vector<64x32xf32> -> vector<64x32xf32>
    %14 = arith.addf %6, %13 : vector<64x32xf32>
    %15 = vector.extract_strided_slice %8 {offsets = [0, 1, 0, 0], sizes = [1, 8, 8, 4], strides = [1, 1, 1, 1]} : vector<1x10x8x4xbf16> to vector<1x8x8x4xbf16>
    %16 = vector.shape_cast %15 : vector<1x8x8x4xbf16> to vector<64x4xbf16>
    %c3 = arith.constant 3 : index
    %c0_22 = arith.constant 0 : index
    %c0_23 = arith.constant 0 : index
    %17 = vector.load %arg2[%c3, %c0_22, %c0_23] : memref<9x4x32xbf16, #tpu.memory_space<vmem>>, vector<1x4x32xbf16>
    %18 = vector.shape_cast %17 : vector<1x4x32xbf16> to vector<4x32xbf16>
    %cst_24 = arith.constant dense<0.000000e+00> : vector<64x32xf32>
    %19 = tpu.matmul %16, %18, %cst_24 {dimension_numbers = #tpu.dot_dimension_numbers<[1], [0], [0], [1], [0, 0, 1, 1], [], []>} : vector<64x4xbf16>, vector<4x32xbf16>, vector<64x32xf32> -> vector<64x32xf32>
    %20 = arith.addf %14, %19 : vector<64x32xf32>
    %21 = vector.extract_strided_slice %8 {offsets = [0, 2, 0, 0], sizes = [1, 8, 8, 4], strides = [1, 1, 1, 1]} : vector<1x10x8x4xbf16> to vector<1x8x8x4xbf16>
    %22 = vector.shape_cast %21 : vector<1x8x8x4xbf16> to vector<64x4xbf16>
    %c6 = arith.constant 6 : index
    %c0_25 = arith.constant 0 : index
    %c0_26 = arith.constant 0 : index
    %23 = vector.load %arg2[%c6, %c0_25, %c0_26] : memref<9x4x32xbf16, #tpu.memory_space<vmem>>, vector<1x4x32xbf16>
    %24 = vector.shape_cast %23 : vector<1x4x32xbf16> to vector<4x32xbf16>
    %cst_27 = arith.constant dense<0.000000e+00> : vector<64x32xf32>
    %25 = tpu.matmul %22, %24, %cst_27 {dimension_numbers = #tpu.dot_dimension_numbers<[1], [0], [0], [1], [0, 0, 1, 1], [], []>} : vector<64x4xbf16>, vector<4x32xbf16>, vector<64x32xf32> -> vector<64x32xf32>
    %26 = arith.addf %20, %25 : vector<64x32xf32>
    %c0_28 = arith.constant 0 : index
    %c0_29 = arith.constant 0 : index
    %c1_30 = arith.constant 1 : index
    %c0_31 = arith.constant 0 : index
    %27 = vector.load %arg23[%c0_28, %c0_29, %c1_30, %c0_31] : memref<1x10x10x40xf32, #tpu.memory_space<vmem>>, vector<1x10x8x4xf32>
    %28 = arith.truncf %27 : vector<1x10x8x4xf32> to vector<1x10x8x4xbf16>
    %29 = vector.extract_strided_slice %28 {offsets = [0, 0, 0, 0], sizes = [1, 8, 8, 4], strides = [1, 1, 1, 1]} : vector<1x10x8x4xbf16> to vector<1x8x8x4xbf16>
    %30 = vector.shape_cast %29 : vector<1x8x8x4xbf16> to vector<64x4xbf16>
    %c1_32 = arith.constant 1 : index
    %c0_33 = arith.constant 0 : index
    %c0_34 = arith.constant 0 : index
    %31 = vector.load %arg2[%c1_32, %c0_33, %c0_34] : memref<9x4x32xbf16, #tpu.memory_space<vmem>>, vector<1x4x32xbf16>
    %32 = vector.shape_cast %31 : vector<1x4x32xbf16> to vector<4x32xbf16>
    %cst_35 = arith.constant dense<0.000000e+00> : vector<64x32xf32>
    %33 = tpu.matmul %30, %32, %cst_35 {dimension_numbers = #tpu.dot_dimension_numbers<[1], [0], [0], [1], [0, 0, 1, 1], [], []>} : vector<64x4xbf16>, vector<4x32xbf16>, vector<64x32xf32> -> vector<64x32xf32>
    %34 = arith.addf %26, %33 : vector<64x32xf32>
    %35 = vector.extract_strided_slice %28 {offsets = [0, 1, 0, 0], sizes = [1, 8, 8, 4], strides = [1, 1, 1, 1]} : vector<1x10x8x4xbf16> to vector<1x8x8x4xbf16>
    %36 = vector.shape_cast %35 : vector<1x8x8x4xbf16> to vector<64x4xbf16>
    %c4 = arith.constant 4 : index
    %c0_36 = arith.constant 0 : index
    %c0_37 = arith.constant 0 : index
    %37 = vector.load %arg2[%c4, %c0_36, %c0_37] : memref<9x4x32xbf16, #tpu.memory_space<vmem>>, vector<1x4x32xbf16>
    %38 = vector.shape_cast %37 : vector<1x4x32xbf16> to vector<4x32xbf16>
    %cst_38 = arith.constant dense<0.000000e+00> : vector<64x32xf32>
    %39 = tpu.matmul %36, %38, %cst_38 {dimension_numbers = #tpu.dot_dimension_numbers<[1], [0], [0], [1], [0, 0, 1, 1], [], []>} : vector<64x4xbf16>, vector<4x32xbf16>, vector<64x32xf32> -> vector<64x32xf32>
    %40 = arith.addf %34, %39 : vector<64x32xf32>
    %41 = vector.extract_strided_slice %28 {offsets = [0, 2, 0, 0], sizes = [1, 8, 8, 4], strides = [1, 1, 1, 1]} : vector<1x10x8x4xbf16> to vector<1x8x8x4xbf16>
    %42 = vector.shape_cast %41 : vector<1x8x8x4xbf16> to vector<64x4xbf16>
    %c7 = arith.constant 7 : index
    %c0_39 = arith.constant 0 : index
    %c0_40 = arith.constant 0 : index
    %43 = vector.load %arg2[%c7, %c0_39, %c0_40] : memref<9x4x32xbf16, #tpu.memory_space<vmem>>, vector<1x4x32xbf16>
    %44 = vector.shape_cast %43 : vector<1x4x32xbf16> to vector<4x32xbf16>
    %cst_41 = arith.constant dense<0.000000e+00> : vector<64x32xf32>
    %45 = tpu.matmul %42, %44, %cst_41 {dimension_numbers = #tpu.dot_dimension_numbers<[1], [0], [0], [1], [0, 0, 1, 1], [], []>} : vector<64x4xbf16>, vector<4x32xbf16>, vector<64x32xf32> -> vector<64x32xf32>
    %46 = arith.addf %40, %45 : vector<64x32xf32>
    %c0_42 = arith.constant 0 : index
    %c0_43 = arith.constant 0 : index
    %c2 = arith.constant 2 : index
    %c0_44 = arith.constant 0 : index
    %47 = vector.load %arg23[%c0_42, %c0_43, %c2, %c0_44] : memref<1x10x10x40xf32, #tpu.memory_space<vmem>>, vector<1x10x8x4xf32>
    %48 = arith.truncf %47 : vector<1x10x8x4xf32> to vector<1x10x8x4xbf16>
    %49 = vector.extract_strided_slice %48 {offsets = [0, 0, 0, 0], sizes = [1, 8, 8, 4], strides = [1, 1, 1, 1]} : vector<1x10x8x4xbf16> to vector<1x8x8x4xbf16>
    %50 = vector.shape_cast %49 : vector<1x8x8x4xbf16> to vector<64x4xbf16>
    %c2_45 = arith.constant 2 : index
    %c0_46 = arith.constant 0 : index
    %c0_47 = arith.constant 0 : index
    %51 = vector.load %arg2[%c2_45, %c0_46, %c0_47] : memref<9x4x32xbf16, #tpu.memory_space<vmem>>, vector<1x4x32xbf16>
    %52 = vector.shape_cast %51 : vector<1x4x32xbf16> to vector<4x32xbf16>
    %cst_48 = arith.constant dense<0.000000e+00> : vector<64x32xf32>
    %53 = tpu.matmul %50, %52, %cst_48 {dimension_numbers = #tpu.dot_dimension_numbers<[1], [0], [0], [1], [0, 0, 1, 1], [], []>} : vector<64x4xbf16>, vector<4x32xbf16>, vector<64x32xf32> -> vector<64x32xf32>
    %54 = arith.addf %46, %53 : vector<64x32xf32>
    %55 = vector.extract_strided_slice %48 {offsets = [0, 1, 0, 0], sizes = [1, 8, 8, 4], strides = [1, 1, 1, 1]} : vector<1x10x8x4xbf16> to vector<1x8x8x4xbf16>
    %56 = vector.shape_cast %55 : vector<1x8x8x4xbf16> to vector<64x4xbf16>
    %c5 = arith.constant 5 : index
    %c0_49 = arith.constant 0 : index
    %c0_50 = arith.constant 0 : index
    %57 = vector.load %arg2[%c5, %c0_49, %c0_50] : memref<9x4x32xbf16, #tpu.memory_space<vmem>>, vector<1x4x32xbf16>
    %58 = vector.shape_cast %57 : vector<1x4x32xbf16> to vector<4x32xbf16>
    %cst_51 = arith.constant dense<0.000000e+00> : vector<64x32xf32>
    %59 = tpu.matmul %56, %58, %cst_51 {dimension_numbers = #tpu.dot_dimension_numbers<[1], [0], [0], [1], [0, 0, 1, 1], [], []>} : vector<64x4xbf16>, vector<4x32xbf16>, vector<64x32xf32> -> vector<64x32xf32>
    %60 = arith.addf %54, %59 : vector<64x32xf32>
    %61 = vector.extract_strided_slice %48 {offsets = [0, 2, 0, 0], sizes = [1, 8, 8, 4], strides = [1, 1, 1, 1]} : vector<1x10x8x4xbf16> to vector<1x8x8x4xbf16>
    %62 = vector.shape_cast %61 : vector<1x8x8x4xbf16> to vector<64x4xbf16>
    %c8 = arith.constant 8 : index
    %c0_52 = arith.constant 0 : index
    %c0_53 = arith.constant 0 : index
    %63 = vector.load %arg2[%c8, %c0_52, %c0_53] : memref<9x4x32xbf16, #tpu.memory_space<vmem>>, vector<1x4x32xbf16>
    %64 = vector.shape_cast %63 : vector<1x4x32xbf16> to vector<4x32xbf16>
    %cst_54 = arith.constant dense<0.000000e+00> : vector<64x32xf32>
    %65 = tpu.matmul %62, %64, %cst_54 {dimension_numbers = #tpu.dot_dimension_numbers<[1], [0], [0], [1], [0, 0, 1, 1], [], []>} : vector<64x4xbf16>, vector<4x32xbf16>, vector<64x32xf32> -> vector<64x32xf32>
    %66 = arith.addf %60, %65 : vector<64x32xf32>
    %c0_55 = arith.constant 0 : index
    %c0_56 = arith.constant 0 : index
    %67 = vector.load %arg3[%c0_55, %c0_56] : memref<1x32xf32, #tpu.memory_space<vmem>>, vector<1x32xf32>
    %68 = vector.broadcast %67 : vector<1x32xf32> to vector<64x32xf32>
    %69 = arith.addf %66, %68 : vector<64x32xf32>
    %c0_57 = arith.constant 0 : index
    %c0_58 = arith.constant 0 : index
    %70 = vector.load %arg24[%c0_57, %c0_58] : memref<64x128xf32, #tpu.memory_space<vmem>>, vector<64x32xf32>
    tpu.vector_store %arg24[%c0_57, %c0_58], %69 {strides = array<i32>} : memref<64x128xf32, #tpu.memory_space<vmem>>, vector<64x32xf32>,
    %c0_59 = arith.constant 0 : index
    %c0_60 = arith.constant 0 : index
    %71 = vector.load %arg24[%c0_59, %c0_60] : memref<64x128xf32, #tpu.memory_space<vmem>>, vector<64x32xf32>
    %c0_61 = arith.constant 0 : index
    %c0_62 = arith.constant 0 : index
    %72 = vector.load %arg4[%c0_61, %c0_62] : memref<1x32xf32, #tpu.memory_space<vmem>>, vector<1x32xf32>
    %73 = vector.broadcast %72 : vector<1x32xf32> to vector<64x32xf32>
    %74 = arith.mulf %71, %73 : vector<64x32xf32>
    %c0_63 = arith.constant 0 : index
    %c0_64 = arith.constant 0 : index
    %75 = vector.load %arg5[%c0_63, %c0_64] : memref<1x32xf32, #tpu.memory_space<vmem>>, vector<1x32xf32>
    %76 = vector.broadcast %75 : vector<1x32xf32> to vector<64x32xf32>
    %77 = arith.addf %74, %76 : vector<64x32xf32>
    %cst_65 = arith.constant 0.000000e+00 : f32
    %78 = vector.broadcast %cst_65 : f32 to vector<64x32xf32>
    %79 = arith.maximumf %77, %78 : vector<64x32xf32>
    %80 = arith.truncf %79 : vector<64x32xf32> to vector<64x32xbf16>
    %c0_66 = arith.constant 0 : index
    %c0_67 = arith.constant 0 : index
    %81 = vector.load %arg6[%c0_66, %c0_67] : memref<32x24xbf16, #tpu.memory_space<vmem>>, vector<32x24xbf16>
    %cst_68 = arith.constant dense<0.000000e+00> : vector<64x24xf32>
    %82 = tpu.matmul %80, %81, %cst_68 {dimension_numbers = #tpu.dot_dimension_numbers<[1], [0], [0], [1], [0, 0, 1, 1], [], []>} : vector<64x32xbf16>, vector<32x24xbf16>, vector<64x24xf32> -> vector<64x24xf32>
    %c0_69 = arith.constant 0 : index
    %c0_70 = arith.constant 0 : index
    %83 = vector.load %arg7[%c0_69, %c0_70] : memref<1x24xf32, #tpu.memory_space<vmem>>, vector<1x24xf32>
    %84 = vector.broadcast %83 : vector<1x24xf32> to vector<64x24xf32>
    %85 = arith.addf %82, %84 : vector<64x24xf32>
    %cst_71 = arith.constant 0.000000e+00 : f32
    %86 = vector.broadcast %cst_71 : f32 to vector<64x24xf32>
    %87 = arith.maximumf %85, %86 : vector<64x24xf32>
    %88 = vector.shape_cast %87 : vector<64x24xf32> to vector<1x8x8x24xf32>
    %c0_72 = arith.constant 0 : index
    %c1_73 = arith.constant 1 : index
    %c1_74 = arith.constant 1 : index
    %c0_75 = arith.constant 0 : index
    %89 = vector.load %arg23[%c0_72, %c1_73, %c1_74, %c0_75] : memref<1x10x10x40xf32, #tpu.memory_space<vmem>>, vector<1x8x8x24xf32>
    tpu.vector_store %arg23[%c0_72, %c1_73, %c1_74, %c0_75], %88 {strides = array<i32>} : memref<1x10x10x40xf32, #tpu.memory_space<vmem>>, vector<1x8x8x24xf32>,
    %cst_76 = arith.constant 0.000000e+00 : f32
    %90 = vector.broadcast %cst_76 : f32 to vector<64x16xf32>
    %c0_77 = arith.constant 0 : index
    %c0_78 = arith.constant 0 : index
    %c0_79 = arith.constant 0 : index
    %c0_80 = arith.constant 0 : index
    %91 = vector.load %arg23[%c0_77, %c0_78, %c0_79, %c0_80] : memref<1x10x10x40xf32, #tpu.memory_space<vmem>>, vector<1x10x8x24xf32>
    %92 = arith.truncf %91 : vector<1x10x8x24xf32> to vector<1x10x8x24xbf16>
    %93 = vector.extract_strided_slice %92 {offsets = [0, 0, 0, 0], sizes = [1, 8, 8, 24], strides = [1, 1, 1, 1]} : vector<1x10x8x24xbf16> to vector<1x8x8x24xbf16>
    %94 = vector.shape_cast %93 : vector<1x8x8x24xbf16> to vector<64x24xbf16>
    %c0_81 = arith.constant 0 : index
    %c0_82 = arith.constant 0 : index
    %c0_83 = arith.constant 0 : index
    %95 = vector.load %arg8[%c0_81, %c0_82, %c0_83] : memref<9x24x16xbf16, #tpu.memory_space<vmem>>, vector<1x24x16xbf16>
    %96 = vector.shape_cast %95 : vector<1x24x16xbf16> to vector<24x16xbf16>
    %cst_84 = arith.constant dense<0.000000e+00> : vector<64x16xf32>
    %97 = tpu.matmul %94, %96, %cst_84 {dimension_numbers = #tpu.dot_dimension_numbers<[1], [0], [0], [1], [0, 0, 1, 1], [], []>} : vector<64x24xbf16>, vector<24x16xbf16>, vector<64x16xf32> -> vector<64x16xf32>
    %98 = arith.addf %90, %97 : vector<64x16xf32>
    %99 = vector.extract_strided_slice %92 {offsets = [0, 1, 0, 0], sizes = [1, 8, 8, 24], strides = [1, 1, 1, 1]} : vector<1x10x8x24xbf16> to vector<1x8x8x24xbf16>
    %100 = vector.shape_cast %99 : vector<1x8x8x24xbf16> to vector<64x24xbf16>
    %c3_85 = arith.constant 3 : index
    %c0_86 = arith.constant 0 : index
    %c0_87 = arith.constant 0 : index
    %101 = vector.load %arg8[%c3_85, %c0_86, %c0_87] : memref<9x24x16xbf16, #tpu.memory_space<vmem>>, vector<1x24x16xbf16>
    %102 = vector.shape_cast %101 : vector<1x24x16xbf16> to vector<24x16xbf16>
    %cst_88 = arith.constant dense<0.000000e+00> : vector<64x16xf32>
    %103 = tpu.matmul %100, %102, %cst_88 {dimension_numbers = #tpu.dot_dimension_numbers<[1], [0], [0], [1], [0, 0, 1, 1], [], []>} : vector<64x24xbf16>, vector<24x16xbf16>, vector<64x16xf32> -> vector<64x16xf32>
    %104 = arith.addf %98, %103 : vector<64x16xf32>
    %105 = vector.extract_strided_slice %92 {offsets = [0, 2, 0, 0], sizes = [1, 8, 8, 24], strides = [1, 1, 1, 1]} : vector<1x10x8x24xbf16> to vector<1x8x8x24xbf16>
    %106 = vector.shape_cast %105 : vector<1x8x8x24xbf16> to vector<64x24xbf16>
    %c6_89 = arith.constant 6 : index
    %c0_90 = arith.constant 0 : index
    %c0_91 = arith.constant 0 : index
    %107 = vector.load %arg8[%c6_89, %c0_90, %c0_91] : memref<9x24x16xbf16, #tpu.memory_space<vmem>>, vector<1x24x16xbf16>
    %108 = vector.shape_cast %107 : vector<1x24x16xbf16> to vector<24x16xbf16>
    %cst_92 = arith.constant dense<0.000000e+00> : vector<64x16xf32>
    %109 = tpu.matmul %106, %108, %cst_92 {dimension_numbers = #tpu.dot_dimension_numbers<[1], [0], [0], [1], [0, 0, 1, 1], [], []>} : vector<64x24xbf16>, vector<24x16xbf16>, vector<64x16xf32> -> vector<64x16xf32>
    %110 = arith.addf %104, %109 : vector<64x16xf32>
    %c0_93 = arith.constant 0 : index
    %c0_94 = arith.constant 0 : index
    %c1_95 = arith.constant 1 : index
    %c0_96 = arith.constant 0 : index
    %111 = vector.load %arg23[%c0_93, %c0_94, %c1_95, %c0_96] : memref<1x10x10x40xf32, #tpu.memory_space<vmem>>, vector<1x10x8x24xf32>
    %112 = arith.truncf %111 : vector<1x10x8x24xf32> to vector<1x10x8x24xbf16>
    %113 = vector.extract_strided_slice %112 {offsets = [0, 0, 0, 0], sizes = [1, 8, 8, 24], strides = [1, 1, 1, 1]} : vector<1x10x8x24xbf16> to vector<1x8x8x24xbf16>
    %114 = vector.shape_cast %113 : vector<1x8x8x24xbf16> to vector<64x24xbf16>
    %c1_97 = arith.constant 1 : index
    %c0_98 = arith.constant 0 : index
    %c0_99 = arith.constant 0 : index
    %115 = vector.load %arg8[%c1_97, %c0_98, %c0_99] : memref<9x24x16xbf16, #tpu.memory_space<vmem>>, vector<1x24x16xbf16>
    %116 = vector.shape_cast %115 : vector<1x24x16xbf16> to vector<24x16xbf16>
    %cst_100 = arith.constant dense<0.000000e+00> : vector<64x16xf32>
    %117 = tpu.matmul %114, %116, %cst_100 {dimension_numbers = #tpu.dot_dimension_numbers<[1], [0], [0], [1], [0, 0, 1, 1], [], []>} : vector<64x24xbf16>, vector<24x16xbf16>, vector<64x16xf32> -> vector<64x16xf32>
    %118 = arith.addf %110, %117 : vector<64x16xf32>
    %119 = vector.extract_strided_slice %112 {offsets = [0, 1, 0, 0], sizes = [1, 8, 8, 24], strides = [1, 1, 1, 1]} : vector<1x10x8x24xbf16> to vector<1x8x8x24xbf16>
    %120 = vector.shape_cast %119 : vector<1x8x8x24xbf16> to vector<64x24xbf16>
    %c4_101 = arith.constant 4 : index
    %c0_102 = arith.constant 0 : index
    %c0_103 = arith.constant 0 : index
    %121 = vector.load %arg8[%c4_101, %c0_102, %c0_103] : memref<9x24x16xbf16, #tpu.memory_space<vmem>>, vector<1x24x16xbf16>
    %122 = vector.shape_cast %121 : vector<1x24x16xbf16> to vector<24x16xbf16>
    %cst_104 = arith.constant dense<0.000000e+00> : vector<64x16xf32>
    %123 = tpu.matmul %120, %122, %cst_104 {dimension_numbers = #tpu.dot_dimension_numbers<[1], [0], [0], [1], [0, 0, 1, 1], [], []>} : vector<64x24xbf16>, vector<24x16xbf16>, vector<64x16xf32> -> vector<64x16xf32>
    %124 = arith.addf %118, %123 : vector<64x16xf32>
    %125 = vector.extract_strided_slice %112 {offsets = [0, 2, 0, 0], sizes = [1, 8, 8, 24], strides = [1, 1, 1, 1]} : vector<1x10x8x24xbf16> to vector<1x8x8x24xbf16>
    %126 = vector.shape_cast %125 : vector<1x8x8x24xbf16> to vector<64x24xbf16>
    %c7_105 = arith.constant 7 : index
    %c0_106 = arith.constant 0 : index
    %c0_107 = arith.constant 0 : index
    %127 = vector.load %arg8[%c7_105, %c0_106, %c0_107] : memref<9x24x16xbf16, #tpu.memory_space<vmem>>, vector<1x24x16xbf16>
    %128 = vector.shape_cast %127 : vector<1x24x16xbf16> to vector<24x16xbf16>
    %cst_108 = arith.constant dense<0.000000e+00> : vector<64x16xf32>
    %129 = tpu.matmul %126, %128, %cst_108 {dimension_numbers = #tpu.dot_dimension_numbers<[1], [0], [0], [1], [0, 0, 1, 1], [], []>} : vector<64x24xbf16>, vector<24x16xbf16>, vector<64x16xf32> -> vector<64x16xf32>
    %130 = arith.addf %124, %129 : vector<64x16xf32>
    %c0_109 = arith.constant 0 : index
    %c0_110 = arith.constant 0 : index
    %c2_111 = arith.constant 2 : index
    %c0_112 = arith.constant 0 : index
    %131 = vector.load %arg23[%c0_109, %c0_110, %c2_111, %c0_112] : memref<1x10x10x40xf32, #tpu.memory_space<vmem>>, vector<1x10x8x24xf32>
    %132 = arith.truncf %131 : vector<1x10x8x24xf32> to vector<1x10x8x24xbf16>
    %133 = vector.extract_strided_slice %132 {offsets = [0, 0, 0, 0], sizes = [1, 8, 8, 24], strides = [1, 1, 1, 1]} : vector<1x10x8x24xbf16> to vector<1x8x8x24xbf16>
    %134 = vector.shape_cast %133 : vector<1x8x8x24xbf16> to vector<64x24xbf16>
    %c2_113 = arith.constant 2 : index
    %c0_114 = arith.constant 0 : index
    %c0_115 = arith.constant 0 : index
    %135 = vector.load %arg8[%c2_113, %c0_114, %c0_115] : memref<9x24x16xbf16, #tpu.memory_space<vmem>>, vector<1x24x16xbf16>
    %136 = vector.shape_cast %135 : vector<1x24x16xbf16> to vector<24x16xbf16>
    %cst_116 = arith.constant dense<0.000000e+00> : vector<64x16xf32>
    %137 = tpu.matmul %134, %136, %cst_116 {dimension_numbers = #tpu.dot_dimension_numbers<[1], [0], [0], [1], [0, 0, 1, 1], [], []>} : vector<64x24xbf16>, vector<24x16xbf16>, vector<64x16xf32> -> vector<64x16xf32>
    %138 = arith.addf %130, %137 : vector<64x16xf32>
    %139 = vector.extract_strided_slice %132 {offsets = [0, 1, 0, 0], sizes = [1, 8, 8, 24], strides = [1, 1, 1, 1]} : vector<1x10x8x24xbf16> to vector<1x8x8x24xbf16>
    %140 = vector.shape_cast %139 : vector<1x8x8x24xbf16> to vector<64x24xbf16>
    %c5_117 = arith.constant 5 : index
    %c0_118 = arith.constant 0 : index
    %c0_119 = arith.constant 0 : index
    %141 = vector.load %arg8[%c5_117, %c0_118, %c0_119] : memref<9x24x16xbf16, #tpu.memory_space<vmem>>, vector<1x24x16xbf16>
    %142 = vector.shape_cast %141 : vector<1x24x16xbf16> to vector<24x16xbf16>
    %cst_120 = arith.constant dense<0.000000e+00> : vector<64x16xf32>
    %143 = tpu.matmul %140, %142, %cst_120 {dimension_numbers = #tpu.dot_dimension_numbers<[1], [0], [0], [1], [0, 0, 1, 1], [], []>} : vector<64x24xbf16>, vector<24x16xbf16>, vector<64x16xf32> -> vector<64x16xf32>
    %144 = arith.addf %138, %143 : vector<64x16xf32>
    %145 = vector.extract_strided_slice %132 {offsets = [0, 2, 0, 0], sizes = [1, 8, 8, 24], strides = [1, 1, 1, 1]} : vector<1x10x8x24xbf16> to vector<1x8x8x24xbf16>
    %146 = vector.shape_cast %145 : vector<1x8x8x24xbf16> to vector<64x24xbf16>
    %c8_121 = arith.constant 8 : index
    %c0_122 = arith.constant 0 : index
    %c0_123 = arith.constant 0 : index
    %147 = vector.load %arg8[%c8_121, %c0_122, %c0_123] : memref<9x24x16xbf16, #tpu.memory_space<vmem>>, vector<1x24x16xbf16>
    %148 = vector.shape_cast %147 : vector<1x24x16xbf16> to vector<24x16xbf16>
    %cst_124 = arith.constant dense<0.000000e+00> : vector<64x16xf32>
    %149 = tpu.matmul %146, %148, %cst_124 {dimension_numbers = #tpu.dot_dimension_numbers<[1], [0], [0], [1], [0, 0, 1, 1], [], []>} : vector<64x24xbf16>, vector<24x16xbf16>, vector<64x16xf32> -> vector<64x16xf32>
    %150 = arith.addf %144, %149 : vector<64x16xf32>
    %c0_125 = arith.constant 0 : index
    %c0_126 = arith.constant 0 : index
    %151 = vector.load %arg9[%c0_125, %c0_126] : memref<1x16xf32, #tpu.memory_space<vmem>>, vector<1x16xf32>
    %152 = vector.broadcast %151 : vector<1x16xf32> to vector<64x16xf32>
    %153 = arith.addf %150, %152 : vector<64x16xf32>
    %cst_127 = arith.constant 2.000000e+00 : f32
    %154 = vector.broadcast %cst_127 : f32 to vector<64x16xf32>
    %155 = arith.mulf %154, %153 : vector<64x16xf32>
    %c0_128 = arith.constant 0 : index
    %c32 = arith.constant 32 : index
    %156 = vector.load %arg24[%c0_128, %c32] : memref<64x128xf32, #tpu.memory_space<vmem>>, vector<64x16xf32>
    tpu.vector_store %arg24[%c0_128, %c32], %155 {strides = array<i32>} : memref<64x128xf32, #tpu.memory_space<vmem>>, vector<64x16xf32>,
    %c0_129 = arith.constant 0 : index
    %c0_130 = arith.constant 0 : index
    %157 = vector.load %arg24[%c0_129, %c0_130] : memref<64x128xf32, #tpu.memory_space<vmem>>, vector<64x48xf32>
    %c0_131 = arith.constant 0 : index
    %c0_132 = arith.constant 0 : index
    %158 = vector.load %arg10[%c0_131, %c0_132] : memref<1x48xf32, #tpu.memory_space<vmem>>, vector<1x48xf32>
    %159 = vector.broadcast %158 : vector<1x48xf32> to vector<64x48xf32>
    %160 = arith.mulf %157, %159 : vector<64x48xf32>
    %c0_133 = arith.constant 0 : index
    %c0_134 = arith.constant 0 : index
    %161 = vector.load %arg11[%c0_133, %c0_134] : memref<1x48xf32, #tpu.memory_space<vmem>>, vector<1x48xf32>
    %162 = vector.broadcast %161 : vector<1x48xf32> to vector<64x48xf32>
    %163 = arith.addf %160, %162 : vector<64x48xf32>
    %cst_135 = arith.constant 0.000000e+00 : f32
    %164 = vector.broadcast %cst_135 : f32 to vector<64x48xf32>
    %165 = arith.maximumf %163, %164 : vector<64x48xf32>
    %166 = arith.truncf %165 : vector<64x48xf32> to vector<64x48xbf16>
    %c0_136 = arith.constant 0 : index
    %c0_137 = arith.constant 0 : index
    %167 = vector.load %arg12[%c0_136, %c0_137] : memref<48x32xbf16, #tpu.memory_space<vmem>>, vector<48x32xbf16>
    %cst_138 = arith.constant dense<0.000000e+00> : vector<64x32xf32>
    %168 = tpu.matmul %166, %167, %cst_138 {dimension_numbers = #tpu.dot_dimension_numbers<[1], [0], [0], [1], [0, 0, 1, 1], [], []>} : vector<64x48xbf16>, vector<48x32xbf16>, vector<64x32xf32> -> vector<64x32xf32>
    %c0_139 = arith.constant 0 : index
    %c0_140 = arith.constant 0 : index
    %169 = vector.load %arg13[%c0_139, %c0_140] : memref<1x32xf32, #tpu.memory_space<vmem>>, vector<1x32xf32>
    %170 = vector.broadcast %169 : vector<1x32xf32> to vector<64x32xf32>
    %171 = arith.addf %168, %170 : vector<64x32xf32>
    %cst_141 = arith.constant 0.000000e+00 : f32
    %172 = vector.broadcast %cst_141 : f32 to vector<64x32xf32>
    %173 = arith.maximumf %171, %172 : vector<64x32xf32>
    %174 = vector.shape_cast %173 : vector<64x32xf32> to vector<1x8x8x32xf32>
    %c0_142 = arith.constant 0 : index
    %c1_143 = arith.constant 1 : index
    %c1_144 = arith.constant 1 : index
    %c0_145 = arith.constant 0 : index
    %175 = vector.load %arg23[%c0_142, %c1_143, %c1_144, %c0_145] : memref<1x10x10x40xf32, #tpu.memory_space<vmem>>, vector<1x8x8x32xf32>
    tpu.vector_store %arg23[%c0_142, %c1_143, %c1_144, %c0_145], %174 {strides = array<i32>} : memref<1x10x10x40xf32, #tpu.memory_space<vmem>>, vector<1x8x8x32xf32>,
    %cst_146 = arith.constant 0.000000e+00 : f32
    %176 = vector.broadcast %cst_146 : f32 to vector<64x16xf32>
    %c0_147 = arith.constant 0 : index
    %c0_148 = arith.constant 0 : index
    %c0_149 = arith.constant 0 : index
    %c0_150 = arith.constant 0 : index
    %177 = vector.load %arg23[%c0_147, %c0_148, %c0_149, %c0_150] : memref<1x10x10x40xf32, #tpu.memory_space<vmem>>, vector<1x10x8x32xf32>
    %178 = arith.truncf %177 : vector<1x10x8x32xf32> to vector<1x10x8x32xbf16>
    %179 = vector.extract_strided_slice %178 {offsets = [0, 0, 0, 0], sizes = [1, 8, 8, 32], strides = [1, 1, 1, 1]} : vector<1x10x8x32xbf16> to vector<1x8x8x32xbf16>
    %180 = vector.shape_cast %179 : vector<1x8x8x32xbf16> to vector<64x32xbf16>
    %c0_151 = arith.constant 0 : index
    %c0_152 = arith.constant 0 : index
    %c0_153 = arith.constant 0 : index
    %181 = vector.load %arg14[%c0_151, %c0_152, %c0_153] : memref<9x32x16xbf16, #tpu.memory_space<vmem>>, vector<1x32x16xbf16>
    %182 = vector.shape_cast %181 : vector<1x32x16xbf16> to vector<32x16xbf16>
    %cst_154 = arith.constant dense<0.000000e+00> : vector<64x16xf32>
    %183 = tpu.matmul %180, %182, %cst_154 {dimension_numbers = #tpu.dot_dimension_numbers<[1], [0], [0], [1], [0, 0, 1, 1], [], []>} : vector<64x32xbf16>, vector<32x16xbf16>, vector<64x16xf32> -> vector<64x16xf32>
    %184 = arith.addf %176, %183 : vector<64x16xf32>
    %185 = vector.extract_strided_slice %178 {offsets = [0, 1, 0, 0], sizes = [1, 8, 8, 32], strides = [1, 1, 1, 1]} : vector<1x10x8x32xbf16> to vector<1x8x8x32xbf16>
    %186 = vector.shape_cast %185 : vector<1x8x8x32xbf16> to vector<64x32xbf16>
    %c3_155 = arith.constant 3 : index
    %c0_156 = arith.constant 0 : index
    %c0_157 = arith.constant 0 : index
    %187 = vector.load %arg14[%c3_155, %c0_156, %c0_157] : memref<9x32x16xbf16, #tpu.memory_space<vmem>>, vector<1x32x16xbf16>
    %188 = vector.shape_cast %187 : vector<1x32x16xbf16> to vector<32x16xbf16>
    %cst_158 = arith.constant dense<0.000000e+00> : vector<64x16xf32>
    %189 = tpu.matmul %186, %188, %cst_158 {dimension_numbers = #tpu.dot_dimension_numbers<[1], [0], [0], [1], [0, 0, 1, 1], [], []>} : vector<64x32xbf16>, vector<32x16xbf16>, vector<64x16xf32> -> vector<64x16xf32>
    %190 = arith.addf %184, %189 : vector<64x16xf32>
    %191 = vector.extract_strided_slice %178 {offsets = [0, 2, 0, 0], sizes = [1, 8, 8, 32], strides = [1, 1, 1, 1]} : vector<1x10x8x32xbf16> to vector<1x8x8x32xbf16>
    %192 = vector.shape_cast %191 : vector<1x8x8x32xbf16> to vector<64x32xbf16>
    %c6_159 = arith.constant 6 : index
    %c0_160 = arith.constant 0 : index
    %c0_161 = arith.constant 0 : index
    %193 = vector.load %arg14[%c6_159, %c0_160, %c0_161] : memref<9x32x16xbf16, #tpu.memory_space<vmem>>, vector<1x32x16xbf16>
    %194 = vector.shape_cast %193 : vector<1x32x16xbf16> to vector<32x16xbf16>
    %cst_162 = arith.constant dense<0.000000e+00> : vector<64x16xf32>
    %195 = tpu.matmul %192, %194, %cst_162 {dimension_numbers = #tpu.dot_dimension_numbers<[1], [0], [0], [1], [0, 0, 1, 1], [], []>} : vector<64x32xbf16>, vector<32x16xbf16>, vector<64x16xf32> -> vector<64x16xf32>
    %196 = arith.addf %190, %195 : vector<64x16xf32>
    %c0_163 = arith.constant 0 : index
    %c0_164 = arith.constant 0 : index
    %c1_165 = arith.constant 1 : index
    %c0_166 = arith.constant 0 : index
    %197 = vector.load %arg23[%c0_163, %c0_164, %c1_165, %c0_166] : memref<1x10x10x40xf32, #tpu.memory_space<vmem>>, vector<1x10x8x32xf32>
    %198 = arith.truncf %197 : vector<1x10x8x32xf32> to vector<1x10x8x32xbf16>
    %199 = vector.extract_strided_slice %198 {offsets = [0, 0, 0, 0], sizes = [1, 8, 8, 32], strides = [1, 1, 1, 1]} : vector<1x10x8x32xbf16> to vector<1x8x8x32xbf16>
    %200 = vector.shape_cast %199 : vector<1x8x8x32xbf16> to vector<64x32xbf16>
    %c1_167 = arith.constant 1 : index
    %c0_168 = arith.constant 0 : index
    %c0_169 = arith.constant 0 : index
    %201 = vector.load %arg14[%c1_167, %c0_168, %c0_169] : memref<9x32x16xbf16, #tpu.memory_space<vmem>>, vector<1x32x16xbf16>
    %202 = vector.shape_cast %201 : vector<1x32x16xbf16> to vector<32x16xbf16>
    %cst_170 = arith.constant dense<0.000000e+00> : vector<64x16xf32>
    %203 = tpu.matmul %200, %202, %cst_170 {dimension_numbers = #tpu.dot_dimension_numbers<[1], [0], [0], [1], [0, 0, 1, 1], [], []>} : vector<64x32xbf16>, vector<32x16xbf16>, vector<64x16xf32> -> vector<64x16xf32>
    %204 = arith.addf %196, %203 : vector<64x16xf32>
    %205 = vector.extract_strided_slice %198 {offsets = [0, 1, 0, 0], sizes = [1, 8, 8, 32], strides = [1, 1, 1, 1]} : vector<1x10x8x32xbf16> to vector<1x8x8x32xbf16>
    %206 = vector.shape_cast %205 : vector<1x8x8x32xbf16> to vector<64x32xbf16>
    %c4_171 = arith.constant 4 : index
    %c0_172 = arith.constant 0 : index
    %c0_173 = arith.constant 0 : index
    %207 = vector.load %arg14[%c4_171, %c0_172, %c0_173] : memref<9x32x16xbf16, #tpu.memory_space<vmem>>, vector<1x32x16xbf16>
    %208 = vector.shape_cast %207 : vector<1x32x16xbf16> to vector<32x16xbf16>
    %cst_174 = arith.constant dense<0.000000e+00> : vector<64x16xf32>
    %209 = tpu.matmul %206, %208, %cst_174 {dimension_numbers = #tpu.dot_dimension_numbers<[1], [0], [0], [1], [0, 0, 1, 1], [], []>} : vector<64x32xbf16>, vector<32x16xbf16>, vector<64x16xf32> -> vector<64x16xf32>
    %210 = arith.addf %204, %209 : vector<64x16xf32>
    %211 = vector.extract_strided_slice %198 {offsets = [0, 2, 0, 0], sizes = [1, 8, 8, 32], strides = [1, 1, 1, 1]} : vector<1x10x8x32xbf16> to vector<1x8x8x32xbf16>
    %212 = vector.shape_cast %211 : vector<1x8x8x32xbf16> to vector<64x32xbf16>
    %c7_175 = arith.constant 7 : index
    %c0_176 = arith.constant 0 : index
    %c0_177 = arith.constant 0 : index
    %213 = vector.load %arg14[%c7_175, %c0_176, %c0_177] : memref<9x32x16xbf16, #tpu.memory_space<vmem>>, vector<1x32x16xbf16>
    %214 = vector.shape_cast %213 : vector<1x32x16xbf16> to vector<32x16xbf16>
    %cst_178 = arith.constant dense<0.000000e+00> : vector<64x16xf32>
    %215 = tpu.matmul %212, %214, %cst_178 {dimension_numbers = #tpu.dot_dimension_numbers<[1], [0], [0], [1], [0, 0, 1, 1], [], []>} : vector<64x32xbf16>, vector<32x16xbf16>, vector<64x16xf32> -> vector<64x16xf32>
    %216 = arith.addf %210, %215 : vector<64x16xf32>
    %c0_179 = arith.constant 0 : index
    %c0_180 = arith.constant 0 : index
    %c2_181 = arith.constant 2 : index
    %c0_182 = arith.constant 0 : index
    %217 = vector.load %arg23[%c0_179, %c0_180, %c2_181, %c0_182] : memref<1x10x10x40xf32, #tpu.memory_space<vmem>>, vector<1x10x8x32xf32>
    %218 = arith.truncf %217 : vector<1x10x8x32xf32> to vector<1x10x8x32xbf16>
    %219 = vector.extract_strided_slice %218 {offsets = [0, 0, 0, 0], sizes = [1, 8, 8, 32], strides = [1, 1, 1, 1]} : vector<1x10x8x32xbf16> to vector<1x8x8x32xbf16>
    %220 = vector.shape_cast %219 : vector<1x8x8x32xbf16> to vector<64x32xbf16>
    %c2_183 = arith.constant 2 : index
    %c0_184 = arith.constant 0 : index
    %c0_185 = arith.constant 0 : index
    %221 = vector.load %arg14[%c2_183, %c0_184, %c0_185] : memref<9x32x16xbf16, #tpu.memory_space<vmem>>, vector<1x32x16xbf16>
    %222 = vector.shape_cast %221 : vector<1x32x16xbf16> to vector<32x16xbf16>
    %cst_186 = arith.constant dense<0.000000e+00> : vector<64x16xf32>
    %223 = tpu.matmul %220, %222, %cst_186 {dimension_numbers = #tpu.dot_dimension_numbers<[1], [0], [0], [1], [0, 0, 1, 1], [], []>} : vector<64x32xbf16>, vector<32x16xbf16>, vector<64x16xf32> -> vector<64x16xf32>
    %224 = arith.addf %216, %223 : vector<64x16xf32>
    %225 = vector.extract_strided_slice %218 {offsets = [0, 1, 0, 0], sizes = [1, 8, 8, 32], strides = [1, 1, 1, 1]} : vector<1x10x8x32xbf16> to vector<1x8x8x32xbf16>
    %226 = vector.shape_cast %225 : vector<1x8x8x32xbf16> to vector<64x32xbf16>
    %c5_187 = arith.constant 5 : index
    %c0_188 = arith.constant 0 : index
    %c0_189 = arith.constant 0 : index
    %227 = vector.load %arg14[%c5_187, %c0_188, %c0_189] : memref<9x32x16xbf16, #tpu.memory_space<vmem>>, vector<1x32x16xbf16>
    %228 = vector.shape_cast %227 : vector<1x32x16xbf16> to vector<32x16xbf16>
    %cst_190 = arith.constant dense<0.000000e+00> : vector<64x16xf32>
    %229 = tpu.matmul %226, %228, %cst_190 {dimension_numbers = #tpu.dot_dimension_numbers<[1], [0], [0], [1], [0, 0, 1, 1], [], []>} : vector<64x32xbf16>, vector<32x16xbf16>, vector<64x16xf32> -> vector<64x16xf32>
    %230 = arith.addf %224, %229 : vector<64x16xf32>
    %231 = vector.extract_strided_slice %218 {offsets = [0, 2, 0, 0], sizes = [1, 8, 8, 32], strides = [1, 1, 1, 1]} : vector<1x10x8x32xbf16> to vector<1x8x8x32xbf16>
    %232 = vector.shape_cast %231 : vector<1x8x8x32xbf16> to vector<64x32xbf16>
    %c8_191 = arith.constant 8 : index
    %c0_192 = arith.constant 0 : index
    %c0_193 = arith.constant 0 : index
    %233 = vector.load %arg14[%c8_191, %c0_192, %c0_193] : memref<9x32x16xbf16, #tpu.memory_space<vmem>>, vector<1x32x16xbf16>
    %234 = vector.shape_cast %233 : vector<1x32x16xbf16> to vector<32x16xbf16>
    %cst_194 = arith.constant dense<0.000000e+00> : vector<64x16xf32>
    %235 = tpu.matmul %232, %234, %cst_194 {dimension_numbers = #tpu.dot_dimension_numbers<[1], [0], [0], [1], [0, 0, 1, 1], [], []>} : vector<64x32xbf16>, vector<32x16xbf16>, vector<64x16xf32> -> vector<64x16xf32>
    %236 = arith.addf %230, %235 : vector<64x16xf32>
    %c0_195 = arith.constant 0 : index
    %c0_196 = arith.constant 0 : index
    %237 = vector.load %arg15[%c0_195, %c0_196] : memref<1x16xf32, #tpu.memory_space<vmem>>, vector<1x16xf32>
    %238 = vector.broadcast %237 : vector<1x16xf32> to vector<64x16xf32>
    %239 = arith.addf %236, %238 : vector<64x16xf32>
    %cst_197 = arith.constant 2.000000e+00 : f32
    %240 = vector.broadcast %cst_197 : f32 to vector<64x16xf32>
    %241 = arith.mulf %240, %239 : vector<64x16xf32>
    %c0_198 = arith.constant 0 : index
    %c48 = arith.constant 48 : index
    %242 = vector.load %arg24[%c0_198, %c48] : memref<64x128xf32, #tpu.memory_space<vmem>>, vector<64x16xf32>
    tpu.vector_store %arg24[%c0_198, %c48], %241 {strides = array<i32>} : memref<64x128xf32, #tpu.memory_space<vmem>>, vector<64x16xf32>,
    %c0_199 = arith.constant 0 : index
    %c0_200 = arith.constant 0 : index
    %243 = vector.load %arg24[%c0_199, %c0_200] : memref<64x128xf32, #tpu.memory_space<vmem>>, vector<64x64xf32>
    %c0_201 = arith.constant 0 : index
    %c0_202 = arith.constant 0 : index
    %244 = vector.load %arg16[%c0_201, %c0_202] : memref<1x64xf32, #tpu.memory_space<vmem>>, vector<1x64xf32>
    %245 = vector.broadcast %244 : vector<1x64xf32> to vector<64x64xf32>
    %246 = arith.mulf %243, %245 : vector<64x64xf32>
    %c0_203 = arith.constant 0 : index
    %c0_204 = arith.constant 0 : index
    %247 = vector.load %arg17[%c0_203, %c0_204] : memref<1x64xf32, #tpu.memory_space<vmem>>, vector<1x64xf32>
    %248 = vector.broadcast %247 : vector<1x64xf32> to vector<64x64xf32>
    %249 = arith.addf %246, %248 : vector<64x64xf32>
    %cst_205 = arith.constant 0.000000e+00 : f32
    %250 = vector.broadcast %cst_205 : f32 to vector<64x64xf32>
    %251 = arith.maximumf %249, %250 : vector<64x64xf32>
    %252 = arith.truncf %251 : vector<64x64xf32> to vector<64x64xbf16>
    %c0_206 = arith.constant 0 : index
    %c0_207 = arith.constant 0 : index
    %253 = vector.load %arg18[%c0_206, %c0_207] : memref<64x40xbf16, #tpu.memory_space<vmem>>, vector<64x40xbf16>
    %cst_208 = arith.constant dense<0.000000e+00> : vector<64x40xf32>
    %254 = tpu.matmul %252, %253, %cst_208 {dimension_numbers = #tpu.dot_dimension_numbers<[1], [0], [0], [1], [0, 0, 1, 1], [], []>} : vector<64x64xbf16>, vector<64x40xbf16>, vector<64x40xf32> -> vector<64x40xf32>
    %c0_209 = arith.constant 0 : index
    %c0_210 = arith.constant 0 : index
    %255 = vector.load %arg19[%c0_209, %c0_210] : memref<1x40xf32, #tpu.memory_space<vmem>>, vector<1x40xf32>
    %256 = vector.broadcast %255 : vector<1x40xf32> to vector<64x40xf32>
    %257 = arith.addf %254, %256 : vector<64x40xf32>
    %cst_211 = arith.constant 0.000000e+00 : f32
    %258 = vector.broadcast %cst_211 : f32 to vector<64x40xf32>
    %259 = arith.maximumf %257, %258 : vector<64x40xf32>
    %260 = vector.shape_cast %259 : vector<64x40xf32> to vector<1x8x8x40xf32>
    %c0_212 = arith.constant 0 : index
    %c1_213 = arith.constant 1 : index
    %c1_214 = arith.constant 1 : index
    %c0_215 = arith.constant 0 : index
    %261 = vector.load %arg23[%c0_212, %c1_213, %c1_214, %c0_215] : memref<1x10x10x40xf32, #tpu.memory_space<vmem>>, vector<1x8x8x40xf32>
    tpu.vector_store %arg23[%c0_212, %c1_213, %c1_214, %c0_215], %260 {strides = array<i32>} : memref<1x10x10x40xf32, #tpu.memory_space<vmem>>, vector<1x8x8x40xf32>,
    %cst_216 = arith.constant 0.000000e+00 : f32
    %262 = vector.broadcast %cst_216 : f32 to vector<64x16xf32>
    %c0_217 = arith.constant 0 : index
    %c0_218 = arith.constant 0 : index
    %c0_219 = arith.constant 0 : index
    %c0_220 = arith.constant 0 : index
    %263 = vector.load %arg23[%c0_217, %c0_218, %c0_219, %c0_220] : memref<1x10x10x40xf32, #tpu.memory_space<vmem>>, vector<1x10x8x40xf32>
    %264 = arith.truncf %263 : vector<1x10x8x40xf32> to vector<1x10x8x40xbf16>
    %265 = vector.extract_strided_slice %264 {offsets = [0, 0, 0, 0], sizes = [1, 8, 8, 40], strides = [1, 1, 1, 1]} : vector<1x10x8x40xbf16> to vector<1x8x8x40xbf16>
    %266 = vector.shape_cast %265 : vector<1x8x8x40xbf16> to vector<64x40xbf16>
    %c0_221 = arith.constant 0 : index
    %c0_222 = arith.constant 0 : index
    %c0_223 = arith.constant 0 : index
    %267 = vector.load %arg20[%c0_221, %c0_222, %c0_223] : memref<9x40x16xbf16, #tpu.memory_space<vmem>>, vector<1x40x16xbf16>
    %268 = vector.shape_cast %267 : vector<1x40x16xbf16> to vector<40x16xbf16>
    %cst_224 = arith.constant dense<0.000000e+00> : vector<64x16xf32>
    %269 = tpu.matmul %266, %268, %cst_224 {dimension_numbers = #tpu.dot_dimension_numbers<[1], [0], [0], [1], [0, 0, 1, 1], [], []>} : vector<64x40xbf16>, vector<40x16xbf16>, vector<64x16xf32> -> vector<64x16xf32>
    %270 = arith.addf %262, %269 : vector<64x16xf32>
    %271 = vector.extract_strided_slice %264 {offsets = [0, 1, 0, 0], sizes = [1, 8, 8, 40], strides = [1, 1, 1, 1]} : vector<1x10x8x40xbf16> to vector<1x8x8x40xbf16>
    %272 = vector.shape_cast %271 : vector<1x8x8x40xbf16> to vector<64x40xbf16>
    %c3_225 = arith.constant 3 : index
    %c0_226 = arith.constant 0 : index
    %c0_227 = arith.constant 0 : index
    %273 = vector.load %arg20[%c3_225, %c0_226, %c0_227] : memref<9x40x16xbf16, #tpu.memory_space<vmem>>, vector<1x40x16xbf16>
    %274 = vector.shape_cast %273 : vector<1x40x16xbf16> to vector<40x16xbf16>
    %cst_228 = arith.constant dense<0.000000e+00> : vector<64x16xf32>
    %275 = tpu.matmul %272, %274, %cst_228 {dimension_numbers = #tpu.dot_dimension_numbers<[1], [0], [0], [1], [0, 0, 1, 1], [], []>} : vector<64x40xbf16>, vector<40x16xbf16>, vector<64x16xf32> -> vector<64x16xf32>
    %276 = arith.addf %270, %275 : vector<64x16xf32>
    %277 = vector.extract_strided_slice %264 {offsets = [0, 2, 0, 0], sizes = [1, 8, 8, 40], strides = [1, 1, 1, 1]} : vector<1x10x8x40xbf16> to vector<1x8x8x40xbf16>
    %278 = vector.shape_cast %277 : vector<1x8x8x40xbf16> to vector<64x40xbf16>
    %c6_229 = arith.constant 6 : index
    %c0_230 = arith.constant 0 : index
    %c0_231 = arith.constant 0 : index
    %279 = vector.load %arg20[%c6_229, %c0_230, %c0_231] : memref<9x40x16xbf16, #tpu.memory_space<vmem>>, vector<1x40x16xbf16>
    %280 = vector.shape_cast %279 : vector<1x40x16xbf16> to vector<40x16xbf16>
    %cst_232 = arith.constant dense<0.000000e+00> : vector<64x16xf32>
    %281 = tpu.matmul %278, %280, %cst_232 {dimension_numbers = #tpu.dot_dimension_numbers<[1], [0], [0], [1], [0, 0, 1, 1], [], []>} : vector<64x40xbf16>, vector<40x16xbf16>, vector<64x16xf32> -> vector<64x16xf32>
    %282 = arith.addf %276, %281 : vector<64x16xf32>
    %c0_233 = arith.constant 0 : index
    %c0_234 = arith.constant 0 : index
    %c1_235 = arith.constant 1 : index
    %c0_236 = arith.constant 0 : index
    %283 = vector.load %arg23[%c0_233, %c0_234, %c1_235, %c0_236] : memref<1x10x10x40xf32, #tpu.memory_space<vmem>>, vector<1x10x8x40xf32>
    %284 = arith.truncf %283 : vector<1x10x8x40xf32> to vector<1x10x8x40xbf16>
    %285 = vector.extract_strided_slice %284 {offsets = [0, 0, 0, 0], sizes = [1, 8, 8, 40], strides = [1, 1, 1, 1]} : vector<1x10x8x40xbf16> to vector<1x8x8x40xbf16>
    %286 = vector.shape_cast %285 : vector<1x8x8x40xbf16> to vector<64x40xbf16>
    %c1_237 = arith.constant 1 : index
    %c0_238 = arith.constant 0 : index
    %c0_239 = arith.constant 0 : index
    %287 = vector.load %arg20[%c1_237, %c0_238, %c0_239] : memref<9x40x16xbf16, #tpu.memory_space<vmem>>, vector<1x40x16xbf16>
    %288 = vector.shape_cast %287 : vector<1x40x16xbf16> to vector<40x16xbf16>
    %cst_240 = arith.constant dense<0.000000e+00> : vector<64x16xf32>
    %289 = tpu.matmul %286, %288, %cst_240 {dimension_numbers = #tpu.dot_dimension_numbers<[1], [0], [0], [1], [0, 0, 1, 1], [], []>} : vector<64x40xbf16>, vector<40x16xbf16>, vector<64x16xf32> -> vector<64x16xf32>
    %290 = arith.addf %282, %289 : vector<64x16xf32>
    %291 = vector.extract_strided_slice %284 {offsets = [0, 1, 0, 0], sizes = [1, 8, 8, 40], strides = [1, 1, 1, 1]} : vector<1x10x8x40xbf16> to vector<1x8x8x40xbf16>
    %292 = vector.shape_cast %291 : vector<1x8x8x40xbf16> to vector<64x40xbf16>
    %c4_241 = arith.constant 4 : index
    %c0_242 = arith.constant 0 : index
    %c0_243 = arith.constant 0 : index
    %293 = vector.load %arg20[%c4_241, %c0_242, %c0_243] : memref<9x40x16xbf16, #tpu.memory_space<vmem>>, vector<1x40x16xbf16>
    %294 = vector.shape_cast %293 : vector<1x40x16xbf16> to vector<40x16xbf16>
    %cst_244 = arith.constant dense<0.000000e+00> : vector<64x16xf32>
    %295 = tpu.matmul %292, %294, %cst_244 {dimension_numbers = #tpu.dot_dimension_numbers<[1], [0], [0], [1], [0, 0, 1, 1], [], []>} : vector<64x40xbf16>, vector<40x16xbf16>, vector<64x16xf32> -> vector<64x16xf32>
    %296 = arith.addf %290, %295 : vector<64x16xf32>
    %297 = vector.extract_strided_slice %284 {offsets = [0, 2, 0, 0], sizes = [1, 8, 8, 40], strides = [1, 1, 1, 1]} : vector<1x10x8x40xbf16> to vector<1x8x8x40xbf16>
    %298 = vector.shape_cast %297 : vector<1x8x8x40xbf16> to vector<64x40xbf16>
    %c7_245 = arith.constant 7 : index
    %c0_246 = arith.constant 0 : index
    %c0_247 = arith.constant 0 : index
    %299 = vector.load %arg20[%c7_245, %c0_246, %c0_247] : memref<9x40x16xbf16, #tpu.memory_space<vmem>>, vector<1x40x16xbf16>
    %300 = vector.shape_cast %299 : vector<1x40x16xbf16> to vector<40x16xbf16>
    %cst_248 = arith.constant dense<0.000000e+00> : vector<64x16xf32>
    %301 = tpu.matmul %298, %300, %cst_248 {dimension_numbers = #tpu.dot_dimension_numbers<[1], [0], [0], [1], [0, 0, 1, 1], [], []>} : vector<64x40xbf16>, vector<40x16xbf16>, vector<64x16xf32> -> vector<64x16xf32>
    %302 = arith.addf %296, %301 : vector<64x16xf32>
    %c0_249 = arith.constant 0 : index
    %c0_250 = arith.constant 0 : index
    %c2_251 = arith.constant 2 : index
    %c0_252 = arith.constant 0 : index
    %303 = vector.load %arg23[%c0_249, %c0_250, %c2_251, %c0_252] : memref<1x10x10x40xf32, #tpu.memory_space<vmem>>, vector<1x10x8x40xf32>
    %304 = arith.truncf %303 : vector<1x10x8x40xf32> to vector<1x10x8x40xbf16>
    %305 = vector.extract_strided_slice %304 {offsets = [0, 0, 0, 0], sizes = [1, 8, 8, 40], strides = [1, 1, 1, 1]} : vector<1x10x8x40xbf16> to vector<1x8x8x40xbf16>
    %306 = vector.shape_cast %305 : vector<1x8x8x40xbf16> to vector<64x40xbf16>
    %c2_253 = arith.constant 2 : index
    %c0_254 = arith.constant 0 : index
    %c0_255 = arith.constant 0 : index
    %307 = vector.load %arg20[%c2_253, %c0_254, %c0_255] : memref<9x40x16xbf16, #tpu.memory_space<vmem>>, vector<1x40x16xbf16>
    %308 = vector.shape_cast %307 : vector<1x40x16xbf16> to vector<40x16xbf16>
    %cst_256 = arith.constant dense<0.000000e+00> : vector<64x16xf32>
    %309 = tpu.matmul %306, %308, %cst_256 {dimension_numbers = #tpu.dot_dimension_numbers<[1], [0], [0], [1], [0, 0, 1, 1], [], []>} : vector<64x40xbf16>, vector<40x16xbf16>, vector<64x16xf32> -> vector<64x16xf32>
    %310 = arith.addf %302, %309 : vector<64x16xf32>
    %311 = vector.extract_strided_slice %304 {offsets = [0, 1, 0, 0], sizes = [1, 8, 8, 40], strides = [1, 1, 1, 1]} : vector<1x10x8x40xbf16> to vector<1x8x8x40xbf16>
    %312 = vector.shape_cast %311 : vector<1x8x8x40xbf16> to vector<64x40xbf16>
    %c5_257 = arith.constant 5 : index
    %c0_258 = arith.constant 0 : index
    %c0_259 = arith.constant 0 : index
    %313 = vector.load %arg20[%c5_257, %c0_258, %c0_259] : memref<9x40x16xbf16, #tpu.memory_space<vmem>>, vector<1x40x16xbf16>
    %314 = vector.shape_cast %313 : vector<1x40x16xbf16> to vector<40x16xbf16>
    %cst_260 = arith.constant dense<0.000000e+00> : vector<64x16xf32>
    %315 = tpu.matmul %312, %314, %cst_260 {dimension_numbers = #tpu.dot_dimension_numbers<[1], [0], [0], [1], [0, 0, 1, 1], [], []>} : vector<64x40xbf16>, vector<40x16xbf16>, vector<64x16xf32> -> vector<64x16xf32>
    %316 = arith.addf %310, %315 : vector<64x16xf32>
    %317 = vector.extract_strided_slice %304 {offsets = [0, 2, 0, 0], sizes = [1, 8, 8, 40], strides = [1, 1, 1, 1]} : vector<1x10x8x40xbf16> to vector<1x8x8x40xbf16>
    %318 = vector.shape_cast %317 : vector<1x8x8x40xbf16> to vector<64x40xbf16>
    %c8_261 = arith.constant 8 : index
    %c0_262 = arith.constant 0 : index
    %c0_263 = arith.constant 0 : index
    %319 = vector.load %arg20[%c8_261, %c0_262, %c0_263] : memref<9x40x16xbf16, #tpu.memory_space<vmem>>, vector<1x40x16xbf16>
    %320 = vector.shape_cast %319 : vector<1x40x16xbf16> to vector<40x16xbf16>
    %cst_264 = arith.constant dense<0.000000e+00> : vector<64x16xf32>
    %321 = tpu.matmul %318, %320, %cst_264 {dimension_numbers = #tpu.dot_dimension_numbers<[1], [0], [0], [1], [0, 0, 1, 1], [], []>} : vector<64x40xbf16>, vector<40x16xbf16>, vector<64x16xf32> -> vector<64x16xf32>
    %322 = arith.addf %316, %321 : vector<64x16xf32>
    %c0_265 = arith.constant 0 : index
    %c0_266 = arith.constant 0 : index
    %323 = vector.load %arg21[%c0_265, %c0_266] : memref<1x16xf32, #tpu.memory_space<vmem>>, vector<1x16xf32>
    %324 = vector.broadcast %323 : vector<1x16xf32> to vector<64x16xf32>
    %325 = arith.addf %322, %324 : vector<64x16xf32>
    %cst_267 = arith.constant 2.000000e+00 : f32
    %326 = vector.broadcast %cst_267 : f32 to vector<64x16xf32>
    %327 = arith.mulf %326, %325 : vector<64x16xf32>
    %c0_268 = arith.constant 0 : index
    %c64 = arith.constant 64 : index
    %328 = vector.load %arg24[%c0_268, %c64] : memref<64x128xf32, #tpu.memory_space<vmem>>, vector<64x16xf32>
    tpu.vector_store %arg24[%c0_268, %c64], %327 {strides = array<i32>} : memref<64x128xf32, #tpu.memory_space<vmem>>, vector<64x16xf32>,
    %c0_269 = arith.constant 0 : index
    %c0_270 = arith.constant 0 : index
    %329 = vector.load %arg24[%c0_269, %c0_270] : memref<64x128xf32, #tpu.memory_space<vmem>>, vector<64x128xf32>
    %330 = vector.shape_cast %329 : vector<64x128xf32> to vector<1x64x128xf32>
    %c0_271 = arith.constant 0 : index
    %c0_272 = arith.constant 0 : index
    %c0_273 = arith.constant 0 : index
    %331 = vector.load %arg22[%c0_271, %c0_272, %c0_273] : memref<1x64x128xf32, #tpu.memory_space<vmem>>, vector<1x64x128xf32>
    tpu.vector_store %arg22[%c0_271, %c0_272, %c0_273], %330 {strides = array<i32>} : memref<1x64x128xf32, #tpu.memory_space<vmem>>, vector<1x64x128xf32>,
    return
  }
  func.func @transform_0(%arg0: i32) -> (i32, i32, i32, i32) {
    %c0_i32 = arith.constant 0 : i32
    %c0_i32_0 = arith.constant 0 : i32
    %c0_i32_1 = arith.constant 0 : i32
    %c0_i32_2 = arith.constant 0 : i32
    return %arg0, %c0_i32, %c0_i32_0, %c0_i32_1 : i32, i32, i32, i32
  }
  func.func @transform_1(%arg0: i32) -> (i32, i32, i32) {
    %c0_i32 = arith.constant 0 : i32
    %c0_i32_0 = arith.constant 0 : i32
    %c0_i32_1 = arith.constant 0 : i32
    %c0_i32_2 = arith.constant 0 : i32
    return %c0_i32, %c0_i32_0, %c0_i32_1 : i32, i32, i32
  }
  func.func @transform_2(%arg0: i32) -> (i32, i32) {
    %c0_i32 = arith.constant 0 : i32
    %c0_i32_0 = arith.constant 0 : i32
    %c0_i32_1 = arith.constant 0 : i32
    return %c0_i32, %c0_i32_0 : i32, i32
  }
  func.func @transform_3(%arg0: i32) -> (i32, i32) {
    %c0_i32 = arith.constant 0 : i32
    %c0_i32_0 = arith.constant 0 : i32
    %c0_i32_1 = arith.constant 0 : i32
    return %c0_i32, %c0_i32_0 : i32, i32
  }
  func.func @transform_4(%arg0: i32) -> (i32, i32) {
    %c0_i32 = arith.constant 0 : i32
    %c0_i32_0 = arith.constant 0 : i32
    %c0_i32_1 = arith.constant 0 : i32
    return %c0_i32, %c0_i32_0 : i32, i32
  }
  func.func @transform_5(%arg0: i32) -> (i32, i32) {
    %c0_i32 = arith.constant 0 : i32
    %c0_i32_0 = arith.constant 0 : i32
    %c0_i32_1 = arith.constant 0 : i32
    return %c0_i32, %c0_i32_0 : i32, i32
  }
  func.func @transform_6(%arg0: i32) -> (i32, i32) {
    %c0_i32 = arith.constant 0 : i32
    %c0_i32_0 = arith.constant 0 : i32
    %c0_i32_1 = arith.constant 0 : i32
    return %c0_i32, %c0_i32_0 : i32, i32
  }
  func.func @transform_7(%arg0: i32) -> (i32, i32, i32) {
    %c0_i32 = arith.constant 0 : i32
    %c0_i32_0 = arith.constant 0 : i32
    %c0_i32_1 = arith.constant 0 : i32
    %c0_i32_2 = arith.constant 0 : i32
    return %c0_i32, %c0_i32_0, %c0_i32_1 : i32, i32, i32
  }
  func.func @transform_8(%arg0: i32) -> (i32, i32) {
    %c0_i32 = arith.constant 0 : i32
    %c0_i32_0 = arith.constant 0 : i32
    %c0_i32_1 = arith.constant 0 : i32
    return %c0_i32, %c0_i32_0 : i32, i32
  }
  func.func @transform_9(%arg0: i32) -> (i32, i32) {
    %c0_i32 = arith.constant 0 : i32
    %c0_i32_0 = arith.constant 0 : i32
    %c0_i32_1 = arith.constant 0 : i32
    return %c0_i32, %c0_i32_0 : i32, i32
  }
  func.func @transform_10(%arg0: i32) -> (i32, i32) {
    %c0_i32 = arith.constant 0 : i32
    %c0_i32_0 = arith.constant 0 : i32
    %c0_i32_1 = arith.constant 0 : i32
    return %c0_i32, %c0_i32_0 : i32, i32
  }
  func.func @transform_11(%arg0: i32) -> (i32, i32) {
    %c0_i32 = arith.constant 0 : i32
    %c0_i32_0 = arith.constant 0 : i32
    %c0_i32_1 = arith.constant 0 : i32
    return %c0_i32, %c0_i32_0 : i32, i32
  }
  func.func @transform_12(%arg0: i32) -> (i32, i32) {
    %c0_i32 = arith.constant 0 : i32
    %c0_i32_0 = arith.constant 0 : i32
    %c0_i32_1 = arith.constant 0 : i32
    return %c0_i32, %c0_i32_0 : i32, i32
  }
  func.func @transform_13(%arg0: i32) -> (i32, i32, i32) {
    %c0_i32 = arith.constant 0 : i32
    %c0_i32_0 = arith.constant 0 : i32
    %c0_i32_1 = arith.constant 0 : i32
    %c0_i32_2 = arith.constant 0 : i32
    return %c0_i32, %c0_i32_0, %c0_i32_1 : i32, i32, i32
  }
  func.func @transform_14(%arg0: i32) -> (i32, i32) {
    %c0_i32 = arith.constant 0 : i32
    %c0_i32_0 = arith.constant 0 : i32
    %c0_i32_1 = arith.constant 0 : i32
    return %c0_i32, %c0_i32_0 : i32, i32
  }
  func.func @transform_15(%arg0: i32) -> (i32, i32) {
    %c0_i32 = arith.constant 0 : i32
    %c0_i32_0 = arith.constant 0 : i32
    %c0_i32_1 = arith.constant 0 : i32
    return %c0_i32, %c0_i32_0 : i32, i32
  }
  func.func @transform_16(%arg0: i32) -> (i32, i32) {
    %c0_i32 = arith.constant 0 : i32
    %c0_i32_0 = arith.constant 0 : i32
    %c0_i32_1 = arith.constant 0 : i32
    return %c0_i32, %c0_i32_0 : i32, i32
  }
  func.func @transform_17(%arg0: i32) -> (i32, i32) {
    %c0_i32 = arith.constant 0 : i32
    %c0_i32_0 = arith.constant 0 : i32
    %c0_i32_1 = arith.constant 0 : i32
    return %c0_i32, %c0_i32_0 : i32, i32
  }
  func.func @transform_18(%arg0: i32) -> (i32, i32) {
    %c0_i32 = arith.constant 0 : i32
    %c0_i32_0 = arith.constant 0 : i32
    %c0_i32_1 = arith.constant 0 : i32
    return %c0_i32, %c0_i32_0 : i32, i32
  }
  func.func @transform_19(%arg0: i32) -> (i32, i32, i32) {
    %c0_i32 = arith.constant 0 : i32
    %c0_i32_0 = arith.constant 0 : i32
    %c0_i32_1 = arith.constant 0 : i32
    %c0_i32_2 = arith.constant 0 : i32
    return %c0_i32, %c0_i32_0, %c0_i32_1 : i32, i32, i32
  }
  func.func @transform_20(%arg0: i32) -> (i32, i32) {
    %c0_i32 = arith.constant 0 : i32
    %c0_i32_0 = arith.constant 0 : i32
    %c0_i32_1 = arith.constant 0 : i32
    return %c0_i32, %c0_i32_0 : i32, i32
  }
  func.func @transform_21(%arg0: i32) -> (i32, i32, i32) {
    %c0_i32 = arith.constant 0 : i32
    %c0_i32_0 = arith.constant 0 : i32
    %c0_i32_1 = arith.constant 0 : i32
    return %arg0, %c0_i32, %c0_i32_0 : i32, i32, i32
  }
}

</mosaic_0001>

<bundles_post_ra>
// kernel: tpu_custom_call.1
= control target key start
LH: loop header
LB: loop body
LE: loop exit
PB: predicated region body
PF: predicated region fallthrough
CT: control target
= control target key end

     0   :  { %s8173_s0 = inlined_call_operand.vmem [shape: f32[2,8,8,4], index: 0, kind: input, shape index: {}]   ;;  %s8174_s1 = inlined_call_operand.vmem [shape: bf16[9,4,32], index: 1, kind: input, shape index: {}]   ;;  %s8175_s2 = inlined_call_operand.vmem [shape: f32[1,32], index: 2, kind: input, shape index: {}]   ;;  %s8176_s3 = inlined_call_operand.vmem [shape: f32[1,32], index: 3, kind: input, shape index: {}]   ;;  %s8177_s4 = inlined_call_operand.vmem [shape: f32[1,32], index: 4, kind: input, shape index: {}]   ;;  %s8178_s5 = inlined_call_operand.vmem [shape: bf16[32,24], index: 5, kind: input, shape index: {}]   ;;  %s8179_s6 = inlined_call_operand.vmem [shape: f32[1,24], index: 6, kind: input, shape index: {}]   ;;  %s8180_s7 = inlined_call_operand.vmem [shape: bf16[9,24,16], index: 7, kind: input, shape index: {}]   ;;  %s8181_s8 = inlined_call_operand.vmem [shape: f32[1,16], index: 8, kind: input, shape index: {}]   ;;  %s8182_s9 = inlined_call_operand.vmem [shape: f32[1,48], index: 9, kind: input, shape index: {}]   ;;  %s8183_s10 = inlined_call_operand.vmem [shape: f32[1,48], index: 10, kind: input, shape index: {}]   ;;  %s8184_s11 = inlined_call_operand.vmem [shape: bf16[48,32], index: 11, kind: input, shape index: {}]   ;;  %s8185_s12 = inlined_call_operand.vmem [shape: f32[1,32], index: 12, kind: input, shape index: {}]   ;;  %s8186_s13 = inlined_call_operand.vmem [shape: bf16[9,32,16], index: 13, kind: input, shape index: {}]   ;;  %s8187_s14 = inlined_call_operand.vmem [shape: f32[1,16], index: 14, kind: input, shape index: {}]   ;;  %s8188_s15 = inlined_call_operand.vmem [shape: f32[1,64], index: 15, kind: input, shape index: {}]   ;;  %s8189_s16 = inlined_call_operand.vmem [shape: f32[1,64], index: 16, kind: input, shape index: {}]   ;;  %s8190_s17 = inlined_call_operand.vmem [shape: bf16[64,40], index: 17, kind: input, shape index: {}]   ;;  %s8191_s18 = inlined_call_operand.vmem [shape: f32[1,40], index: 18, kind: input, shape index: {}]   ;;  %s8192_s19 = inlined_call_operand.vmem [shape: bf16[9,40,16], index: 19, kind: input, shape index: {}]   ;;  %s8193_s20 = inlined_call_operand.vmem [shape: f32[1,16], index: 20, kind: input, shape index: {}]   ;;  %s8194_s21 = inlined_call_operand.hbm [shape: f32[2,64,128], index: 21, kind: output, shape index: {}]  }
   0x1   :  { %8199 = sst [smem:[#allocation9_spill]] %s8173_s0 }
   0x2   :  { %8200 = sst [smem:[#allocation10_spill]] %s8174_s1 }
   0x3   :  { %8201 = sst [smem:[#allocation11_spill]] %s8175_s2 }
   0x4   :  { %8202 = sst [smem:[#allocation12_spill]] %s8176_s3 }
   0x5   :  { %8203 = sst [smem:[#allocation13_spill]] %s8177_s4 }
   0x6   :  { %8204 = sst [smem:[#allocation14_spill]] %s8178_s5 }
   0x7   :  { %8205 = sst [smem:[#allocation15_spill]] %s8179_s6 }
   0x8   :  { %8206 = sst [smem:[#allocation16_spill]] %s8180_s7 }
   0x9   :  { %8207 = sst [smem:[#allocation17_spill]] %s8181_s8 }
   0xa   :  { %26 = vsyncpa [#allocation5], 0 }
   0xb   :  { %28 = vsyncpa [#allocation5 + $0x1], 0  ;;  %s7440_s2 = smov 0   ;;  %s7442_s25 = smov 0  }
   0xc   :  { %s7444_s26 = smov 0   ;;  %s7446_s27 = smov 0  }
   0xd LB: > { %8208 = sst [smem:[#allocation7_spill]] %s7317_s26  ;;  %s7461_s3 = sadd.s32 4294967295, %s7321_s27   ;;  %s7321_s27 = sphi %s7446_s27, %s8225_s27   ;;  %s7317_s26 = sphi %s7444_s26, %s8222_s26   ;;  %s7313_s25 = sphi %s7442_s25, %s8224_s25   ;;  %s7309_s2 = sphi %s7440_s2, %s8223_s2  }
   0xe   : > { %s5569_s28 = sadd.s32 4294967294, %s7321_s27   ;;  %s7465_s29 = sadd.s32 1, %s7321_s27  }
   0xf   : > { %s487_s0 = sadd.s32 1, %s7317_s26  ;;  %s484_s4 = ssub.s32 %s7321_s27, %s7465_s29 }
  0x10   : > { %p497_p0 = scmp.ne.s32.totalorder %s7317_s26, %s7313_s25  ;;  %p485_p1 = scmp.eq.s32.totalorder %s484_s4, 0 }
  0x11   : > { %p498_p2 = scmp.eq.s32.totalorder %s7461_s3, 1  ;;  %p503_p3 = scmp.ne.s32.totalorder %s7313_s25, %s7309_s2 }
  0x12   : > { %p504_p4 = scmp.eq.s32.totalorder %s5569_s28, 1  ;;  %p5572_p7 = scmp.ge.s32.totalorder %s7321_s27, 1 }
  0x13   : > { %s7476_s30 = scalar_select %p485_p1, %s7317_s26, %s487_s0  }
  0x14   : > { %p7478_p5 = por %p498_p2, %p497_p0  ;;  %p7482_p6 = por %p504_p4, %p503_p3 }
  0x15   : > { %8209 = sst [smem:[#allocation8_spill]] %s7476_s30  ;;  %p590_p8 = scmp.lt.s32.totalorder %s7321_s27, 3 }
  0x17   : > { %p591_p9 = pnand %p5572_p7, %p590_p8 }
  0x18   : > { %s8212_s24 = sld [smem:[#allocation10_spill]] (!%p591_p9)  ;;  %vm759_vm0 = vcmask (!%p591_p9), 1041408   ;;  %p650_p10 = scmp.lt.s32.totalorder (!%p591_p9), %s7461_s3, 1  ;;  %vm656_vm1 = vcmask (!%p591_p9), 326656   ;;  %vm658_vm2 = vcmask (!%p591_p9), 320512   ;;  %v7323_v2 = vmov (!%p591_p9), 0.0  }
  0x19   : > { %594 = sbr.rel (%p591_p9) target bundleno = 2563 (0xa03), region = 104  ;;  %660 = vst.msk [vmem:[#allocation2 + $0x10] sm:$0xff] (!%p591_p9), %vm656_vm1, %v7323_v2  ;;  %662 = vst.msk [vmem:[#allocation2 + $0x20] sm:$0xff] (!%p591_p9), %vm656_vm1, %v7323_v2  ;;  %vm695_vm3 = vcmask (!%p591_p9), 31744   ;;  %s8213_s0 = sld [smem:[#allocation9_spill]] (!%p591_p9)  ;;  %vm1633_vm4 = vcmask (!%p591_p9), 261120  }
  0x1a   : > { %657 = vst.msk [vmem:[#allocation2] sm:$0xff] (!%p591_p9), %vm656_vm1, %v7323_v2  ;;  %664 = vst.msk [vmem:[#allocation2 + $0x30] sm:$0xff] (!%p591_p9), %vm656_vm1, %v7323_v2  ;;  %s8214_s28 = sld [smem:[#allocation14_spill]] (!%p591_p9)  ;;  %s8215_s26 = sld [smem:[#allocation11_spill]] (!%p591_p9)  ;;  %vm1877_vm5 = vcmask (!%p591_p9), 1043456   ;;  %vm1800_vm6 = vcmask (!%p591_p9), 195584  }
  0x1b   : > { %666 = vst.msk [vmem:[#allocation2 + $0x40] sm:$0xff] (!%p591_p9), %vm656_vm1, %v7323_v2  ;;  %668 = vst.msk [vmem:[#allocation2 + $0x50] sm:$0xff] (!%p591_p9), %vm656_vm1, %v7323_v2  ;;  %s8218_s7 = sld [smem:[#allocation16_spill]] (!%p591_p9)  ;;  %s8219_s6 = sld [smem:[#allocation15_spill]] (!%p591_p9)  ;;  %vm2877_vm7 = vcmask (!%p591_p9), 392448   ;;  %vm2967_vm8 = vcmask (!%p591_p9), 392192  }
  0x1c   : > { %670 = vst.msk [vmem:[#allocation2 + $0x60] sm:$0xff] (!%p591_p9), %vm656_vm1, %v7323_v2  ;;  %672 = vst.msk [vmem:[#allocation2 + $0x70] sm:$0xff] (!%p591_p9), %vm656_vm1, %v7323_v2  ;;  %s8220_s8 = sld [smem:[#allocation17_spill]] (!%p591_p9)  ;;  %vm4137_vm9 = vcmask (!%p591_p9), 523648   ;;  %vm4235_vm10 = vcmask (!%p591_p9), 523264   ;;  %vm5468_vm11 = vcmask (!%p591_p9), 654848  }
  0x1d   : > { %674 = vst.msk [vmem:[#allocation2 + $0x80] sm:$0xff] (!%p591_p9), %vm656_vm1, %v7323_v2  ;;  %676 = vst.msk [vmem:[#allocation2 + $0x90] sm:$0xff] (!%p591_p9), %vm656_vm1, %v7323_v2  ;;  %s6143_s1 = sshll.u32 (!%p591_p9), %s7461_s3, 10 }
  0x1e   : > { %v5576_v0 = vld [vmem:[%s8212_s24 + $0x6] sm:$0x3] (!%p591_p9)  ;;  %678 = vst [vmem:[#allocation3] sm:$0xff] (!%p591_p9), %v7323_v2  ;;  %679 = vst [vmem:[#allocation3 + $0x8] sm:$0xff] (!%p591_p9), %v7323_v2  ;;  %v724_v3 = vld [vmem:[%s8212_s24] sm:$0x3] (!%p591_p9) }
  0x1f   : > { %7115 = vmatprep.subr.msk.bf16.mxu0 (!%p591_p9), %vm759_vm0, %v5576_v0  ;;  %v761_v1 = vsel (!%p591_p9), %vm759_vm0, %v5576_v0, 0  ;;  %680 = vst [vmem:[#allocation3 + $0x10] sm:$0xff] (!%p591_p9), %v7323_v2  ;;  %681 = vst [vmem:[#allocation3 + $0x18] sm:$0xff] (!%p591_p9), %v7323_v2  ;;  %v847_v20 = vsel (!%p591_p9), %vm759_vm0, %v724_v3, 0  ;;  %v5593_v22 = vld [vmem:[%s8212_s24 + $0xc] sm:$0x3] (!%p591_p9) }
  0x20   : > { %682 = vst [vmem:[#allocation3 + $0x20] sm:$0xff] %v7323_v2  ;;  %683 = vst [vmem:[#allocation3 + $0x28] sm:$0xff] %v7323_v2  ;;  %6382 = vmatpush3.bf16.msra.mxu0 %v761_v1  ;;  %s651_s4 = scalar_select %p650_p10, %s7461_s3, 1  ;;  %v5599_v25 = vld [vmem:[%s8212_s24 + $0x2] sm:$0x3]  ;;  %v923_v28 = vsel %vm759_vm0, %v5593_v22, 0 }
  0x21   : > { %684 = vst [vmem:[#allocation3 + $0x30] sm:$0xff] %v7323_v2  ;;  %685 = vst [vmem:[#allocation3 + $0x38] sm:$0xff] %v7323_v2  ;;  %7116 = vmatprep.subr.msk.bf16.mxu0 %vm759_vm0, %v724_v3  ;;  %v7542_v26 = vld [vmem:[#allocation2] sm:$0xff]  ;;  %v1053_v29 = vsel %vm759_vm0, %v5599_v25, 0  ;;  %v5608_v34 = vld [vmem:[%s8212_s24 + $0x8] sm:$0x3] }
  0x22   : > { %661 = vst.msk [vmem:[#allocation2 + $0x18] sm:$0x3] %vm658_vm2, %v7323_v2  ;;  %663 = vst.msk [vmem:[#allocation2 + $0x28] sm:$0x3] %vm658_vm2, %v7323_v2  ;;  %s6034_s23 = sshll.u32 %s651_s4, 6  ;;  %v1149_v46 = vsel %vm759_vm0, %v5608_v34, 0 }
  0x23   : > { %659 = vst.msk [vmem:[#allocation2 + $0x8] sm:$0x3] %vm658_vm2, %v7323_v2  ;;  %665 = vst.msk [vmem:[#allocation2 + $0x38] sm:$0x3] %vm658_vm2, %v7323_v2  ;;  %s654_s30 = scalar_lea.vmem %s8213_s0, %s6034_s23  ;;  %v5617_v47 = vld [vmem:[%s8212_s24 + $0xe] sm:$0x3] }
  0x24   : > { %667 = vst.msk [vmem:[#allocation2 + $0x48] sm:$0x3] %vm658_vm2, %v7323_v2  ;;  %669 = vst.msk [vmem:[#allocation2 + $0x58] sm:$0x3] %vm658_vm2, %v7323_v2  ;;  %v686_v4 = vld [vmem:[%s654_s30] sm:$0xff]  ;;  %v687_v5 = vld [vmem:[%s654_s30 + $0x8] sm:$0xff] }
  0x25   : > { %671 = vst.msk [vmem:[#allocation2 + $0x68] sm:$0x3] %vm658_vm2, %v7323_v2  ;;  %673 = vst.msk [vmem:[#allocation2 + $0x78] sm:$0x3] %vm658_vm2, %v7323_v2  ;;  %v688_v6 = vld [vmem:[%s654_s30 + $0x10] sm:$0xff]  ;;  %v689_v7 = vld [vmem:[%s654_s30 + $0x18] sm:$0xff] }
  0x26   : > { %675 = vst.msk [vmem:[#allocation2 + $0x88] sm:$0x3] %vm658_vm2, %v7323_v2  ;;  %677 = vst.msk [vmem:[#allocation2 + $0x98] sm:$0x3] %vm658_vm2, %v7323_v2  ;;  %v690_v8 = vld [vmem:[%s654_s30 + $0x20] sm:$0xff]  ;;  %v691_v9 = vld [vmem:[%s654_s30 + $0x28] sm:$0xff] }
  0x27   : > { %696 = vst.msk [vmem:[#allocation2 + $0x11] sm:$0xff] %vm695_vm3, %v686_v4  ;;  %697 = vst.msk [vmem:[#allocation2 + $0x21] sm:$0xff] %vm695_vm3, %v687_v5  ;;  %v692_v10 = vld [vmem:[%s654_s30 + $0x30] sm:$0xff]  ;;  %v693_v11 = vld [vmem:[%s654_s30 + $0x38] sm:$0xff]  ;;  %v1233_v54 = vsel %vm759_vm0, %v5617_v47, 0  ;;  %s8216_s30 = sld [smem:[#allocation12_spill]] }
  0x28   : > { %698 = vst.msk [vmem:[#allocation2 + $0x31] sm:$0xff] %vm695_vm3, %v688_v6  ;;  %699 = vst.msk [vmem:[#allocation2 + $0x41] sm:$0xff] %vm695_vm3, %v689_v7  ;;  %v7558_v35 = vld [vmem:[#allocation2 + $0x90] sm:$0xff]  ;;  %v5623_v55 = vld [vmem:[%s8212_s24 + $0x4] sm:$0x3]  ;;  %s8217_s4 = sld [smem:[#allocation13_spill]] }
  0x29   : > { %700 = vst.msk [vmem:[#allocation2 + $0x51] sm:$0xff] %vm695_vm3, %v690_v8  ;;  %701 = vst.msk [vmem:[#allocation2 + $0x61] sm:$0xff] %vm695_vm3, %v691_v9  ;;  %v1363_v58 = vsel %vm759_vm0, %v5623_v55, 0  ;;  %v5632_v59 = vld [vmem:[%s8212_s24 + $0xa] sm:$0x3]  ;;  %s7324_s23 = smov 32  }
  0x2a   : > { %702 = vst.msk [vmem:[#allocation2 + $0x71] sm:$0xff] %vm695_vm3, %v692_v10  ;;  %703 = vst.msk [vmem:[#allocation2 + $0x81] sm:$0xff] %vm695_vm3, %v693_v11  ;;  %v7561_v36 = vld [vmem:[#allocation2 + $0x1] sm:$0xff]  ;;  %v1459_v7 = vsel %vm759_vm0, %v5632_v59, 0  ;;  %v5641_v8 = vld [vmem:[%s8212_s24 + $0x10] sm:$0x3] }
  0x2b   : > { %v7595_v61 = vld [vmem:[#allocation2 + $0x2] sm:$0xff]  ;;  %s7326_s24 = smov 64  }
  0x2d   : > { %v7593_v60 = vld [vmem:[#allocation2 + $0x91] sm:$0xff] }
  0x2e   : > { %v705_v12 = vld [vmem:[#allocation2 + $0x10] sm:$0xff]  ;;  %v706_v13 = vld [vmem:[#allocation2 + $0x20] sm:$0xff] }
  0x2f   : > { %v707_v14 = vld [vmem:[#allocation2 + $0x30] sm:$0xff]  ;;  %v6035_v15 = vpack.c.bf16 %v706_v13, %v705_v12  ;;  %v708_v16 = vld [vmem:[#allocation2 + $0x40] sm:$0xff]  ;;  %v6039_v30 = vpack.c.bf16 %v705_v12, %v7542_v26 }
  0x30   : > { %v709_v17 = vld [vmem:[#allocation2 + $0x50] sm:$0xff]  ;;  %v710_v18 = vld [vmem:[#allocation2 + $0x60] sm:$0xff]  ;;  %v6036_v19 = vpack.c.bf16 %v708_v16, %v707_v14  ;;  %v6040_v31 = vpack.c.bf16 %v707_v14, %v706_v13 }
  0x31   : > { %v6037_v21 = vpack.c.bf16 %v710_v18, %v709_v17  ;;  %6383 = vmatprep.mubr.msk.bf16.mxu0 %vm695_vm3, %v6035_v15  ;;  %v711_v23 = vld [vmem:[#allocation2 + $0x70] sm:$0xff]  ;;  %v712_v24 = vld [vmem:[#allocation2 + $0x80] sm:$0xff]  ;;  %v6041_v32 = vpack.c.bf16 %v709_v17, %v708_v16  ;;  %v1543_v15 = vsel %vm759_vm0, %v5641_v8, 0 }
  0x32   : > { %6384 = vmatmul.mubr.msk.bf16.vlgmr.msra.gmra.mrb[0].mxu0 %vm695_vm3, %v6036_v19  ;;  %v6038_v27 = vpack.c.bf16 %v712_v24, %v711_v23  ;;  %v6042_v33 = vpack.c.bf16 %v711_v23, %v710_v18  ;;  %v999_v37 = vld [vmem:[#allocation2 + $0x11] sm:$0xff]  ;;  %v6043_v38 = vpack.c.bf16 %v7558_v35, %v712_v24  ;;  %v1000_v40 = vld [vmem:[#allocation2 + $0x21] sm:$0xff] }
  0x33   : > { %6392 = vmatpush3.bf16.msra.mxu0 %v847_v20  ;;  %6387 = vmatprep.mubr.msk.bf16.mxu0 %vm695_vm3, %v6037_v21  ;;  %v6044_v39 = vpack.c.bf16 %v999_v37, %v7561_v36  ;;  %v1001_v41 = vld [vmem:[#allocation2 + $0x31] sm:$0xff]  ;;  %v1002_v42 = vld [vmem:[#allocation2 + $0x41] sm:$0xff]  ;;  %v6048_v51 = vpack.c.bf16 %v1000_v40, %v999_v37 }
  0x34   : > { %7117 = vmatprep.subr.msk.bf16.mxu0 %vm759_vm0, %v5593_v22  ;;  %v1003_v43 = vld [vmem:[#allocation2 + $0x51] sm:$0xff]  ;;  %v6045_v44 = vpack.c.bf16 %v1001_v41, %v1000_v40  ;;  %v1004_v48 = vld [vmem:[#allocation2 + $0x61] sm:$0xff]  ;;  %v6049_v52 = vpack.c.bf16 %v1002_v42, %v1001_v41  ;;  %v5647_v22 = vld [vmem:[%s8215_s26] ss:$0 sm:$0xff] }
  0x35   : > { %v6046_v45 = vpack.c.bf16 %v1003_v43, %v1002_v42  ;;  %v1005_v49 = vld [vmem:[#allocation2 + $0x71] sm:$0xff]  ;;  %v6050_v53 = vpack.c.bf16 %v1004_v48, %v1003_v43  ;;  %v1006_v56 = vld [vmem:[#allocation2 + $0x81] sm:$0xff] }
  0x36   : > { %v6047_v50 = vpack.c.bf16 %v1005_v49, %v1004_v48  ;;  %v6051_v57 = vpack.c.bf16 %v1006_v56, %v1005_v49  ;;  %v1309_v62 = vld [vmem:[#allocation2 + $0x12] sm:$0xff]  ;;  %v6052_v63 = vpack.c.bf16 %v7593_v60, %v1006_v56  ;;  %v1310_v1 = vld [vmem:[#allocation2 + $0x22] sm:$0xff] }
  0x37   : > { %v6053_v0 = vpack.c.bf16 %v1309_v62, %v7595_v61  ;;  %v1311_v2 = vld [vmem:[#allocation2 + $0x32] sm:$0xff]  ;;  %v1312_v3 = vld [vmem:[#allocation2 + $0x42] sm:$0xff]  ;;  %v6057_v12 = vpack.c.bf16 %v1310_v1, %v1309_v62 }
  0x38   : > { %v1313_v4 = vld [vmem:[#allocation2 + $0x52] sm:$0xff]  ;;  %v6054_v5 = vpack.c.bf16 %v1311_v2, %v1310_v1  ;;  %v1314_v9 = vld [vmem:[#allocation2 + $0x62] sm:$0xff]  ;;  %v6058_v13 = vpack.c.bf16 %v1312_v3, %v1311_v2 }
  0x39   : > { %v6055_v6 = vpack.c.bf16 %v1313_v4, %v1312_v3  ;;  %v1315_v10 = vld [vmem:[#allocation2 + $0x72] sm:$0xff]  ;;  %v6059_v14 = vpack.c.bf16 %v1314_v9, %v1313_v4  ;;  %v1316_v16 = vld [vmem:[#allocation2 + $0x82] sm:$0xff] }
  0x3a   : > { %6388 = vmatmul.mubr.msk.bf16.gmra.mrb[4].mxu0 %vm695_vm3, %v6038_v27  ;;  %v6056_v11 = vpack.c.bf16 %v1315_v10, %v1314_v9  ;;  %v6060_v17 = vpack.c.bf16 %v1316_v16, %v1315_v10  ;;  %v7618_v18 = vld [vmem:[#allocation2 + $0x92] sm:$0xff]  ;;  %v7187_v20 = vld [vmem:[%s8214_s28] sm:$0xff]   ;;  %v7188_v21 = vld [vmem:[%s8214_s28 + $0x8] sm:$0xff]  }
  0x3b   : > { %6393 = vmatprep.mubr.msk.bf16.mxu0 %vm695_vm3, %v6039_v30  ;;  %v6061_v19 = vpack.c.bf16 %v7618_v18, %v1316_v16  ;;  %6855 = vmatprep.subr.bf16.mxu1 %v7187_v20 }
  0x3c   : > { %6857 = vmatpush3.bf16.msra.mxu1 %v7187_v20 }
  0x3d   : > { %6856 = vmatprep.subr.bf16.mxu1 %v7188_v21 }
  0x40   : > { %6858 = vmatpush3.bf16.msra.mxu1 %v7188_v21 }
  0x42   : > { %6394 = vmatmul.mubr.msk.bf16.vlgmr.msra.gmra.mrb[0].mxu0 %vm695_vm3, %v6040_v31 }
  0x43   : > { %6402 = vmatpush3.bf16.msra.mxu0 %v923_v28  ;;  %6397 = vmatprep.mubr.msk.bf16.mxu0 %vm695_vm3, %v6041_v32 }
  0x44   : > { %7118 = vmatprep.subr.msk.bf16.mxu0 %vm759_vm0, %v5599_v25 }
  0x4a   : > { %6398 = vmatmul.mubr.msk.bf16.gmra.mrb[4].mxu0 %vm695_vm3, %v6042_v33 }
  0x4b   : > { %6403 = vmatprep.mubr.msk.bf16.mxu0 %vm695_vm3, %v6040_v31 }
  0x52   : > { %6404 = vmatmul.mubr.msk.bf16.vlgmr.msra.gmra.mrb[0].mxu0 %vm695_vm3, %v6041_v32 }
  0x53   : > { %6412 = vmatpush3.bf16.msra.mxu0 %v1053_v29  ;;  %6407 = vmatprep.mubr.msk.bf16.mxu0 %vm695_vm3, %v6042_v33  ;;  %v5648_v33 = vld [vmem:[%s8216_s30] ss:$0 sm:$0xff] }
  0x54   : > { %7119 = vmatprep.subr.msk.bf16.mxu0 %vm759_vm0, %v5608_v34 }
  0x5a   : > { %6408 = vmatmul.mubr.msk.bf16.gmra.mrb[4].mxu0 %vm695_vm3, %v6043_v38 }
  0x5b   : > { %6413 = vmatprep.mubr.msk.bf16.mxu0 %vm695_vm3, %v6044_v39 }
  0x62   : > { %6414 = vmatmul.mubr.msk.bf16.vlgmr.msra.gmra.mrb[0].mxu0 %vm695_vm3, %v6045_v44 }
  0x63   : > { %6422 = vmatpush3.bf16.msra.mxu0 %v1149_v46  ;;  %6417 = vmatprep.mubr.msk.bf16.mxu0 %vm695_vm3, %v6046_v45 }
  0x64   : > { %7120 = vmatprep.subr.msk.bf16.mxu0 %vm759_vm0, %v5617_v47 }
  0x6a   : > { %6418 = vmatmul.mubr.msk.bf16.gmra.mrb[4].mxu0 %vm695_vm3, %v6047_v50 }
  0x6b   : > { %6423 = vmatprep.mubr.msk.bf16.mxu0 %vm695_vm3, %v6048_v51 }
  0x72   : > { %6424 = vmatmul.mubr.msk.bf16.vlgmr.msra.gmra.mrb[0].mxu0 %vm695_vm3, %v6049_v52 }
  0x73   : > { %6432 = vmatpush3.bf16.msra.mxu0 %v1233_v54  ;;  %6427 = vmatprep.mubr.msk.bf16.mxu0 %vm695_vm3, %v6050_v53 }
  0x74   : > { %7121 = vmatprep.subr.msk.bf16.mxu0 %vm759_vm0, %v5623_v55 }
  0x7a   : > { %6428 = vmatmul.mubr.msk.bf16.gmra.mrb[4].mxu0 %vm695_vm3, %v6051_v57 }
  0x7b   : > { %6433 = vmatprep.mubr.msk.bf16.mxu0 %vm695_vm3, %v6045_v44  ;;  %v5649_v44 = vld [vmem:[%s8217_s4] ss:$0 sm:$0xff] }
  0x82   : > { %6434 = vmatmul.mubr.msk.bf16.vlgmr.msra.gmra.mrb[0].mxu0 %vm695_vm3, %v6046_v45 }
  0x83   : > { %6442 = vmatpush3.bf16.msra.mxu0 %v1363_v58  ;;  %6437 = vmatprep.mubr.msk.bf16.mxu0 %vm695_vm3, %v6047_v50 }
  0x84   : > { %7122 = vmatprep.subr.msk.bf16.mxu0 %vm759_vm0, %v5632_v59 }
  0x8a   : > { %6438 = vmatmul.mubr.msk.bf16.gmra.mrb[4].mxu0 %vm695_vm3, %v6052_v63 }
  0x8b   : > { %6443 = vmatprep.mubr.msk.bf16.mxu0 %vm695_vm3, %v6053_v0 }
  0x92   : > { %6444 = vmatmul.mubr.msk.bf16.vlgmr.msra.gmra.mrb[0].mxu0 %vm695_vm3, %v6054_v5 }
  0x93   : > { %6452 = vmatpush3.bf16.msra.mxu0 %v1459_v7  ;;  %6447 = vmatprep.mubr.msk.bf16.mxu0 %vm695_vm3, %v6055_v6 }
  0x94   : > { %7123 = vmatprep.subr.msk.bf16.mxu0 %vm759_vm0, %v5641_v8 }
  0x9a   : > { %6448 = vmatmul.mubr.msk.bf16.gmra.mrb[4].mxu0 %vm695_vm3, %v6056_v11 }
  0x9b   : > { %6453 = vmatprep.mubr.msk.bf16.mxu0 %vm695_vm3, %v6057_v12 }
  0xa2   : > { %6454 = vmatmul.mubr.msk.bf16.vlgmr.msra.gmra.mrb[0].mxu0 %vm695_vm3, %v6058_v13 }
  0xa3   : > { %6462 = vmatpush3.bf16.msra.mxu0 %v1543_v15  ;;  %6457 = vmatprep.mubr.msk.bf16.mxu0 %vm695_vm3, %v6059_v14 }
  0xa4   : > { %6471 = vmatprep.subr.bf16.mxu0 %v7187_v20 }
  0xaa   : > { %6458 = vmatmul.mubr.msk.bf16.gmra.mrb[4].mxu0 %vm695_vm3, %v6060_v17 }
  0xab   : > { %6463 = vmatprep.mubr.msk.bf16.mxu0 %vm695_vm3, %v6054_v5 }
  0xb2   : > { %6464 = vmatmul.mubr.msk.bf16.vlgmr.msra.gmra.mrb[0].mxu0 %vm695_vm3, %v6055_v6 }
  0xb3   : > { %6467 = vmatprep.mubr.msk.bf16.mxu0 %vm695_vm3, %v6056_v11  ;;  %6472 = vmatpush3.bf16.msra.mxu0 %v7187_v20  ;;  %v7190_v20 = vld [vmem:[%s8218_s7 + $0x2c] ss:$0 sps:$4 sm:$0xff]  }
  0xb4   : > { %6473 = vmatprep.subr.bf16.mxu0 %v7188_v21 }
  0xb7   : > { %6474 = vmatpush3.bf16.msra.mxu0 %v7188_v21  ;;  %v1879_v21 = vsel %vm1877_vm5, %v7190_v20, 0 }
  0xba   : > { %6468 = vmatmul.mubr.msk.bf16.gmra.mrb[4].mxu0 %vm695_vm3, %v6061_v19  ;;  %v7189_v19 = vld [vmem:[%s8218_s7 + $0x24] sm:$0xff]  }
  0xbb   : > { %6483 = vmatprep.subr.bf16.mxu1 %v7189_v19 }
 0x185   : > { %v6465_v23 = vpop.f32.mrb[0].mxu0 }
 0x186   : > { %v1627_v24 = vadd.f32 %v6465_v23, %v5647_v22  ;;  %v1579_v25 = vpop.f32.mrb[1].mxu0  ;;  %v5650_v23 = vld [vmem:[%s8219_s6] ss:$0 sm:$0xff]  ;;  %s647_s6 = sand.u32 1, %s7313_s25  }
 0x187   : > { %v1625_v27 = vadd.f32 %v5647_v22, %v1579_v25  ;;  %v6466_v28 = vpop.f32.mrb[2].mxu0  ;;  %s5573_s26 = sshll.u32 %s647_s6, 6 }
 0x188   : > { %1636 = vst.msk [vmem:[#allocation3 + $0x10] sm:$0xff] %vm1633_vm4, %v1627_v24  ;;  %v1628_v29 = vadd.f32 %v6466_v28, %v5647_v22  ;;  %v1582_v30 = vpop.f32.mrb[3].mxu0  ;;  %s649_s30 = scalar_lea.vmem [#allocation4], %s5573_s26  ;;  %s8132_s26 = scalar_lea.sflag [#allocation5], %s647_s6 }
 0x189   : > { %1634 = vst.msk [vmem:[#allocation3] sm:$0xff] %vm1633_vm4, %v1625_v27  ;;  %v1626_v31 = vadd.f32 %v5647_v22, %v1582_v30  ;;  %s5507_s0 = sshll.u32 %s649_s30, 4  ;;  %s8128_s0 = int_to_ptr.vmem [resolvable:$true] %s5507_s0 }
 0x18a   : > { %1637 = vst.msk [vmem:[#allocation3 + $0x18] sm:$0xff] %vm1633_vm4, %v1628_v29  ;;  %s7259_s3 = scalar_lea.vmem %s8128_s0, 1024 }
 0x18b   : > { %1635 = vst.msk [vmem:[#allocation3 + $0x8] sm:$0xff] %vm1633_vm4, %v1626_v31  ;;  %p7260_p11 = scmp.ne.s32.totalorder %s8128_s0, %s7259_s3 }
 0x18d   : > { %v6469_v32 = vpop.f32.mrb[4].mxu0  ;;  %p7261_p12 = pnand %p7260_p11, %p7478_p5 }
 0x18e   : > { %v1631_v34 = vadd.f32 %v6469_v32, %v5647_v22  ;;  %v1595_v37 = vpop.f32.mrb[5].mxu0 }
 0x18f   : > { %v1629_v38 = vadd.f32 %v5647_v22, %v1595_v37  ;;  %v6470_v39 = vpop.f32.mrb[6].mxu0  ;;  %v1644_v40 = vld [vmem:[#allocation3 + $0x10] sm:$0xff]  ;;  %p7262_p13 = pneg %p7261_p12 }
 0x190   : > { %1640 = vst.msk [vmem:[#allocation3 + $0x30] sm:$0xff] %vm1633_vm4, %v1631_v34  ;;  %v1632_v41 = vadd.f32 %v6470_v39, %v5647_v22  ;;  %v1598_v42 = vpop.f32.mrb[7].mxu0  ;;  %v1642_v43 = vld [vmem:[#allocation3] sm:$0xff]  ;;  %v1659_v45 = vmul.f32 %v5648_v33, %v1644_v40 }
 0x191   : > { %1638 = vst.msk [vmem:[#allocation3 + $0x20] sm:$0xff] %vm1633_vm4, %v1629_v38  ;;  %v1630_v46 = vadd.f32 %v5647_v22, %v1598_v42  ;;  %v1657_v47 = vmul.f32 %v5648_v33, %v1642_v43  ;;  %v1645_v48 = vld [vmem:[#allocation3 + $0x18] sm:$0xff]  ;;  %v7191_v22 = vld [vmem:[%s8218_s7] sm:$0xff]  }
 0x192   : > { %1641 = vst.msk [vmem:[#allocation3 + $0x38] sm:$0xff] %vm1633_vm4, %v1632_v41  ;;  %v1643_v49 = vld [vmem:[#allocation3 + $0x8] sm:$0xff]  ;;  %v1660_v50 = vmul.f32 %v5648_v33, %v1645_v48  ;;  %v1674_v53 = vadd.f32 %v5649_v44, %v1659_v45 }
 0x193   : > { %1639 = vst.msk [vmem:[#allocation3 + $0x28] sm:$0xff] %vm1633_vm4, %v1630_v46  ;;  %v1658_v51 = vmul.f32 %v5648_v33, %v1643_v49  ;;  %v1672_v52 = vadd.f32 %v5649_v44, %v1657_v47 }
 0x194   : > { %v1675_v54 = vadd.f32 %v5649_v44, %v1660_v50  ;;  %v1682_v62 = vmax.f32 %v1674_v53, 0.0 }
 0x195   : > { %v1673_v55 = vadd.f32 %v5649_v44, %v1658_v51  ;;  %v1680_v57 = vmax.f32 %v1672_v52, 0.0 }
 0x196   : > { %v1683_v56 = vmax.f32 %v1675_v54, 0.0 }
 0x197   : > { %v1681_v58 = vmax.f32 %v1673_v55, 0.0  ;;  %v1648_v59 = vld [vmem:[#allocation3 + $0x30] sm:$0xff] }
 0x198   : > { %v1646_v63 = vld [vmem:[#allocation3 + $0x20] sm:$0xff]  ;;  %v1663_v0 = vmul.f32 %v5648_v33, %v1648_v59  ;;  %v1689_v4 = vpack.c.bf16 %v1683_v56, %v1682_v62  ;;  %v7193_v59 = vld [vmem:[%s8218_s7 + $0x48] sm:$0xff]  }
 0x199   : > { %v1688_v1 = vpack.c.bf16 %v1681_v58, %v1680_v57  ;;  %v1661_v2 = vmul.f32 %v5648_v33, %v1646_v63  ;;  %v1649_v3 = vld [vmem:[#allocation3 + $0x38] sm:$0xff]  ;;  %v7192_v57 = vld [vmem:[%s8218_s7 + $0x8] ss:$0 sps:$4 sm:$0xff]  }
 0x19a   : > { %v1647_v5 = vld [vmem:[#allocation3 + $0x28] sm:$0xff]  ;;  %v1664_v6 = vmul.f32 %v5648_v33, %v1649_v3  ;;  %v1678_v9 = vadd.f32 %v5649_v44, %v1663_v0  ;;  %v1974_v58 = vsel %vm1877_vm5, %v7192_v57, 0 }
 0x19b   : > { %6475 = vmatprep.mubr.msk.bf16.mxu0 %vm1633_vm4, %v1688_v1  ;;  %v1662_v7 = vmul.f32 %v5648_v33, %v1647_v5  ;;  %v1676_v8 = vadd.f32 %v5649_v44, %v1661_v2 }
 0x19c   : > { %6476 = vmatmul.mubr.msk.bf16.vlgmr.msra.gmra.mrb[8].mxu0 %vm1633_vm4, %v1689_v4  ;;  %v1679_v10 = vadd.f32 %v5649_v44, %v1664_v6  ;;  %v1686_v15 = vmax.f32 %v1678_v9, 0.0  ;;  %v7194_v6 = vld [vmem:[%s8218_s7 + $0x50] ss:$0 sps:$4 sm:$0xff]  }
 0x19d   : > { %v1677_v11 = vadd.f32 %v5649_v44, %v1662_v7  ;;  %v1684_v13 = vmax.f32 %v1676_v8, 0.0  ;;  %v2061_v8 = vsel %vm1877_vm5, %v7194_v6, 0 }
 0x19e   : > { %v1687_v12 = vmax.f32 %v1679_v10, 0.0  ;;  %v7196_v10 = vld [vmem:[%s8218_s7 + $0x14] ss:$0 sps:$4 sm:$0xff]  }
 0x19f   : > { %v1685_v14 = vmax.f32 %v1677_v11, 0.0  ;;  %v2202_v11 = vsel %vm1877_vm5, %v7196_v10, 0 }
 0x1a0   : > { %v1691_v17 = vpack.c.bf16 %v1687_v12, %v1686_v15  ;;  %v7197_v12 = vld [vmem:[%s8218_s7 + $0x30] sm:$0xff]  }
 0x1a1   : > { %v1690_v16 = vpack.c.bf16 %v1685_v14, %v1684_v13 }
 0x1a3   : > { %6479 = vmatprep.mubr.msk.bf16.mxu1 %vm1633_vm4, %v1690_v16 }
 0x1a4   : > { %6480 = vmatmul.mubr.msk.bf16.vlgmr.msra.gmra.mrb[0].mxu1 %vm1633_vm4, %v1691_v17 }
 0x1a5   : > { %6484 = vmatpush3.bf16.msra.mxu1 %v7189_v19 }
 0x1a6   : > { %7124 = vmatprep.subr.msk.bf16.mxu1 %vm1877_vm5, %v7190_v20 }
 0x1a9   : > { %6486 = vmatpush3.bf16.msra.mxu1 %v1879_v21 }
 0x1aa   : > { %6495 = vmatprep.subr.bf16.mxu1 %v7191_v22 }
 0x26f   : > { %v6477_v24 = vpop.f32.mrb[8].mxu0 }
 0x270   : > { %v1770_v25 = vadd.f32 %v6477_v24, %v5650_v23  ;;  %v1761_v27 = vpop.f32.mrb[9].mxu0 }
 0x271   : > { %v1762_v28 = vadd.f32 %v5650_v23, %v1761_v27  ;;  %v6478_v29 = vpop.f32.mrb[10].mxu0 }
 0x272   : > { %v1794_v30 = vmax.f32 %v1770_v25, 0.0  ;;  %v1773_v31 = vadd.f32 %v6478_v29, %v5650_v23  ;;  %v1764_v32 = vpop.f32.mrb[11].mxu0 }
 0x273   : > { %v1792_v33 = vmax.f32 %v1762_v28, 0.0  ;;  %v1765_v34 = vadd.f32 %v5650_v23, %v1764_v32 }
 0x274   : > { %1803 = vst.msk [vmem:[#allocation2 + $0x31] sm:$0xff] %vm1800_vm6, %v1794_v30  ;;  %v1795_v37 = vmax.f32 %v1773_v31, 0.0  ;;  %v7200_v30 = vld [vmem:[%s8218_s7 + $0x5c] ss:$0 sps:$4 sm:$0xff]  }
 0x275   : > { %1801 = vst.msk [vmem:[#allocation2 + $0x11] sm:$0xff] %vm1800_vm6, %v1792_v33  ;;  %v1793_v38 = vmax.f32 %v1765_v34, 0.0  ;;  %v2404_v32 = vsel %vm1877_vm5, %v7200_v30, 0  ;;  %v7201_v33 = vld [vmem:[%s8218_s7 + $0x18] sm:$0xff]  }
 0x276   : > { %1804 = vst.msk [vmem:[#allocation2 + $0x41] sm:$0xff] %vm1800_vm6, %v1795_v37 }
 0x277   : > { %1802 = vst.msk [vmem:[#allocation2 + $0x21] sm:$0xff] %vm1800_vm6, %v1793_v38  ;;  %v6481_v39 = vpop.f32.mrb[0].mxu1  ;;  %v7202_v38 = vld [vmem:[%s8218_s7 + $0x20] ss:$0 sps:$4 sm:$0xff]  }
 0x278   : > { %v1786_v40 = vadd.f32 %v6481_v39, %v5650_v23  ;;  %v1777_v41 = vpop.f32.mrb[1].mxu1  ;;  %v2545_v39 = vsel %vm1877_vm5, %v7202_v38, 0 }
 0x279   : > { %v1778_v42 = vadd.f32 %v5650_v23, %v1777_v41  ;;  %v6482_v43 = vpop.f32.mrb[2].mxu1 }
 0x27a   : > { %v1798_v44 = vmax.f32 %v1786_v40, 0.0  ;;  %v1789_v45 = vadd.f32 %v6482_v43, %v5650_v23  ;;  %v1780_v46 = vpop.f32.mrb[3].mxu1  ;;  %v7203_v40 = vld [vmem:[%s8218_s7 + $0x3c] sm:$0xff]  }
 0x27b   : > { %v1796_v47 = vmax.f32 %v1778_v42, 0.0  ;;  %v1781_v48 = vadd.f32 %v5650_v23, %v1780_v46  ;;  %v1812_v54 = vld [vmem:[#allocation2 + $0x30] sm:$0xff] }
 0x27c   : > { %1807 = vst.msk [vmem:[#allocation2 + $0x71] sm:$0xff] %vm1800_vm6, %v1798_v44  ;;  %v1799_v49 = vmax.f32 %v1789_v45, 0.0  ;;  %v1810_v52 = vld [vmem:[#allocation2 + $0x10] sm:$0xff] }
 0x27d   : > { %1805 = vst.msk [vmem:[#allocation2 + $0x51] sm:$0xff] %vm1800_vm6, %v1796_v47  ;;  %v1797_v50 = vmax.f32 %v1781_v48, 0.0  ;;  %v1813_v51 = vld [vmem:[#allocation2 + $0x40] sm:$0xff]  ;;  %v6066_v4 = vpack.c.bf16 %v1810_v52, %v7542_v26  ;;  %v7195_v26 = vld [vmem:[%s8218_s7 + $0xc] sm:$0xff]  }
 0x27e   : > { %1808 = vst.msk [vmem:[#allocation2 + $0x81] sm:$0xff] %vm1800_vm6, %v1799_v49  ;;  %v1811_v53 = vld [vmem:[#allocation2 + $0x20] sm:$0xff]  ;;  %v6063_v56 = vpack.c.bf16 %v1813_v51, %v1812_v54  ;;  %v2137_v13 = vld [vmem:[#allocation2 + $0x11] sm:$0xff] }
 0x27f   : > { %1806 = vst.msk [vmem:[#allocation2 + $0x61] sm:$0xff] %vm1800_vm6, %v1797_v50  ;;  %v6062_v55 = vpack.c.bf16 %v1811_v53, %v1810_v52  ;;  %v6067_v5 = vpack.c.bf16 %v1812_v54, %v1811_v53  ;;  %v6071_v15 = vpack.c.bf16 %v2137_v13, %v7561_v36  ;;  %v2138_v16 = vld [vmem:[#allocation2 + $0x21] sm:$0xff]  ;;  %v2139_v19 = vld [vmem:[#allocation2 + $0x31] sm:$0xff] }
 0x280   : > { %v6072_v20 = vpack.c.bf16 %v2139_v19, %v2138_v16  ;;  %v2140_v21 = vld [vmem:[#allocation2 + $0x41] sm:$0xff]  ;;  %v7199_v36 = vld [vmem:[%s8218_s7 + $0x54] sm:$0xff]   ;;  %v6075_v28 = vpack.c.bf16 %v2138_v16, %v2137_v13 }
 0x281   : > { %6487 = vmatprep.mubr.msk.bf16.mxu1 %vm1800_vm6, %v6062_v55  ;;  %v6076_v29 = vpack.c.bf16 %v2140_v21, %v2139_v19  ;;  %v2480_v41 = vld [vmem:[#allocation2 + $0x12] sm:$0xff]  ;;  %v2481_v44 = vld [vmem:[#allocation2 + $0x22] sm:$0xff] }
 0x282   : > { %6488 = vmatmul.mubr.msk.bf16.vlgmr.msra.gmra.mrb[4].mxu1 %vm1800_vm6, %v6063_v56  ;;  %v6080_v43 = vpack.c.bf16 %v2480_v41, %v7595_v61  ;;  %v2482_v46 = vld [vmem:[#allocation2 + $0x32] sm:$0xff]  ;;  %v2483_v48 = vld [vmem:[#allocation2 + $0x42] sm:$0xff]  ;;  %v6084_v54 = vpack.c.bf16 %v2481_v44, %v2480_v41 }
 0x283   : > { %6496 = vmatpush3.bf16.msra.mxu1 %v7191_v22  ;;  %v1816_v2 = vld [vmem:[#allocation2 + $0x70] sm:$0xff]  ;;  %v7198_v22 = vld [vmem:[%s8218_s7 + $0x38] ss:$0 sps:$4 sm:$0xff]   ;;  %v6081_v47 = vpack.c.bf16 %v2482_v46, %v2481_v44  ;;  %v7204_v49 = vld [vmem:[%s8218_s7 + $0x44] ss:$0 sps:$4 sm:$0xff]   ;;  %v6085_v55 = vpack.c.bf16 %v2483_v48, %v2482_v46 }
 0x284   : > { %7125 = vmatprep.subr.msk.bf16.mxu1 %vm1877_vm5, %v7192_v57  ;;  %v1814_v63 = vld [vmem:[#allocation2 + $0x50] sm:$0xff]  ;;  %v7205_v61 = vld [vmem:[%s8218_s7 + $0x60] sm:$0xff]   ;;  %v7206_v56 = vld [vmem:[%s8218_s7 + $0x68] ss:$0 sps:$4 sm:$0xff]   ;;  %s7327_s7 = smov [#allocation4]  }
 0x285   : > { %v1817_v62 = vld [vmem:[#allocation2 + $0x80] sm:$0xff]  ;;  %v6068_v7 = vpack.c.bf16 %v1814_v63, %v1813_v51  ;;  %v2141_v17 = vld [vmem:[#allocation2 + $0x51] sm:$0xff]  ;;  %s7263_s4 = sshll.u32 %s7327_s7, 4  ;;  %s7264_s4 = int_to_ptr.vmem [resolvable:$false] %s7263_s4 }
 0x286   : > { %v1815_v0 = vld [vmem:[#allocation2 + $0x60] sm:$0xff]  ;;  %v6065_v3 = vpack.c.bf16 %v1817_v62, %v1816_v2  ;;  %v6070_v14 = vpack.c.bf16 %v7558_v35, %v1817_v62  ;;  %v6073_v23 = vpack.c.bf16 %v2141_v17, %v2140_v21  ;;  %v2309_v35 = vsel %vm1877_vm5, %v7198_v22, 0  ;;  %v2143_v25 = vld [vmem:[#allocation2 + $0x71] sm:$0xff]  ;;  %p7266_p0 = scmp.lt.s32.totalorder %s8128_s0, %s7264_s4 }
 0x287   : > { %v6064_v1 = vpack.c.bf16 %v1815_v0, %v1814_v63  ;;  %6498 = vmatpush3.bf16.msra.mxu1 %v1974_v58  ;;  %v6069_v9 = vpack.c.bf16 %v1816_v2, %v1815_v0  ;;  %v2142_v24 = vld [vmem:[#allocation2 + $0x61] sm:$0xff]  ;;  %v2484_v45 = vld [vmem:[#allocation2 + $0x52] sm:$0xff]  ;;  %v2747_v58 = vsel %vm1877_vm5, %v7206_v56, 0  ;;  %v5762_v0 = vld [vmem:[%s8220_s8] ss:$0 sm:$0xff] }
 0x288   : > { %6507 = vmatprep.subr.bf16.mxu1 %v7193_v59  ;;  %v6074_v27 = vpack.c.bf16 %v2143_v25, %v2142_v24  ;;  %v6077_v31 = vpack.c.bf16 %v2142_v24, %v2141_v17  ;;  %v2144_v34 = vld [vmem:[#allocation2 + $0x81] sm:$0xff]  ;;  %v6082_v50 = vpack.c.bf16 %v2484_v45, %v2483_v48  ;;  %v2486_v52 = vld [vmem:[#allocation2 + $0x72] sm:$0xff] }
 0x289   : > { %6491 = vmatprep.mubr.msk.bf16.mxu1 %vm1800_vm6, %v6064_v1  ;;  %v6078_v37 = vpack.c.bf16 %v2144_v34, %v2143_v25  ;;  %v6079_v42 = vpack.c.bf16 %v7593_v60, %v2144_v34  ;;  %v2652_v60 = vsel %vm1877_vm5, %v7204_v49, 0  ;;  %v2485_v51 = vld [vmem:[#allocation2 + $0x62] sm:$0xff] }
 0x28a   : > { %6492 = vmatmul.mubr.msk.bf16.gmra.mrb[8].mxu1 %vm1800_vm6, %v6065_v3  ;;  %v6083_v53 = vpack.c.bf16 %v2486_v52, %v2485_v51  ;;  %v6086_v57 = vpack.c.bf16 %v2485_v51, %v2484_v45 }
 0x28b   : > { %6499 = vmatprep.mubr.msk.bf16.mxu1 %vm1800_vm6, %v6066_v4  ;;  %v7207_v4 = vld [vmem:[%s8184_s11] sm:$0xff]  }
 0x28c   : > { %6591 = vmatprep.subr.bf16.mxu0 %v7207_v4 }
 0x28d   : > { %6592 = vmatpush3.bf16.msra.mxu0 %v7207_v4 }
 0x292   : > { %6500 = vmatmul.mubr.msk.bf16.vlgmr.msra.gmra.mrb[4].mxu1 %vm1800_vm6, %v6067_v5 }
 0x293   : > { %6508 = vmatpush3.bf16.msra.mxu1 %v7193_v59  ;;  %6503 = vmatprep.mubr.msk.bf16.mxu1 %vm1800_vm6, %v6068_v7  ;;  %v2487_v59 = vld [vmem:[#allocation2 + $0x82] sm:$0xff] }
 0x294   : > { %7126 = vmatprep.subr.msk.bf16.mxu1 %vm1877_vm5, %v7194_v6  ;;  %v6087_v62 = vpack.c.bf16 %v2487_v59, %v2486_v52  ;;  %v6088_v63 = vpack.c.bf16 %v7618_v18, %v2487_v59 }
 0x297   : > { %6510 = vmatpush3.bf16.msra.mxu1 %v2061_v8 }
 0x298   : > { %6519 = vmatprep.subr.bf16.mxu1 %v7195_v26 }
 0x29a   : > { %6504 = vmatmul.mubr.msk.bf16.gmra.mrb[8].mxu1 %vm1800_vm6, %v6069_v9 }
 0x29b   : > { %6511 = vmatprep.mubr.msk.bf16.mxu1 %vm1800_vm6, %v6067_v5 }
 0x2a2   : > { %6512 = vmatmul.mubr.msk.bf16.vlgmr.msra.gmra.mrb[4].mxu1 %vm1800_vm6, %v6068_v7 }
 0x2a3   : > { %6520 = vmatpush3.bf16.msra.mxu1 %v7195_v26  ;;  %6515 = vmatprep.mubr.msk.bf16.mxu1 %vm1800_vm6, %v6069_v9 }
 0x2a4   : > { %7127 = vmatprep.subr.msk.bf16.mxu1 %vm1877_vm5, %v7196_v10  ;;  %v7208_v10 = vld [vmem:[%s8184_s11 + $0x8] sm:$0xff]  }
 0x2a5   : > { %6593 = vmatprep.subr.bf16.mxu0 %v7208_v10 }
 0x2a6   : > { %6594 = vmatpush3.bf16.msra.mxu0 %v7208_v10  ;;  %v7212_v10 = vld [vmem:[%s8186_s13] sm:$0xff]  }
 0x2a7   : > { %6522 = vmatpush3.bf16.msra.mxu1 %v2202_v11 }
 0x2a8   : > { %6531 = vmatprep.subr.bf16.mxu1 %v7197_v12 }
 0x2aa   : > { %6516 = vmatmul.mubr.msk.bf16.gmra.mrb[8].mxu1 %vm1800_vm6, %v6070_v14 }
 0x2ab   : > { %6523 = vmatprep.mubr.msk.bf16.mxu1 %vm1800_vm6, %v6071_v15 }
 0x2b2   : > { %6524 = vmatmul.mubr.msk.bf16.vlgmr.msra.gmra.mrb[4].mxu1 %vm1800_vm6, %v6072_v20 }
 0x2b3   : > { %6532 = vmatpush3.bf16.msra.mxu1 %v7197_v12  ;;  %6527 = vmatprep.mubr.msk.bf16.mxu1 %vm1800_vm6, %v6073_v23  ;;  %v7209_v12 = vld [vmem:[%s8184_s11 + $0x10] sm:$0xff]  }
 0x2b4   : > { %7128 = vmatprep.subr.msk.bf16.mxu1 %vm1877_vm5, %v7198_v22  ;;  %6595 = vmatprep.subr.bf16.mxu0 %v7209_v12 }
 0x2b5   : > { %6596 = vmatpush3.bf16.msra.mxu0 %v7209_v12 }
 0x2b7   : > { %6534 = vmatpush3.bf16.msra.mxu1 %v2309_v35 }
 0x2b8   : > { %6543 = vmatprep.subr.bf16.mxu1 %v7199_v36 }
 0x2ba   : > { %6528 = vmatmul.mubr.msk.bf16.gmra.mrb[8].mxu1 %vm1800_vm6, %v6074_v27 }
 0x2bb   : > { %6535 = vmatprep.mubr.msk.bf16.mxu1 %vm1800_vm6, %v6075_v28 }
 0x2c2   : > { %6536 = vmatmul.mubr.msk.bf16.vlgmr.msra.gmra.mrb[4].mxu1 %vm1800_vm6, %v6076_v29 }
 0x2c3   : > { %6544 = vmatpush3.bf16.msra.mxu1 %v7199_v36  ;;  %6539 = vmatprep.mubr.msk.bf16.mxu1 %vm1800_vm6, %v6077_v31 }
 0x2c4   : > { %7129 = vmatprep.subr.msk.bf16.mxu1 %vm1877_vm5, %v7200_v30  ;;  %v5763_v30 = vld [vmem:[%s8182_s9] ss:$0 sm:$0xff] }
 0x2c7   : > { %6546 = vmatpush3.bf16.msra.mxu1 %v2404_v32 }
 0x2c8   : > { %6555 = vmatprep.subr.bf16.mxu1 %v7201_v33 }
 0x2ca   : > { %6540 = vmatmul.mubr.msk.bf16.gmra.mrb[8].mxu1 %vm1800_vm6, %v6078_v37 }
 0x2cb   : > { %6547 = vmatprep.mubr.msk.bf16.mxu1 %vm1800_vm6, %v6072_v20 }
 0x2d2   : > { %6548 = vmatmul.mubr.msk.bf16.vlgmr.msra.gmra.mrb[4].mxu1 %vm1800_vm6, %v6073_v23 }
 0x2d3   : > { %6556 = vmatpush3.bf16.msra.mxu1 %v7201_v33  ;;  %6551 = vmatprep.mubr.msk.bf16.mxu1 %vm1800_vm6, %v6074_v27 }
 0x2d4   : > { %7130 = vmatprep.subr.msk.bf16.mxu1 %vm1877_vm5, %v7202_v38  ;;  %v5764_v38 = vld [vmem:[%s8183_s10] ss:$0 sm:$0xff] }
 0x2d7   : > { %6558 = vmatpush3.bf16.msra.mxu1 %v2545_v39 }
 0x2d8   : > { %6567 = vmatprep.subr.bf16.mxu1 %v7203_v40 }
 0x2da   : > { %6552 = vmatmul.mubr.msk.bf16.gmra.mrb[8].mxu1 %vm1800_vm6, %v6079_v42 }
 0x2db   : > { %6559 = vmatprep.mubr.msk.bf16.mxu1 %vm1800_vm6, %v6080_v43 }
 0x2e2   : > { %6560 = vmatmul.mubr.msk.bf16.vlgmr.msra.gmra.mrb[4].mxu1 %vm1800_vm6, %v6081_v47 }
 0x2e3   : > { %6568 = vmatpush3.bf16.msra.mxu1 %v7203_v40  ;;  %6563 = vmatprep.mubr.msk.bf16.mxu1 %vm1800_vm6, %v6082_v50 }
 0x2e4   : > { %7131 = vmatprep.subr.msk.bf16.mxu1 %vm1877_vm5, %v7204_v49 }
 0x2e7   : > { %6570 = vmatpush3.bf16.msra.mxu1 %v2652_v60 }
 0x2e8   : > { %6579 = vmatprep.subr.bf16.mxu1 %v7205_v61 }
 0x2ea   : > { %6564 = vmatmul.mubr.msk.bf16.gmra.mrb[8].mxu1 %vm1800_vm6, %v6083_v53 }
 0x2eb   : > { %6571 = vmatprep.mubr.msk.bf16.mxu1 %vm1800_vm6, %v6084_v54 }
 0x2f2   : > { %6572 = vmatmul.mubr.msk.bf16.vlgmr.msra.gmra.mrb[4].mxu1 %vm1800_vm6, %v6085_v55 }
 0x2f3   : > { %6580 = vmatpush3.bf16.msra.mxu1 %v7205_v61  ;;  %6575 = vmatprep.mubr.msk.bf16.mxu1 %vm1800_vm6, %v6086_v57 }
 0x2f4   : > { %7132 = vmatprep.subr.msk.bf16.mxu1 %vm1877_vm5, %v7206_v56 }
 0x2f7   : > { %6582 = vmatpush3.bf16.msra.mxu1 %v2747_v58 }
 0x2fa   : > { %6576 = vmatmul.mubr.msk.bf16.gmra.mrb[8].mxu1 %vm1800_vm6, %v6087_v62 }
 0x2fb   : > { %6583 = vmatprep.mubr.msk.bf16.mxu1 %vm1800_vm6, %v6081_v47 }
 0x302   : > { %6584 = vmatmul.mubr.msk.bf16.vlgmr.msra.gmra.mrb[4].mxu1 %vm1800_vm6, %v6082_v50 }
 0x303   : > { %6587 = vmatprep.mubr.msk.bf16.mxu1 %vm1800_vm6, %v6083_v53 }
 0x30a   : > { %6588 = vmatmul.mubr.msk.bf16.gmra.mrb[8].mxu1 %vm1800_vm6, %v6088_v63 }
 0x3d5   : > { %v6585_v1 = vpop.f32.mrb[4].mxu1 }
 0x3d6   : > { %v2831_v2 = vadd.f32 %v6585_v1, %v5762_v0  ;;  %v2783_v3 = vpop.f32.mrb[5].mxu1 }
 0x3d7   : > { %v2829_v5 = vadd.f32 %v5762_v0, %v2783_v3  ;;  %v6586_v6 = vpop.f32.mrb[6].mxu1 }
 0x3d8   : > { %v2839_v7 = vmul.f32 2.0, %v2831_v2  ;;  %v2832_v8 = vadd.f32 %v6586_v6, %v5762_v0  ;;  %v2786_v26 = vpop.f32.mrb[7].mxu1 }
 0x3d9   : > { %v2837_v18 = vmul.f32 2.0, %v2829_v5  ;;  %v2830_v9 = vadd.f32 %v5762_v0, %v2786_v26 }
 0x3da   : > { %2857 = vrot.lane.b32.xlu1 %v2839_v7, %s7324_s23  ;;  %v2840_v11 = vmul.f32 2.0, %v2832_v8 }
 0x3db   : > { %2853 = vrot.lane.b32.xlu0 %v2837_v18, %s7324_s23  ;;  %v2838_v13 = vmul.f32 2.0, %v2830_v9  ;;  %v7210_v18 = vld [vmem:[%s8186_s13 + $0x30] sm:$0xff]   ;;  %v7211_v9 = vld [vmem:[%s8186_s13 + $0x38] sm:$0xff]  }
 0x3dc   : > { %6605 = vmatprep.subr.bf16.mxu0 %v7210_v18 }
 0x3dd   : > { %v6589_v14 = vpop.f32.mrb[8].mxu1 }
 0x3de   : > { %2859 = vrot.lane.b32.xlu1 %v2840_v11, %s7324_s23  ;;  %v2799_v15 = vpop.f32.mrb[9].mxu1  ;;  %v2835_v20 = vadd.f32 %v6589_v14, %v5762_v0  ;;  %v5765_v11 = vld [vmem:[%s8185_s12] ss:$0 sm:$0xff] }
 0x3df   : > { %v2833_v16 = vadd.f32 %v5762_v0, %v2799_v15  ;;  %2855 = vrot.lane.b32.xlu0 %v2838_v13, %s7324_s23  ;;  %v6590_v17 = vpop.f32.mrb[10].mxu1 }
 0x3e0   : > { %v2802_v19 = vpop.f32.mrb[11].mxu1  ;;  %v2836_v23 = vadd.f32 %v6590_v17, %v5762_v0  ;;  %v2843_v36 = vmul.f32 2.0, %v2835_v20 }
 0x3e1   : > { %v2841_v21 = vmul.f32 2.0, %v2833_v16  ;;  %v2834_v22 = vadd.f32 %v5762_v0, %v2802_v19 }
 0x3e2   : > { %v2844_v24 = vmul.f32 2.0, %v2836_v23 }
 0x3e3   : > { %v2842_v35 = vmul.f32 2.0, %v2834_v22  ;;  %2861 = vrot.lane.b32.xlu0 %v2841_v21, %s7324_s23 }
 0x3e5   : > { %2863 = vrot.lane.b32.xlu1 %v2842_v35, %s7324_s23 }
 0x3e7   : > { %2865 = vrot.lane.b32.xlu0 %v2843_v36, %s7324_s23 }
 0x3e9   : > { %2867 = vrot.lane.b32.xlu1 %v2844_v24, %s7324_s23  ;;  %s7325_s23 = smov 48  }
 0x44c   : > { %v2858_v25 = vpop.permute.xlu1 %2857 }
 0x44d   : > { %2880 = vst.msk [vmem:[#allocation3 + $0x10] sm:$0xff] %vm2877_vm7, %v2858_v25  ;;  %v2854_v27 = vpop.permute.xlu0 %2853 }
 0x44e   : > { %2878 = vst.msk [vmem:[#allocation3] sm:$0xff] %vm2877_vm7, %v2854_v27 }
 0x450   : > { %v2860_v28 = vpop.permute.xlu1 %2859 }
 0x451   : > { %2881 = vst.msk [vmem:[#allocation3 + $0x18] sm:$0xff] %vm2877_vm7, %v2860_v28  ;;  %v2856_v29 = vpop.permute.xlu0 %2855 }
 0x452   : > { %2879 = vst.msk [vmem:[#allocation3 + $0x8] sm:$0xff] %vm2877_vm7, %v2856_v29 }
 0x454   : > { %v2888_v31 = vld [vmem:[#allocation3 + $0x10] sm:$0xff] }
 0x455   : > { %v2862_v32 = vpop.permute.xlu0 %2861  ;;  %v2886_v33 = vld [vmem:[#allocation3] sm:$0xff]  ;;  %v2903_v39 = vmul.f32 %v5763_v30, %v2888_v31 }
 0x456   : > { %2882 = vst.msk [vmem:[#allocation3 + $0x20] sm:$0xff] %vm2877_vm7, %v2862_v32  ;;  %v2901_v34 = vmul.f32 %v5763_v30, %v2886_v33 }
 0x457   : > { %v2864_v37 = vpop.permute.xlu1 %2863  ;;  %v2918_v47 = vadd.f32 %v5764_v38, %v2903_v39 }
 0x458   : > { %2883 = vst.msk [vmem:[#allocation3 + $0x28] sm:$0xff] %vm2877_vm7, %v2864_v37  ;;  %v2889_v40 = vld [vmem:[#allocation3 + $0x18] sm:$0xff]  ;;  %v2916_v45 = vadd.f32 %v5764_v38, %v2901_v34 }
 0x459   : > { %v2866_v41 = vpop.permute.xlu0 %2865  ;;  %v2887_v42 = vld [vmem:[#allocation3 + $0x8] sm:$0xff]  ;;  %v2904_v43 = vmul.f32 %v5763_v30, %v2889_v40  ;;  %v2926_v53 = vmax.f32 %v2918_v47, 0.0 }
 0x45a   : > { %2884 = vst.msk [vmem:[#allocation3 + $0x30] sm:$0xff] %vm2877_vm7, %v2866_v41  ;;  %v2902_v44 = vmul.f32 %v5763_v30, %v2887_v42  ;;  %v2924_v61 = vmax.f32 %v2916_v45, 0.0  ;;  %v7214_v45 = vld [vmem:[%s8186_s13 + $0x60] sm:$0xff]  }
 0x45b   : > { %v2868_v46 = vpop.permute.xlu1 %2867  ;;  %v2919_v48 = vadd.f32 %v5764_v38, %v2904_v43 }
 0x45c   : > { %2885 = vst.msk [vmem:[#allocation3 + $0x38] sm:$0xff] %vm2877_vm7, %v2868_v46  ;;  %v2917_v49 = vadd.f32 %v5764_v38, %v2902_v44  ;;  %v7213_v44 = vld [vmem:[%s8186_s13 + $0x8] sm:$0xff]  }
 0x45d   : > { %v2927_v50 = vmax.f32 %v2919_v48, 0.0  ;;  %v2890_v60 = vld [vmem:[#allocation3 + $0x20] sm:$0xff] }
 0x45e   : > { %v2925_v51 = vmax.f32 %v2917_v49, 0.0  ;;  %v2905_v52 = vmul.f32 %v5763_v30, %v2890_v60  ;;  %v7832_v49 = vld [vmem:[#allocation2] sm:$0xff] }
 0x45f   : > { %v2891_v54 = vld [vmem:[#allocation3 + $0x28] sm:$0xff]  ;;  %v2933_v58 = vpack.c.bf16 %v2927_v50, %v2926_v53 }
 0x460   : > { %v2932_v55 = vpack.c.bf16 %v2925_v51, %v2924_v61  ;;  %v2906_v56 = vmul.f32 %v5763_v30, %v2891_v54  ;;  %v2920_v57 = vadd.f32 %v5764_v38, %v2905_v52  ;;  %v7215_v53 = vld [vmem:[%s8186_s13 + $0x68] sm:$0xff]  }
 0x461   : > { %v2892_v59 = vld [vmem:[#allocation3 + $0x30] sm:$0xff] }
 0x462   : > { %6597 = vmatprep.mubr.msk.bf16.mxu0 %vm2967_vm8, %v2932_v55  ;;  %v2921_v62 = vadd.f32 %v5764_v38, %v2906_v56  ;;  %v2907_v63 = vmul.f32 %v5763_v30, %v2892_v59  ;;  %v2928_v1 = vmax.f32 %v2920_v57, 0.0  ;;  %v7216_v55 = vld [vmem:[%s8186_s13 + $0x10] sm:$0xff]   ;;  %v7217_v57 = vld [vmem:[%s8186_s13 + $0x18] sm:$0xff]  }
 0x463   : > { %6598 = vmatmul.mubr.msk.bf16.vlgmr.msra.gmra.mrb[12].mxu0 %vm2967_vm8, %v2933_v58  ;;  %v2893_v0 = vld [vmem:[#allocation3 + $0x38] sm:$0xff]  ;;  %v7218_v58 = vld [vmem:[%s8186_s13 + $0x40] sm:$0xff]   ;;  %v7856_v59 = vld [vmem:[#allocation2 + $0x90] sm:$0xff] }
 0x464   : > { %v2929_v2 = vmax.f32 %v2921_v62, 0.0  ;;  %v2908_v3 = vmul.f32 %v5763_v30, %v2893_v0  ;;  %v2922_v4 = vadd.f32 %v5764_v38, %v2907_v63  ;;  %6606 = vmatpush3.bf16.msra.mxu0 %v7210_v18  ;;  %v7858_v62 = vld [vmem:[#allocation2 + $0x1] sm:$0xff] }
 0x465   : > { %6607 = vmatprep.subr.bf16.mxu0 %v7211_v9 }
 0x466   : > { %v2934_v5 = vpack.c.bf16 %v2929_v2, %v2928_v1  ;;  %v2923_v6 = vadd.f32 %v5764_v38, %v2908_v3  ;;  %v2930_v7 = vmax.f32 %v2922_v4, 0.0 }
 0x468   : > { %6601 = vmatprep.mubr.msk.bf16.mxu0 %vm2967_vm8, %v2934_v5  ;;  %v2931_v8 = vmax.f32 %v2923_v6, 0.0  ;;  %6608 = vmatpush3.bf16.msra.mxu0 %v7211_v9 }
 0x469   : > { %6617 = vmatprep.subr.bf16.mxu0 %v7212_v10 }
 0x46a   : > { %v2935_v26 = vpack.c.bf16 %v2931_v8, %v2930_v7  ;;  %v7219_v7 = vld [vmem:[%s8186_s13 + $0x48] sm:$0xff]  }
 0x46c   : > { %6602 = vmatmul.mubr.msk.bf16.gmra.mrb[16].mxu0 %vm2967_vm8, %v2935_v26  ;;  %v7220_v26 = vld [vmem:[%s8186_s13 + $0x70] sm:$0xff]  }
 0x536   : > { %v6599_v12 = vpop.f32.mrb[12].mxu0 }
 0x537   : > { %v3023_v13 = vadd.f32 %v6599_v12, %v5765_v11  ;;  %v3014_v14 = vpop.f32.mrb[13].mxu0 }
 0x538   : > { %v3015_v15 = vadd.f32 %v5765_v11, %v3014_v14  ;;  %v6600_v16 = vpop.f32.mrb[14].mxu0 }
 0x539   : > { %v3047_v17 = vmax.f32 %v3023_v13, 0.0  ;;  %v3026_v19 = vadd.f32 %v6600_v16, %v5765_v11  ;;  %v3017_v20 = vpop.f32.mrb[15].mxu0  ;;  %v7221_v13 = vld [vmem:[%s8186_s13 + $0x78] sm:$0xff]  }
 0x53a   : > { %v3045_v21 = vmax.f32 %v3015_v15, 0.0  ;;  %v3018_v22 = vadd.f32 %v5765_v11, %v3017_v20  ;;  %v7222_v15 = vld [vmem:[%s8186_s13 + $0x20] sm:$0xff]   ;;  %v7224_v20 = vld [vmem:[%s8186_s13 + $0x50] sm:$0xff]  }
 0x53b   : > { %3055 = vst.msk [vmem:[#allocation2 + $0x31] sm:$0xff] %vm1633_vm4, %v3047_v17  ;;  %v3048_v23 = vmax.f32 %v3026_v19, 0.0  ;;  %v7223_v19 = vld [vmem:[%s8186_s13 + $0x28] sm:$0xff]  }
 0x53c   : > { %3053 = vst.msk [vmem:[#allocation2 + $0x11] sm:$0xff] %vm1633_vm4, %v3045_v21  ;;  %v3046_v35 = vmax.f32 %v3018_v22, 0.0  ;;  %v7892_v21 = vld [vmem:[#allocation2 + $0x91] sm:$0xff]  ;;  %v7894_v22 = vld [vmem:[#allocation2 + $0x2] sm:$0xff] }
 0x53d   : > { %3056 = vst.msk [vmem:[#allocation2 + $0x41] sm:$0xff] %vm1633_vm4, %v3048_v23 }
 0x53e   : > { %3054 = vst.msk [vmem:[#allocation2 + $0x21] sm:$0xff] %vm1633_vm4, %v3046_v35 }
 0x53f   : > { %v6603_v36 = vpop.f32.mrb[16].mxu0 }
 0x540   : > { %v3039_v24 = vadd.f32 %v6603_v36, %v5765_v11  ;;  %v3030_v25 = vpop.f32.mrb[17].mxu0 }
 0x541   : > { %v3031_v27 = vadd.f32 %v5765_v11, %v3030_v25  ;;  %v6604_v28 = vpop.f32.mrb[18].mxu0 }
 0x542   : > { %v3051_v29 = vmax.f32 %v3039_v24, 0.0  ;;  %v3042_v30 = vadd.f32 %v6604_v28, %v5765_v11  ;;  %v3033_v31 = vpop.f32.mrb[19].mxu0  ;;  %v3064_v41 = vld [vmem:[#allocation2 + $0x30] sm:$0xff] }
 0x543   : > { %v3049_v32 = vmax.f32 %v3031_v27, 0.0  ;;  %v3034_v33 = vadd.f32 %v5765_v11, %v3033_v31  ;;  %v3062_v39 = vld [vmem:[#allocation2 + $0x10] sm:$0xff] }
 0x544   : > { %3059 = vst.msk [vmem:[#allocation2 + $0x71] sm:$0xff] %vm1633_vm4, %v3051_v29  ;;  %v3052_v34 = vmax.f32 %v3042_v30, 0.0  ;;  %v3065_v37 = vld [vmem:[#allocation2 + $0x40] sm:$0xff]  ;;  %v6093_v51 = vpack.c.bf16 %v3062_v39, %v7832_v49  ;;  %v3391_v63 = vld [vmem:[#allocation2 + $0x11] sm:$0xff] }
 0x545   : > { %3057 = vst.msk [vmem:[#allocation2 + $0x51] sm:$0xff] %vm1633_vm4, %v3049_v32  ;;  %v3050_v38 = vmax.f32 %v3034_v33, 0.0  ;;  %v3063_v40 = vld [vmem:[#allocation2 + $0x20] sm:$0xff]  ;;  %v6090_v43 = vpack.c.bf16 %v3065_v37, %v3064_v41  ;;  %v6098_v1 = vpack.c.bf16 %v3391_v63, %v7858_v62  ;;  %v3393_v4 = vld [vmem:[#allocation2 + $0x31] sm:$0xff] }
 0x546   : > { %3060 = vst.msk [vmem:[#allocation2 + $0x81] sm:$0xff] %vm1633_vm4, %v3052_v34  ;;  %v6089_v42 = vpack.c.bf16 %v3063_v40, %v3062_v39  ;;  %v6094_v52 = vpack.c.bf16 %v3064_v41, %v3063_v40  ;;  %v3392_v2 = vld [vmem:[#allocation2 + $0x21] sm:$0xff]  ;;  %v3737_v23 = vld [vmem:[#allocation2 + $0x12] sm:$0xff] }
 0x547   : > { %3058 = vst.msk [vmem:[#allocation2 + $0x61] sm:$0xff] %vm1633_vm4, %v3050_v38  ;;  %v6099_v5 = vpack.c.bf16 %v3393_v4, %v3392_v2  ;;  %v3394_v6 = vld [vmem:[#allocation2 + $0x41] sm:$0xff]  ;;  %v6102_v11 = vpack.c.bf16 %v3392_v2, %v3391_v63  ;;  %v6107_v36 = vpack.c.bf16 %v3737_v23, %v7894_v22  ;;  %v3739_v27 = vld [vmem:[#allocation2 + $0x32] sm:$0xff] }
 0x548   : > { %6609 = vmatprep.mubr.msk.bf16.mxu0 %vm1633_vm4, %v6089_v42  ;;  %v6103_v12 = vpack.c.bf16 %v3394_v6, %v3393_v4  ;;  %v3738_v24 = vld [vmem:[#allocation2 + $0x22] sm:$0xff]  ;;  %v7225_v30 = vld [vmem:[%s8186_s13 + $0x58] sm:$0xff]  }
 0x549   : > { %6610 = vmatmul.mubr.msk.bf16.vlgmr.msra.gmra.mrb[20].mxu0 %vm1633_vm4, %v6090_v43  ;;  %v6108_v28 = vpack.c.bf16 %v3739_v27, %v3738_v24  ;;  %v3740_v29 = vld [vmem:[#allocation2 + $0x42] sm:$0xff]  ;;  %v6111_v38 = vpack.c.bf16 %v3738_v24, %v3737_v23  ;;  %v7231_v63 = vld [vmem:[%s8190_s17 + $0x18] sm:$0xff]  }
 0x54a   : > { %6618 = vmatpush3.bf16.msra.mxu0 %v7212_v10  ;;  %v7226_v32 = vld [vmem:[%s8186_s13 + $0x80] sm:$0xff]   ;;  %v6112_v39 = vpack.c.bf16 %v3740_v29, %v3739_v27  ;;  %v7227_v40 = vld [vmem:[%s8186_s13 + $0x88] sm:$0xff]  }
 0x54b   : > { %6619 = vmatprep.subr.bf16.mxu0 %v7213_v44  ;;  %v3068_v60 = vld [vmem:[#allocation2 + $0x70] sm:$0xff] }
 0x54c   : > { %v3066_v47 = vld [vmem:[#allocation2 + $0x50] sm:$0xff] }
 0x54d   : > { %v3069_v46 = vld [vmem:[#allocation2 + $0x80] sm:$0xff]  ;;  %v6095_v54 = vpack.c.bf16 %v3066_v47, %v3065_v37  ;;  %v3395_v3 = vld [vmem:[#allocation2 + $0x51] sm:$0xff] }
 0x54e   : > { %v3067_v48 = vld [vmem:[#allocation2 + $0x60] sm:$0xff]  ;;  %6620 = vmatpush3.bf16.msra.mxu0 %v7213_v44  ;;  %v6092_v61 = vpack.c.bf16 %v3069_v46, %v3068_v60  ;;  %v6097_v0 = vpack.c.bf16 %v7856_v59, %v3069_v46  ;;  %v6100_v8 = vpack.c.bf16 %v3395_v3, %v3394_v6  ;;  %v3397_v9 = vld [vmem:[#allocation2 + $0x71] sm:$0xff] }
 0x54f   : > { %v6091_v50 = vpack.c.bf16 %v3067_v48, %v3066_v47  ;;  %6629 = vmatprep.subr.bf16.mxu0 %v7214_v45  ;;  %v6096_v56 = vpack.c.bf16 %v3068_v60, %v3067_v48  ;;  %v3396_v18 = vld [vmem:[#allocation2 + $0x61] sm:$0xff]  ;;  %v3741_v25 = vld [vmem:[#allocation2 + $0x52] sm:$0xff]  ;;  %v5886_v47 = vld [vmem:[%s8187_s14] ss:$0 sm:$0xff] }
 0x550   : > { %v6101_v10 = vpack.c.bf16 %v3397_v9, %v3396_v18  ;;  %v6104_v14 = vpack.c.bf16 %v3396_v18, %v3395_v3  ;;  %v3398_v16 = vld [vmem:[#allocation2 + $0x81] sm:$0xff]  ;;  %v6109_v31 = vpack.c.bf16 %v3741_v25, %v3740_v29  ;;  %v3743_v34 = vld [vmem:[#allocation2 + $0x72] sm:$0xff] }
 0x551   : > { %6613 = vmatprep.mubr.msk.bf16.mxu0 %vm1633_vm4, %v6091_v50  ;;  %v6105_v17 = vpack.c.bf16 %v3398_v16, %v3397_v9  ;;  %v6106_v35 = vpack.c.bf16 %v7892_v21, %v3398_v16  ;;  %v3742_v33 = vld [vmem:[#allocation2 + $0x62] sm:$0xff]  ;;  %v7919_v44 = vld [vmem:[#allocation2 + $0x92] sm:$0xff]  ;;  %v5887_v16 = vld [vmem:[%s8188_s15] ss:$0 sm:$0xff] }
 0x552   : > { %6614 = vmatmul.mubr.msk.bf16.gmra.mrb[24].mxu0 %vm1633_vm4, %v6092_v61  ;;  %v6110_v37 = vpack.c.bf16 %v3743_v34, %v3742_v33  ;;  %v6113_v41 = vpack.c.bf16 %v3742_v33, %v3741_v25  ;;  %v3744_v42 = vld [vmem:[#allocation2 + $0x82] sm:$0xff] }
 0x553   : > { %6621 = vmatprep.mubr.msk.bf16.mxu0 %vm1633_vm4, %v6093_v51  ;;  %v6114_v43 = vpack.c.bf16 %v3744_v42, %v3743_v34  ;;  %v7228_v46 = vld [vmem:[%s8190_s17] sm:$0xff]   ;;  %v7229_v60 = vld [vmem:[%s8190_s17 + $0x8] sm:$0xff]  }
 0x554   : > { %6713 = vmatprep.subr.bf16.mxu1 %v7228_v46 }
 0x555   : > { %6714 = vmatpush3.bf16.msra.mxu1 %v7228_v46 }
 0x556   : > { %6715 = vmatprep.subr.bf16.mxu1 %v7229_v60 }
 0x559   : > { %6716 = vmatpush3.bf16.msra.mxu1 %v7229_v60 }
 0x55a   : > { %6622 = vmatmul.mubr.msk.bf16.vlgmr.msra.gmra.mrb[20].mxu0 %vm1633_vm4, %v6094_v52 }
 0x55b   : > { %6630 = vmatpush3.bf16.msra.mxu0 %v7214_v45  ;;  %6625 = vmatprep.mubr.msk.bf16.mxu0 %vm1633_vm4, %v6095_v54  ;;  %v6115_v45 = vpack.c.bf16 %v7919_v44, %v3744_v42 }
 0x55c   : > { %6631 = vmatprep.subr.bf16.mxu0 %v7215_v53 }
 0x55f   : > { %6632 = vmatpush3.bf16.msra.mxu0 %v7215_v53 }
 0x560   : > { %6641 = vmatprep.subr.bf16.mxu0 %v7216_v55 }
 0x562   : > { %6626 = vmatmul.mubr.msk.bf16.gmra.mrb[24].mxu0 %vm1633_vm4, %v6096_v56 }
 0x563   : > { %6633 = vmatprep.mubr.msk.bf16.mxu0 %vm1633_vm4, %v6094_v52 }
 0x56a   : > { %6634 = vmatmul.mubr.msk.bf16.vlgmr.msra.gmra.mrb[20].mxu0 %vm1633_vm4, %v6095_v54 }
 0x56b   : > { %6642 = vmatpush3.bf16.msra.mxu0 %v7216_v55  ;;  %6637 = vmatprep.mubr.msk.bf16.mxu0 %vm1633_vm4, %v6096_v56  ;;  %v7230_v56 = vld [vmem:[%s8190_s17 + $0x10] sm:$0xff]  }
 0x56c   : > { %6643 = vmatprep.subr.bf16.mxu0 %v7217_v57  ;;  %6717 = vmatprep.subr.bf16.mxu1 %v7230_v56 }
 0x56d   : > { %6718 = vmatpush3.bf16.msra.mxu1 %v7230_v56 }
 0x56e   : > { %6719 = vmatprep.subr.bf16.mxu1 %v7231_v63 }
 0x56f   : > { %6644 = vmatpush3.bf16.msra.mxu0 %v7217_v57 }
 0x570   : > { %6653 = vmatprep.subr.bf16.mxu0 %v7218_v58 }
 0x571   : > { %6720 = vmatpush3.bf16.msra.mxu1 %v7231_v63 }
 0x572   : > { %6638 = vmatmul.mubr.msk.bf16.gmra.mrb[24].mxu0 %vm1633_vm4, %v6097_v0 }
 0x573   : > { %6645 = vmatprep.mubr.msk.bf16.mxu0 %vm1633_vm4, %v6098_v1 }
 0x57a   : > { %6646 = vmatmul.mubr.msk.bf16.vlgmr.msra.gmra.mrb[20].mxu0 %vm1633_vm4, %v6099_v5 }
 0x57b   : > { %6654 = vmatpush3.bf16.msra.mxu0 %v7218_v58  ;;  %6649 = vmatprep.mubr.msk.bf16.mxu0 %vm1633_vm4, %v6100_v8 }
 0x57c   : > { %6655 = vmatprep.subr.bf16.mxu0 %v7219_v7 }
 0x57f   : > { %6656 = vmatpush3.bf16.msra.mxu0 %v7219_v7 }
 0x580   : > { %6665 = vmatprep.subr.bf16.mxu0 %v7220_v26 }
 0x582   : > { %6650 = vmatmul.mubr.msk.bf16.gmra.mrb[24].mxu0 %vm1633_vm4, %v6101_v10 }
 0x583   : > { %6657 = vmatprep.mubr.msk.bf16.mxu0 %vm1633_vm4, %v6102_v11 }
 0x58a   : > { %6658 = vmatmul.mubr.msk.bf16.vlgmr.msra.gmra.mrb[20].mxu0 %vm1633_vm4, %v6103_v12 }
 0x58b   : > { %6666 = vmatpush3.bf16.msra.mxu0 %v7220_v26  ;;  %6661 = vmatprep.mubr.msk.bf16.mxu0 %vm1633_vm4, %v6104_v14 }
 0x58c   : > { %6667 = vmatprep.subr.bf16.mxu0 %v7221_v13 }
 0x58f   : > { %6668 = vmatpush3.bf16.msra.mxu0 %v7221_v13 }
 0x590   : > { %6677 = vmatprep.subr.bf16.mxu0 %v7222_v15 }
 0x592   : > { %6662 = vmatmul.mubr.msk.bf16.gmra.mrb[24].mxu0 %vm1633_vm4, %v6105_v17 }
 0x593   : > { %6669 = vmatprep.mubr.msk.bf16.mxu0 %vm1633_vm4, %v6099_v5 }
 0x59a   : > { %6670 = vmatmul.mubr.msk.bf16.vlgmr.msra.gmra.mrb[20].mxu0 %vm1633_vm4, %v6100_v8 }
 0x59b   : > { %6678 = vmatpush3.bf16.msra.mxu0 %v7222_v15  ;;  %6673 = vmatprep.mubr.msk.bf16.mxu0 %vm1633_vm4, %v6101_v10 }
 0x59c   : > { %6679 = vmatprep.subr.bf16.mxu0 %v7223_v19 }
 0x59f   : > { %6680 = vmatpush3.bf16.msra.mxu0 %v7223_v19 }
 0x5a0   : > { %6689 = vmatprep.subr.bf16.mxu0 %v7224_v20 }
 0x5a2   : > { %6674 = vmatmul.mubr.msk.bf16.gmra.mrb[24].mxu0 %vm1633_vm4, %v6106_v35 }
 0x5a3   : > { %6681 = vmatprep.mubr.msk.bf16.mxu0 %vm1633_vm4, %v6107_v36 }
 0x5aa   : > { %6682 = vmatmul.mubr.msk.bf16.vlgmr.msra.gmra.mrb[20].mxu0 %vm1633_vm4, %v6108_v28 }
 0x5ab   : > { %6690 = vmatpush3.bf16.msra.mxu0 %v7224_v20  ;;  %6685 = vmatprep.mubr.msk.bf16.mxu0 %vm1633_vm4, %v6109_v31  ;;  %v5888_v20 = vld [vmem:[%s8189_s16] ss:$0 sm:$0xff] }
 0x5ac   : > { %6691 = vmatprep.subr.bf16.mxu0 %v7225_v30 }
 0x5af   : > { %6692 = vmatpush3.bf16.msra.mxu0 %v7225_v30 }
 0x5b0   : > { %6701 = vmatprep.subr.bf16.mxu0 %v7226_v32 }
 0x5b2   : > { %6686 = vmatmul.mubr.msk.bf16.gmra.mrb[24].mxu0 %vm1633_vm4, %v6110_v37 }
 0x5b3   : > { %6693 = vmatprep.mubr.msk.bf16.mxu0 %vm1633_vm4, %v6111_v38 }
 0x5ba   : > { %6694 = vmatmul.mubr.msk.bf16.vlgmr.msra.gmra.mrb[20].mxu0 %vm1633_vm4, %v6112_v39 }
 0x5bb   : > { %6702 = vmatpush3.bf16.msra.mxu0 %v7226_v32  ;;  %6697 = vmatprep.mubr.msk.bf16.mxu0 %vm1633_vm4, %v6113_v41 }
 0x5bc   : > { %6703 = vmatprep.subr.bf16.mxu0 %v7227_v40 }
 0x5bf   : > { %6704 = vmatpush3.bf16.msra.mxu0 %v7227_v40 }
 0x5c2   : > { %6698 = vmatmul.mubr.msk.bf16.gmra.mrb[24].mxu0 %vm1633_vm4, %v6114_v43 }
 0x5c3   : > { %6705 = vmatprep.mubr.msk.bf16.mxu0 %vm1633_vm4, %v6108_v28 }
 0x5ca   : > { %6706 = vmatmul.mubr.msk.bf16.vlgmr.msra.gmra.mrb[20].mxu0 %vm1633_vm4, %v6109_v31 }
 0x5cb   : > { %6709 = vmatprep.mubr.msk.bf16.mxu0 %vm1633_vm4, %v6110_v37 }
 0x5d2   : > { %6710 = vmatmul.mubr.msk.bf16.gmra.mrb[24].mxu0 %vm1633_vm4, %v6115_v45 }
 0x69d   : > { %v6707_v48 = vpop.f32.mrb[20].mxu0 }
 0x69e   : > { %v4043_v50 = vpop.f32.mrb[21].mxu0  ;;  %v4091_v53 = vadd.f32 %v6707_v48, %v5886_v47 }
 0x69f   : > { %v4089_v61 = vadd.f32 %v5886_v47, %v4043_v50  ;;  %v6708_v51 = vpop.f32.mrb[22].mxu0 }
 0x6a0   : > { %v4046_v52 = vpop.f32.mrb[23].mxu0  ;;  %v4092_v57 = vadd.f32 %v6708_v51, %v5886_v47  ;;  %v4099_v0 = vmul.f32 2.0, %v4091_v53 }
 0x6a1   : > { %v4097_v54 = vmul.f32 2.0, %v4089_v61  ;;  %v4090_v55 = vadd.f32 %v5886_v47, %v4046_v52 }
 0x6a2   : > { %v4100_v3 = vmul.f32 2.0, %v4092_v57 }
 0x6a3   : > { %v4098_v58 = vmul.f32 2.0, %v4090_v55  ;;  %4113 = vrot.lane.b32.xlu0 %v4097_v54, %s7325_s23 }
 0x6a5   : > { %4115 = vrot.lane.b32.xlu1 %v4098_v58, %s7325_s23  ;;  %v6711_v1 = vpop.f32.mrb[24].mxu0 }
 0x6a6   : > { %v4059_v2 = vpop.f32.mrb[25].mxu0  ;;  %v4095_v7 = vadd.f32 %v6711_v1, %v5886_v47 }
 0x6a7   : > { %v4093_v4 = vadd.f32 %v5886_v47, %v4059_v2  ;;  %4117 = vrot.lane.b32.xlu0 %v4099_v0, %s7325_s23  ;;  %v6712_v5 = vpop.f32.mrb[26].mxu0  ;;  %v7232_v2 = vld [vmem:[%s8192_s19 + $0x3c] sm:$0xff]  }
 0x6a8   : > { %v4062_v6 = vpop.f32.mrb[27].mxu0  ;;  %v4096_v18 = vadd.f32 %v6712_v5, %v5886_v47  ;;  %v4103_v10 = vmul.f32 2.0, %v4095_v7  ;;  %6729 = vmatprep.subr.bf16.mxu1 %v7232_v2  ;;  %v5889_v7 = vld [vmem:[%s8191_s18] ss:$0 sm:$0xff] }
 0x6a9   : > { %v4101_v8 = vmul.f32 2.0, %v4093_v4  ;;  %v4094_v26 = vadd.f32 %v5886_v47, %v4062_v6  ;;  %4119 = vrot.lane.b32.xlu1 %v4100_v3, %s7325_s23  ;;  %v7233_v3 = vld [vmem:[%s8192_s19 + $0x44] sm:$0xff]   ;;  %v7234_v4 = vld [vmem:[%s8192_s19 + $0x4c] ss:$0 sps:$4 sm:$0xff]  }
 0x6aa   : > { %v4104_v11 = vmul.f32 2.0, %v4096_v18  ;;  %v4408_v5 = vsel %vm1877_vm5, %v7234_v4, 0  ;;  %v7235_v6 = vld [vmem:[%s8192_s19] sm:$0xff]  }
 0x6ab   : > { %v4102_v9 = vmul.f32 2.0, %v4094_v26  ;;  %4121 = vrot.lane.b32.xlu0 %v4101_v8, %s7325_s23 }
 0x6ad   : > { %4123 = vrot.lane.b32.xlu1 %v4102_v9, %s7325_s23 }
 0x6af   : > { %4125 = vrot.lane.b32.xlu0 %v4103_v10, %s7325_s23 }
 0x6b1   : > { %4127 = vrot.lane.b32.xlu1 %v4104_v11, %s7325_s23 }
 0x715   : > { %v4114_v12 = vpop.permute.xlu0 %4113 }
 0x716   : > { %4138 = vst.msk [vmem:[#allocation3] sm:$0xff] %vm4137_vm9, %v4114_v12 }
 0x717   : > { %v4116_v13 = vpop.permute.xlu1 %4115 }
 0x718   : > { %4139 = vst.msk [vmem:[#allocation3 + $0x8] sm:$0xff] %vm4137_vm9, %v4116_v13 }
 0x719   : > { %v4118_v14 = vpop.permute.xlu0 %4117 }
 0x71a   : > { %4140 = vst.msk [vmem:[#allocation3 + $0x10] sm:$0xff] %vm4137_vm9, %v4118_v14 }
 0x71b   : > { %v4120_v15 = vpop.permute.xlu1 %4119 }
 0x71c   : > { %4141 = vst.msk [vmem:[#allocation3 + $0x18] sm:$0xff] %vm4137_vm9, %v4120_v15 }
 0x71d   : > { %v4122_v17 = vpop.permute.xlu0 %4121  ;;  %v4146_v19 = vld [vmem:[#allocation3] sm:$0xff] }
 0x71e   : > { %4142 = vst.msk [vmem:[#allocation3 + $0x20] sm:$0xff] %vm4137_vm9, %v4122_v17  ;;  %v4161_v23 = vmul.f32 %v5887_v16, %v4146_v19 }
 0x71f   : > { %v4124_v35 = vpop.permute.xlu1 %4123  ;;  %v4147_v36 = vld [vmem:[#allocation3 + $0x8] sm:$0xff] }
 0x720   : > { %4143 = vst.msk [vmem:[#allocation3 + $0x28] sm:$0xff] %vm4137_vm9, %v4124_v35  ;;  %v4162_v24 = vmul.f32 %v5887_v16, %v4147_v36  ;;  %v4176_v25 = vadd.f32 %v5888_v20, %v4161_v23 }
 0x721   : > { %v4126_v27 = vpop.permute.xlu0 %4125  ;;  %v4148_v28 = vld [vmem:[#allocation3 + $0x10] sm:$0xff] }
 0x722   : > { %4144 = vst.msk [vmem:[#allocation3 + $0x30] sm:$0xff] %vm4137_vm9, %v4126_v27  ;;  %v4177_v29 = vadd.f32 %v5888_v20, %v4162_v24  ;;  %v4163_v30 = vmul.f32 %v5887_v16, %v4148_v28  ;;  %v4184_v33 = vmax.f32 %v4176_v25, 0.0 }
 0x723   : > { %v4128_v31 = vpop.permute.xlu1 %4127  ;;  %v4149_v32 = vld [vmem:[#allocation3 + $0x18] sm:$0xff] }
 0x724   : > { %4145 = vst.msk [vmem:[#allocation3 + $0x38] sm:$0xff] %vm4137_vm9, %v4128_v31  ;;  %v4185_v34 = vmax.f32 %v4177_v29, 0.0  ;;  %v4164_v37 = vmul.f32 %v5887_v16, %v4149_v32  ;;  %v4178_v38 = vadd.f32 %v5888_v20, %v4163_v30 }
 0x725   : > { %v4150_v39 = vld [vmem:[#allocation3 + $0x20] sm:$0xff] }
 0x726   : > { %v4192_v40 = vpack.c.bf16 %v4185_v34, %v4184_v33  ;;  %v4179_v41 = vadd.f32 %v5888_v20, %v4164_v37  ;;  %v4165_v42 = vmul.f32 %v5887_v16, %v4150_v39  ;;  %v4186_v45 = vmax.f32 %v4178_v38, 0.0 }
 0x727   : > { %v4151_v43 = vld [vmem:[#allocation3 + $0x28] sm:$0xff] }
 0x728   : > { %6721 = vmatprep.mubr.msk.bf16.mxu1 %vm4235_vm10, %v4192_v40  ;;  %v4187_v46 = vmax.f32 %v4179_v41, 0.0  ;;  %v4166_v47 = vmul.f32 %v5887_v16, %v4151_v43  ;;  %v4180_v48 = vadd.f32 %v5888_v20, %v4165_v42  ;;  %v7236_v40 = vld [vmem:[%s8192_s19 + $0x8] sm:$0xff]   ;;  %v7237_v41 = vld [vmem:[%s8192_s19 + $0x10] ss:$0 sps:$4 sm:$0xff]  }
 0x729   : > { %v4152_v50 = vld [vmem:[#allocation3 + $0x30] sm:$0xff] }
 0x72a   : > { %v4193_v60 = vpack.c.bf16 %v4187_v46, %v4186_v45  ;;  %v4181_v61 = vadd.f32 %v5888_v20, %v4166_v47  ;;  %v4167_v51 = vmul.f32 %v5887_v16, %v4152_v50  ;;  %v4188_v53 = vmax.f32 %v4180_v48, 0.0 }
 0x72b   : > { %v4153_v52 = vld [vmem:[#allocation3 + $0x38] sm:$0xff]  ;;  %v4509_v50 = vsel %vm1877_vm5, %v7237_v41, 0 }
 0x72c   : > { %6722 = vmatmul.mubr.msk.bf16.vlgmr.msra.gmra.mrb[12].mxu1 %vm4235_vm10, %v4193_v60  ;;  %v4189_v54 = vmax.f32 %v4181_v61, 0.0  ;;  %v4168_v55 = vmul.f32 %v5887_v16, %v4153_v52  ;;  %v4182_v56 = vadd.f32 %v5888_v20, %v4167_v51  ;;  %v7238_v60 = vld [vmem:[%s8192_s19 + $0x78] sm:$0xff]   ;;  %v7239_v52 = vld [vmem:[%s8192_s19 + $0x80] sm:$0xff]  }
 0x72d   : > { %6730 = vmatpush3.bf16.msra.mxu1 %v7232_v2  ;;  %v7244_v2 = vld [vmem:[%s8192_s19 + $0x50] sm:$0xff]  }
 0x72e   : > { %v4194_v57 = vpack.c.bf16 %v4189_v54, %v4188_v53  ;;  %v4183_v58 = vadd.f32 %v5888_v20, %v4168_v55  ;;  %v4190_v63 = vmax.f32 %v4182_v56, 0.0  ;;  %6731 = vmatprep.subr.bf16.mxu1 %v7233_v3  ;;  %v7241_v56 = vld [vmem:[%s8192_s19 + $0x14] sm:$0xff]  }
 0x730   : > { %6725 = vmatprep.mubr.msk.bf16.mxu1 %vm4235_vm10, %v4194_v57  ;;  %v4191_v0 = vmax.f32 %v4183_v58, 0.0  ;;  %v7242_v57 = vld [vmem:[%s8192_s19 + $0x1c] sm:$0xff]   ;;  %v7243_v58 = vld [vmem:[%s8192_s19 + $0x24] ss:$0 sps:$4 sm:$0xff]  }
 0x731   : > { %6732 = vmatpush3.bf16.msra.mxu1 %v7233_v3 }
 0x732   : > { %v4195_v1 = vpack.c.bf16 %v4191_v0, %v4190_v63  ;;  %7133 = vmatprep.subr.msk.bf16.mxu1 %vm1877_vm5, %v7234_v4 }
 0x734   : > { %6726 = vmatmul.mubr.msk.bf16.gmra.mrb[16].mxu1 %vm4235_vm10, %v4195_v1  ;;  %v4753_v1 = vsel %vm1877_vm5, %v7243_v58, 0 }
 0x735   : > { %6734 = vmatpush3.bf16.msra.mxu1 %v4408_v5 }
 0x736   : > { %6743 = vmatprep.subr.bf16.mxu1 %v7235_v6 }
 0x7ff   : > { %v6723_v8 = vpop.f32.mrb[12].mxu1 }
 0x800   : > { %v4291_v26 = vadd.f32 %v6723_v8, %v5889_v7  ;;  %v4282_v18 = vpop.f32.mrb[13].mxu1  ;;  %v7245_v8 = vld [vmem:[%s8192_s19 + $0x58] sm:$0xff]  }
 0x801   : > { %v4283_v9 = vadd.f32 %v5889_v7, %v4282_v18  ;;  %v6724_v10 = vpop.f32.mrb[14].mxu1 }
 0x802   : > { %v4315_v11 = vmax.f32 %v4291_v26, 0.0  ;;  %v4294_v12 = vadd.f32 %v6724_v10, %v5889_v7  ;;  %v4285_v13 = vpop.f32.mrb[15].mxu1 }
 0x803   : > { %v4313_v14 = vmax.f32 %v4283_v9, 0.0  ;;  %v4286_v15 = vadd.f32 %v5889_v7, %v4285_v13 }
 0x804   : > { %4323 = vst.msk [vmem:[#allocation2 + $0x31] sm:$0xff] %vm656_vm1, %v4315_v11  ;;  %v4316_v16 = vmax.f32 %v4294_v12, 0.0  ;;  %v7247_v12 = vld [vmem:[%s8192_s19 + $0x8c] sm:$0xff]  }
 0x805   : > { %4321 = vst.msk [vmem:[#allocation2 + $0x11] sm:$0xff] %vm656_vm1, %v4313_v14  ;;  %v4314_v17 = vmax.f32 %v4286_v15, 0.0  ;;  %v7248_v15 = vld [vmem:[%s8192_s19 + $0x94] sm:$0xff]  }
 0x806   : > { %4324 = vst.msk [vmem:[#allocation2 + $0x41] sm:$0xff] %vm656_vm1, %v4316_v16 }
 0x807   : > { %4322 = vst.msk [vmem:[#allocation2 + $0x21] sm:$0xff] %vm656_vm1, %v4314_v17  ;;  %v6727_v19 = vpop.f32.mrb[16].mxu1  ;;  %v7249_v17 = vld [vmem:[%s8192_s19 + $0x9c] ss:$0 sps:$4 sm:$0xff]  }
 0x808   : > { %v4307_v20 = vadd.f32 %v6727_v19, %v5889_v7  ;;  %v4298_v23 = vpop.f32.mrb[17].mxu1 }
 0x809   : > { %v4299_v35 = vadd.f32 %v5889_v7, %v4298_v23  ;;  %v6728_v36 = vpop.f32.mrb[18].mxu1  ;;  %v4971_v23 = vsel %vm1877_vm5, %v7249_v17, 0 }
 0x80a   : > { %v4319_v24 = vmax.f32 %v4307_v20, 0.0  ;;  %v4310_v25 = vadd.f32 %v6728_v36, %v5889_v7  ;;  %v4301_v27 = vpop.f32.mrb[19].mxu1  ;;  %v7251_v36 = vld [vmem:[%s8192_s19 + $0x30] sm:$0xff]  }
 0x80b   : > { %v4317_v28 = vmax.f32 %v4299_v35, 0.0  ;;  %v4302_v29 = vadd.f32 %v5889_v7, %v4301_v27  ;;  %v4332_v37 = vld [vmem:[#allocation2 + $0x30] sm:$0xff]  ;;  %v7250_v35 = vld [vmem:[%s8192_s19 + $0x28] sm:$0xff]  }
 0x80c   : > { %4327 = vst.msk [vmem:[#allocation2 + $0x71] sm:$0xff] %vm656_vm1, %v4319_v24  ;;  %v4320_v30 = vmax.f32 %v4310_v25, 0.0  ;;  %v4330_v33 = vld [vmem:[#allocation2 + $0x10] sm:$0xff]  ;;  %v7252_v24 = vld [vmem:[%s8192_s19 + $0x38] ss:$0 sps:$4 sm:$0xff]  }
 0x80d   : > { %4325 = vst.msk [vmem:[#allocation2 + $0x51] sm:$0xff] %vm656_vm1, %v4317_v28  ;;  %v4318_v31 = vmax.f32 %v4302_v29, 0.0  ;;  %v4333_v32 = vld [vmem:[#allocation2 + $0x40] sm:$0xff]  ;;  %v6120_v61 = vpack.c.bf16 %v4330_v33, %v7832_v49  ;;  %v7240_v49 = vld [vmem:[%s8192_s19 + $0x88] ss:$0 sps:$4 sm:$0xff]   ;;  %v4680_v63 = vld [vmem:[#allocation2 + $0x11] sm:$0xff] }
 0x80e   : > { %4328 = vst.msk [vmem:[#allocation2 + $0x81] sm:$0xff] %vm656_vm1, %v4320_v30  ;;  %v4331_v34 = vld [vmem:[#allocation2 + $0x20] sm:$0xff]  ;;  %v6117_v39 = vpack.c.bf16 %v4333_v32, %v4332_v37  ;;  %v4604_v55 = vsel %vm1877_vm5, %v7240_v49, 0  ;;  %v6125_v3 = vpack.c.bf16 %v4680_v63, %v7858_v62  ;;  %v5047_v25 = vld [vmem:[#allocation2 + $0x12] sm:$0xff]  ;;  %v5120_v28 = vsel %vm1877_vm5, %v7252_v24, 0 }
 0x80f   : > { %4326 = vst.msk [vmem:[#allocation2 + $0x61] sm:$0xff] %vm656_vm1, %v4318_v31  ;;  %v6116_v38 = vpack.c.bf16 %v4331_v34, %v4330_v33  ;;  %v6121_v51 = vpack.c.bf16 %v4332_v37, %v4331_v34  ;;  %v4681_v4 = vld [vmem:[#allocation2 + $0x21] sm:$0xff]  ;;  %v7246_v62 = vld [vmem:[%s8192_s19 + $0x60] ss:$0 sps:$4 sm:$0xff]   ;;  %v6134_v30 = vpack.c.bf16 %v5047_v25, %v7894_v22  ;;  %v5049_v33 = vld [vmem:[#allocation2 + $0x32] sm:$0xff] }
 0x810   : > { %v4683_v7 = vld [vmem:[#allocation2 + $0x41] sm:$0xff]  ;;  %v4868_v11 = vsel %vm1877_vm5, %v7246_v62, 0  ;;  %v6129_v13 = vpack.c.bf16 %v4681_v4, %v4680_v63  ;;  %v7254_v37 = vld [vmem:[%s8192_s19 + $0x6c] sm:$0xff]   ;;  %v7255_v22 = vld [vmem:[%s8192_s19 + $0x74] ss:$0 sps:$4 sm:$0xff]  }
 0x811   : > { %6735 = vmatprep.mubr.msk.bf16.mxu1 %vm656_vm1, %v6116_v38  ;;  %v7253_v29 = vld [vmem:[%s8192_s19 + $0x64] sm:$0xff]  }
 0x812   : > { %6736 = vmatmul.mubr.msk.bf16.vlgmr.msra.gmra.mrb[20].mxu1 %vm656_vm1, %v6117_v39  ;;  %v5048_v31 = vld [vmem:[#allocation2 + $0x22] sm:$0xff] }
 0x813   : > { %6744 = vmatpush3.bf16.msra.mxu1 %v7235_v6  ;;  %v4336_v47 = vld [vmem:[#allocation2 + $0x70] sm:$0xff]  ;;  %v5050_v34 = vld [vmem:[#allocation2 + $0x42] sm:$0xff] }
 0x814   : > { %6745 = vmatprep.subr.bf16.mxu1 %v7236_v40  ;;  %v4334_v43 = vld [vmem:[#allocation2 + $0x50] sm:$0xff] }
 0x815   : > { %v4337_v42 = vld [vmem:[#allocation2 + $0x80] sm:$0xff]  ;;  %v6122_v53 = vpack.c.bf16 %v4334_v43, %v4333_v32  ;;  %v4684_v5 = vld [vmem:[#allocation2 + $0x51] sm:$0xff] }
 0x816   : > { %v4335_v45 = vld [vmem:[#allocation2 + $0x60] sm:$0xff]  ;;  %v6119_v48 = vpack.c.bf16 %v4337_v42, %v4336_v47  ;;  %v6124_v0 = vpack.c.bf16 %v7856_v59, %v4337_v42  ;;  %v4682_v6 = vld [vmem:[#allocation2 + $0x31] sm:$0xff]  ;;  %v6127_v26 = vpack.c.bf16 %v4684_v5, %v4683_v7  ;;  %v5235_v42 = vsel %vm1877_vm5, %v7255_v22, 0 }
 0x817   : > { %6746 = vmatpush3.bf16.msra.mxu1 %v7236_v40  ;;  %v6118_v46 = vpack.c.bf16 %v4335_v45, %v4334_v43  ;;  %v6123_v54 = vpack.c.bf16 %v4336_v47, %v4335_v45  ;;  %v6126_v59 = vpack.c.bf16 %v4682_v6, %v4681_v4  ;;  %v4685_v18 = vld [vmem:[#allocation2 + $0x61] sm:$0xff]  ;;  %v4686_v9 = vld [vmem:[#allocation2 + $0x71] sm:$0xff]  ;;  %v6130_v14 = vpack.c.bf16 %v4683_v7, %v4682_v6 }
 0x818   : > { %7134 = vmatprep.subr.msk.bf16.mxu1 %vm1877_vm5, %v7237_v41  ;;  %v6128_v10 = vpack.c.bf16 %v4686_v9, %v4685_v18  ;;  %v6131_v16 = vpack.c.bf16 %v4685_v18, %v4684_v5  ;;  %v4687_v19 = vld [vmem:[#allocation2 + $0x81] sm:$0xff]  ;;  %v5051_v32 = vld [vmem:[#allocation2 + $0x52] sm:$0xff]  ;;  %v6138_v45 = vpack.c.bf16 %v5048_v31, %v5047_v25 }
 0x819   : > { %6739 = vmatprep.mubr.msk.bf16.mxu1 %vm656_vm1, %v6118_v46  ;;  %v6132_v20 = vpack.c.bf16 %v4687_v19, %v4686_v9  ;;  %v6133_v27 = vpack.c.bf16 %v7892_v21, %v4687_v19  ;;  %v6135_v21 = vpack.c.bf16 %v5049_v33, %v5048_v31  ;;  %v6136_v38 = vpack.c.bf16 %v5051_v32, %v5050_v34  ;;  %v5052_v39 = vld [vmem:[#allocation2 + $0x62] sm:$0xff]  ;;  %v5053_v40 = vld [vmem:[#allocation2 + $0x72] sm:$0xff] }
 0x81a   : > { %6740 = vmatmul.mubr.msk.bf16.gmra.mrb[24].mxu1 %vm656_vm1, %v6119_v48  ;;  %v6137_v41 = vpack.c.bf16 %v5053_v40, %v5052_v39  ;;  %v7256_v43 = vld [vmem:[%s8192_s19 + $0xa0] sm:$0xff]   ;;  %v6139_v46 = vpack.c.bf16 %v5050_v34, %v5049_v33  ;;  %v7257_v47 = vld [vmem:[%s8192_s19 + $0xa8] sm:$0xff]   ;;  %v6140_v48 = vpack.c.bf16 %v5052_v39, %v5051_v32 }
 0x81b   : > { %6749 = vmatprep.mubr.msk.bf16.mxu1 %vm656_vm1, %v6120_v61  ;;  %6748 = vmatpush3.bf16.msra.mxu1 %v4509_v50  ;;  %v7258_v50 = vld [vmem:[%s8192_s19 + $0xb0] ss:$0 sps:$4 sm:$0xff]  }
 0x81c   : > { %6757 = vmatprep.subr.bf16.mxu1 %v7238_v60 }
 0x822   : > { %6750 = vmatmul.mubr.msk.bf16.vlgmr.msra.gmra.mrb[20].mxu1 %vm656_vm1, %v6121_v51 }
 0x823   : > { %6758 = vmatpush3.bf16.msra.mxu1 %v7238_v60  ;;  %6753 = vmatprep.mubr.msk.bf16.mxu1 %vm656_vm1, %v6122_v53  ;;  %v5054_v60 = vld [vmem:[#allocation2 + $0x82] sm:$0xff] }
 0x824   : > { %6759 = vmatprep.subr.bf16.mxu1 %v7239_v52  ;;  %v6141_v61 = vpack.c.bf16 %v5054_v60, %v5053_v40 }
 0x827   : > { %6760 = vmatpush3.bf16.msra.mxu1 %v7239_v52  ;;  %v6142_v52 = vpack.c.bf16 %v7919_v44, %v5054_v60 }
 0x828   : > { %7135 = vmatprep.subr.msk.bf16.mxu1 %vm1877_vm5, %v7240_v49 }
 0x82a   : > { %6754 = vmatmul.mubr.msk.bf16.gmra.mrb[24].mxu1 %vm656_vm1, %v6123_v54 }
 0x82b   : > { %6763 = vmatprep.mubr.msk.bf16.mxu1 %vm656_vm1, %v6121_v51  ;;  %6762 = vmatpush3.bf16.msra.mxu1 %v4604_v55  ;;  %v5338_v51 = vsel %vm1877_vm5, %v7258_v50, 0 }
 0x82c   : > { %6771 = vmatprep.subr.bf16.mxu1 %v7241_v56 }
 0x832   : > { %6764 = vmatmul.mubr.msk.bf16.vlgmr.msra.gmra.mrb[20].mxu1 %vm656_vm1, %v6122_v53  ;;  %v6028_v53 = vld [vmem:[%s8193_s20] ss:$0 sm:$0xff] }
 0x833   : > { %6772 = vmatpush3.bf16.msra.mxu1 %v7241_v56  ;;  %6767 = vmatprep.mubr.msk.bf16.mxu1 %vm656_vm1, %v6123_v54 }
 0x834   : > { %6773 = vmatprep.subr.bf16.mxu1 %v7242_v57 }
 0x837   : > { %6774 = vmatpush3.bf16.msra.mxu1 %v7242_v57 }
 0x838   : > { %7136 = vmatprep.subr.msk.bf16.mxu1 %vm1877_vm5, %v7243_v58 }
 0x83a   : > { %6768 = vmatmul.mubr.msk.bf16.gmra.mrb[24].mxu1 %vm656_vm1, %v6124_v0 }
 0x83b   : > { %6777 = vmatprep.mubr.msk.bf16.mxu1 %vm656_vm1, %v6125_v3  ;;  %6776 = vmatpush3.bf16.msra.mxu1 %v4753_v1 }
 0x83c   : > { %6785 = vmatprep.subr.bf16.mxu1 %v7244_v2 }
 0x842   : > { %6778 = vmatmul.mubr.msk.bf16.vlgmr.msra.gmra.mrb[20].mxu1 %vm656_vm1, %v6126_v59 }
 0x843   : > { %6786 = vmatpush3.bf16.msra.mxu1 %v7244_v2  ;;  %6781 = vmatprep.mubr.msk.bf16.mxu1 %vm656_vm1, %v6127_v26 }
 0x844   : > { %6787 = vmatprep.subr.bf16.mxu1 %v7245_v8 }
 0x847   : > { %6788 = vmatpush3.bf16.msra.mxu1 %v7245_v8 }
 0x848   : > { %7137 = vmatprep.subr.msk.bf16.mxu1 %vm1877_vm5, %v7246_v62 }
 0x84a   : > { %6782 = vmatmul.mubr.msk.bf16.gmra.mrb[24].mxu1 %vm656_vm1, %v6128_v10 }
 0x84b   : > { %6791 = vmatprep.mubr.msk.bf16.mxu1 %vm656_vm1, %v6129_v13  ;;  %6790 = vmatpush3.bf16.msra.mxu1 %v4868_v11 }
 0x84c   : > { %6799 = vmatprep.subr.bf16.mxu1 %v7247_v12 }
 0x852   : > { %6792 = vmatmul.mubr.msk.bf16.vlgmr.msra.gmra.mrb[20].mxu1 %vm656_vm1, %v6130_v14 }
 0x853   : > { %6800 = vmatpush3.bf16.msra.mxu1 %v7247_v12  ;;  %6795 = vmatprep.mubr.msk.bf16.mxu1 %vm656_vm1, %v6131_v16 }
 0x854   : > { %6801 = vmatprep.subr.bf16.mxu1 %v7248_v15 }
 0x857   : > { %6802 = vmatpush3.bf16.msra.mxu1 %v7248_v15 }
 0x858   : > { %7138 = vmatprep.subr.msk.bf16.mxu1 %vm1877_vm5, %v7249_v17 }
 0x85a   : > { %6796 = vmatmul.mubr.msk.bf16.gmra.mrb[24].mxu1 %vm656_vm1, %v6132_v20 }
 0x85b   : > { %6805 = vmatprep.mubr.msk.bf16.mxu1 %vm656_vm1, %v6126_v59  ;;  %6804 = vmatpush3.bf16.msra.mxu1 %v4971_v23 }
 0x85c   : > { %6813 = vmatprep.subr.bf16.mxu1 %v7250_v35 }
 0x862   : > { %6806 = vmatmul.mubr.msk.bf16.vlgmr.msra.gmra.mrb[20].mxu1 %vm656_vm1, %v6127_v26 }
 0x863   : > { %6814 = vmatpush3.bf16.msra.mxu1 %v7250_v35  ;;  %6809 = vmatprep.mubr.msk.bf16.mxu1 %vm656_vm1, %v6128_v10 }
 0x864   : > { %6815 = vmatprep.subr.bf16.mxu1 %v7251_v36 }
 0x867   : > { %6816 = vmatpush3.bf16.msra.mxu1 %v7251_v36 }
 0x868   : > { %7139 = vmatprep.subr.msk.bf16.mxu1 %vm1877_vm5, %v7252_v24 }
 0x86a   : > { %6810 = vmatmul.mubr.msk.bf16.gmra.mrb[24].mxu1 %vm656_vm1, %v6133_v27 }
 0x86b   : > { %6819 = vmatprep.mubr.msk.bf16.mxu1 %vm656_vm1, %v6134_v30  ;;  %6818 = vmatpush3.bf16.msra.mxu1 %v5120_v28 }
 0x86c   : > { %6827 = vmatprep.subr.bf16.mxu1 %v7253_v29 }
 0x872   : > { %6820 = vmatmul.mubr.msk.bf16.vlgmr.msra.gmra.mrb[20].mxu1 %vm656_vm1, %v6135_v21 }
 0x873   : > { %6828 = vmatpush3.bf16.msra.mxu1 %v7253_v29  ;;  %6823 = vmatprep.mubr.msk.bf16.mxu1 %vm656_vm1, %v6136_v38 }
 0x874   : > { %6829 = vmatprep.subr.bf16.mxu1 %v7254_v37 }
 0x877   : > { %6830 = vmatpush3.bf16.msra.mxu1 %v7254_v37 }
 0x878   : > { %7140 = vmatprep.subr.msk.bf16.mxu1 %vm1877_vm5, %v7255_v22 }
 0x87a   : > { %6824 = vmatmul.mubr.msk.bf16.gmra.mrb[24].mxu1 %vm656_vm1, %v6137_v41 }
 0x87b   : > { %6833 = vmatprep.mubr.msk.bf16.mxu1 %vm656_vm1, %v6138_v45  ;;  %6832 = vmatpush3.bf16.msra.mxu1 %v5235_v42 }
 0x87c   : > { %6841 = vmatprep.subr.bf16.mxu1 %v7256_v43 }
 0x882   : > { %6834 = vmatmul.mubr.msk.bf16.vlgmr.msra.gmra.mrb[20].mxu1 %vm656_vm1, %v6139_v46 }
 0x883   : > { %6842 = vmatpush3.bf16.msra.mxu1 %v7256_v43  ;;  %6837 = vmatprep.mubr.msk.bf16.mxu1 %vm656_vm1, %v6140_v48 }
 0x884   : > { %6843 = vmatprep.subr.bf16.mxu1 %v7257_v47 }
 0x887   : > { %6844 = vmatpush3.bf16.msra.mxu1 %v7257_v47 }
 0x888   : > { %7141 = vmatprep.subr.msk.bf16.mxu1 %vm1877_vm5, %v7258_v50 }
 0x88a   : > { %6838 = vmatmul.mubr.msk.bf16.gmra.mrb[24].mxu1 %vm656_vm1, %v6141_v61 }
 0x88b   : > { %6847 = vmatprep.mubr.msk.bf16.mxu1 %vm656_vm1, %v6135_v21  ;;  %6846 = vmatpush3.bf16.msra.mxu1 %v5338_v51 }
 0x892   : > { %6848 = vmatmul.mubr.msk.bf16.vlgmr.msra.gmra.mrb[20].mxu1 %vm656_vm1, %v6136_v38 }
 0x893   : > { %6851 = vmatprep.mubr.msk.bf16.mxu1 %vm656_vm1, %v6137_v41 }
 0x89a   : > { %6852 = vmatmul.mubr.msk.bf16.gmra.mrb[24].mxu1 %vm656_vm1, %v6142_v52 }
 0x965   : > { %v6849_v49 = vpop.f32.mrb[20].mxu1 }
 0x966   : > { %v5422_v54 = vadd.f32 %v6849_v49, %v6028_v53  ;;  %v5374_v55 = vpop.f32.mrb[21].mxu1 }
 0x967   : > { %v6850_v56 = vpop.f32.mrb[22].mxu1  ;;  %v5420_v58 = vadd.f32 %v6028_v53, %v5374_v55 }
 0x968   : > { %v5430_v57 = vmul.f32 2.0, %v5422_v54  ;;  %v5423_v63 = vadd.f32 %v6850_v56, %v6028_v53  ;;  %v5377_v0 = vpop.f32.mrb[23].mxu1 }
 0x969   : > { %v5421_v2 = vadd.f32 %v6028_v53, %v5377_v0  ;;  %v5428_v3 = vmul.f32 2.0, %v5420_v58 }
 0x96a   : > { %v5431_v1 = vmul.f32 2.0, %v5423_v63  ;;  %5448 = vrot.lane.b32.xlu0 %v5430_v57, %s7326_s24 }
 0x96b   : > { %v5429_v4 = vmul.f32 2.0, %v5421_v2 }
 0x96c   : > { %5450 = vrot.lane.b32.xlu1 %v5431_v1, %s7326_s24 }
 0x96d   : > { %v6853_v44 = vpop.f32.mrb[24].mxu1 }
 0x96e   : > { %5444 = vrot.lane.b32.xlu0 %v5428_v3, %s7326_s24  ;;  %v5390_v5 = vpop.f32.mrb[25].mxu1  ;;  %v5426_v8 = vadd.f32 %v6853_v44, %v6028_v53 }
 0x96f   : > { %v5424_v6 = vadd.f32 %v6028_v53, %v5390_v5  ;;  %v6854_v59 = vpop.f32.mrb[26].mxu1 }
 0x970   : > { %5446 = vrot.lane.b32.xlu1 %v5429_v4, %s7326_s24  ;;  %v5393_v7 = vpop.f32.mrb[27].mxu1  ;;  %v5427_v18 = vadd.f32 %v6854_v59, %v6028_v53  ;;  %v5434_v10 = vmul.f32 2.0, %v5426_v8 }
 0x971   : > { %v5432_v26 = vmul.f32 2.0, %v5424_v6  ;;  %v5425_v62 = vadd.f32 %v6028_v53, %v5393_v7 }
 0x972   : > { %v5435_v11 = vmul.f32 2.0, %v5427_v18 }
 0x973   : > { %v5433_v9 = vmul.f32 2.0, %v5425_v62  ;;  %5452 = vrot.lane.b32.xlu0 %v5432_v26, %s7326_s24 }
 0x975   : > { %5454 = vrot.lane.b32.xlu1 %v5433_v9, %s7326_s24 }
 0x977   : > { %5456 = vrot.lane.b32.xlu0 %v5434_v10, %s7326_s24 }
 0x979   : > { %5458 = vrot.lane.b32.xlu1 %v5435_v11, %s7326_s24  ;;  %s8126_s24 = scalar_lea.hbm %s8194_s21, %s6143_s1  ;;  %s7265_s1 = scalar_lea.vmem %s7264_s4, 2048 }
 0x97a   : > { %p7267_p1 = scmp.lt.s32.totalorder %s7265_s1, %s7259_s3 }
 0x97c   : > { %p7268_p2 = por %p7267_p1, %p7266_p0 }
 0x97e   : > { %p7269_p3 = pnand %p7268_p2, %p7262_p13 }
 0x9dc   : > { %v5449_v12 = vpop.permute.xlu0 %5448 }
 0x9dd   : > { %5471 = vst.msk [vmem:[#allocation3 + $0x10] sm:$0xff] %vm5468_vm11, %v5449_v12 }
 0x9de   : > { %v5451_v13 = vpop.permute.xlu1 %5450 }
 0x9df   : > { %5472 = vst.msk [vmem:[#allocation3 + $0x18] sm:$0xff] %vm5468_vm11, %v5451_v13 }
 0x9e0   : > { %v5445_v14 = vpop.permute.xlu0 %5444 }
 0x9e1   : > { %5469 = vst.msk [vmem:[#allocation3] sm:$0xff] %vm5468_vm11, %v5445_v14 }
 0x9e2   : > { %v5447_v15 = vpop.permute.xlu1 %5446 }
 0x9e3   : > { %5470 = vst.msk [vmem:[#allocation3 + $0x8] sm:$0xff] %vm5468_vm11, %v5447_v15 }
 0x9e4   : > { %v5479_v16 = vld [vmem:[#allocation3 + $0x10] sm:$0xff] }
 0x9e5   : > { %5487 = vst [vmem:[%s649_s30 + $0x10] sm:$0xff] %v5479_v16  ;;  %v5453_v17 = vpop.permute.xlu0 %5452 }
 0x9e6   : > { %v5480_v19 = vld [vmem:[#allocation3 + $0x18] sm:$0xff]  ;;  %5473 = vst.msk [vmem:[#allocation3 + $0x20] sm:$0xff] %vm5468_vm11, %v5453_v17 }
 0x9e7   : > { %5488 = vst [vmem:[%s649_s30 + $0x18] sm:$0xff] %v5480_v19  ;;  %v5455_v20 = vpop.permute.xlu1 %5454 }
 0x9e8   : > { %v5477_v23 = vld [vmem:[#allocation3] sm:$0xff]  ;;  %5474 = vst.msk [vmem:[#allocation3 + $0x28] sm:$0xff] %vm5468_vm11, %v5455_v20 }
 0x9e9   : > { %5485 = vst [vmem:[%s649_s30] sm:$0xff] %v5477_v23  ;;  %v5457_v35 = vpop.permute.xlu0 %5456 }
 0x9ea   : > { %v5478_v36 = vld [vmem:[#allocation3 + $0x8] sm:$0xff]  ;;  %5475 = vst.msk [vmem:[#allocation3 + $0x30] sm:$0xff] %vm5468_vm11, %v5457_v35 }
 0x9eb   : > { %5486 = vst [vmem:[%s649_s30 + $0x8] sm:$0xff] %v5478_v36  ;;  %v5459_v24 = vpop.permute.xlu1 %5458 }
 0x9ec   : > { %5476 = vst.msk [vmem:[#allocation3 + $0x38] sm:$0xff] %vm5468_vm11, %v5459_v24 }
 0x9ed   : > { %v5481_v25 = vld [vmem:[#allocation3 + $0x20] sm:$0xff] }
 0x9ee   : > { %5489 = vst [vmem:[%s649_s30 + $0x20] sm:$0xff] %v5481_v25 }
 0x9ef   : > { %v5482_v27 = vld [vmem:[#allocation3 + $0x28] sm:$0xff] }
 0x9f0   : > { %5490 = vst [vmem:[%s649_s30 + $0x28] sm:$0xff] %v5482_v27 }
 0x9f1   : > { %v5483_v28 = vld [vmem:[#allocation3 + $0x30] sm:$0xff] }
 0x9f2   : > { %5491 = vst [vmem:[%s649_s30 + $0x30] sm:$0xff] %v5483_v28 }
 0x9f3   : > { %v5484_v29 = vld [vmem:[#allocation3 + $0x38] sm:$0xff] }
 0x9f4   : > { %5492 = vst [vmem:[%s649_s30 + $0x38] sm:$0xff] %v5484_v29 }
 0x9f5   : > { %7272 = shalt.err (!%p7269_p3)
}
 0x9f6   : > { %s7273_s6 = scalar_lea.hbm %s8126_s24, 1024  ;;  %s7277_s7 = scalar_lea.hbm %s8194_s21, 2048 }
 0x9f7   : > { %p7274_p4 = scmp.ne.s32.totalorder %s8126_s24, %s7273_s6  ;;  %p7278_p9 = scmp.lt.u32.totalorder %s8126_s24, %s8194_s21 }
 0x9f8   : > { %p7279_p10 = scmp.lt.u32.totalorder %s7277_s7, %s7273_s6  ;;  %p7281_p12 = scmp.lt.u32.totalorder %s7273_s6, %s8126_s24 }
 0x9f9   : > { %p7275_p7 = pnand %p7274_p4, %p7478_p5 }
 0x9fa   : > { %p7280_p11 = por %p7279_p10, %p7278_p9 }
 0x9fb   : > { %p7276_p8 = pneg %p7275_p7 }
 0x9fc   : > { %p7282_p13 = por %p7281_p12, %p7280_p11 }
 0x9fe   : > { %p7283_p0 = pnand %p7282_p13, %p7276_p8 }
 0xa00   : > { %7286 = shalt.err (!%p7283_p0)
}
 0xa01   : > { %s7328_s3 = smov 128   ;;  %s7329_s1 = smov 8  }
 0xa02   : > { %7142 = dma.vmem_to_hbm [thread:$0]  (%p7478_p5), %s8128_s0, 1024, %s8126_s24, %s8132_s26, %s7328_s3, %s7328_s3, %s7329_s1  }
 0xa03 PF: > { %p7148_p1 = scmp.ge.s32.totalorder %s7321_s27, 2  ;;  %s5522_s8 = sand.u32 1, %s7309_s2  }
 0xa04   : > { %s5523_s6 = scalar_lea.sflag [#allocation5], %s5522_s8 }
 0xa05   : > { %p7145_p2 = pnand %p7148_p1, %p7482_p6 }
 0xa07   : > { %7304 = dma.done.wait (!%p7145_p2), %s5523_s6, 1024  }
 0xa08   : > { %7306 = vsyncadd (!%p7145_p2), %s5523_s6, 4294966272  ;;  %s8221_s30 = sld [smem:[#allocation7_spill]]  ;;  %s8222_s26 = sld [smem:[#allocation8_spill]] }
 0xa09   : > { %p31_p3 = scmp.ge.s32.totalorder %s7465_s29, 4   ;;  %s8223_s2 = smov %s7313_s25 }
 0xa0a   : > { %s8225_s27 = smov %s7465_s29 }
 0xa0b   :  { %33 = sbr.rel (!%p31_p3) target bundleno = 13 (0xd), region = 172 }
 0xa0e   : > { %s8224_s25 = smov %s8221_s30 }
 0xa12   :  { %5528 = vsyncpa [#allocation5], 1 }
 0xa13   :  { %5530 = vsyncpa [#allocation5 + $0x1], 1 }

</bundles_post_ra>
